<compile_context>
chip_gen: v6e
topology: v6e:2x2x1
jax: 0.10.0
libtpu: 0.0.40
codegen_flags: <defaults>
</compile_context>

<pallas_src>
import math

import jax
import jax.numpy as jnp
from jax import lax
from jax.experimental import pallas as pl
from jax.experimental.pallas import tpu as pltpu

HIDDEN_SIZE = 5
INPUT_SIZE = 5

GP = 128          # lanes per gate after padding (one vreg lane-tile per gate)
NGATE = 4
GW = NGATE * GP   # 512 padded gate width; column order [i, f, o, g]


# ----------------------------------------------------------------------------
# Kernel
# ----------------------------------------------------------------------------
def bilstm_kernel(pre_ref,      # (T, 2B, GW)  precomputed x@W_ih + b, fwd rows then bwd rows
                  h0_ref,       # (2B, 2*GP)   block-diag initial hidden state
                  c0_ref,       # (2B, GP)     initial cell state (lanes >= H are 0)
                  whh_ref,      # (2*GP, GW)   block-diag hidden weights (fwd rows 0:H, bwd rows GP:GP+H)
                  dmask_ref,    # (2B, 2*GP)   direction mask for rebuilding the block-diag h
                  wh_ref,       # (2*GP, 2)    fused fc1/fc2 weights (col 0 = price, col 1 = volume)
                  bh_ref,       # (1, 2)       fused fc biases
                  out_ref):     # (B, 2)       [price | volume]
    T = pre_ref.shape[0]
    B = h0_ref.shape[0] // 2

    # Loop-invariant loads (hoisted once).
    whh = whh_ref[...]
    dmask = dmask_ref[...]

    h2 = h0_ref[...]            # (2B, 2*GP) block-diagonal hidden state
    c = c0_ref[...]             # (2B, GP)

    # Fully unrolled recurrence (T is static) — one fused fwd+bwd step per t.
    for t in range(T):
        # Single MXU matmul covers both directions via the block-diag layout.
        gates = pre_ref[t] + jnp.dot(h2, whh, preferred_element_type=jnp.float32)  # (2B, GW)

        # Gate order [i, f, o, g]: one sigmoid over the contiguous i/f/o region,
        # one tanh over g — all slices are 128-lane aligned.
        sg = jax.nn.sigmoid(gates[:, : 3 * GP])
        g_g = jnp.tanh(gates[:, 3 * GP:])
        i_g = sg[:, 0:GP]
        f_g = sg[:, GP:2 * GP]
        o_g = sg[:, 2 * GP:3 * GP]

        c = f_g * c + i_g * g_g                      # (2B, GP); pad lanes stay 0
        h = o_g * jnp.tanh(c)                        # (2B, GP)
        # Rebuild block-diagonal state: fwd rows keep lanes [0,GP), bwd rows [GP,2GP).
        h2 = jnp.concatenate([h, h], axis=1) * dmask  # (2B, 2*GP)

    # Fused heads: forward rows contribute h_f @ W[:GP], backward rows h_b @ W[GP:];
    # summing the two row-halves realizes concat([h_f, h_b]) @ W without a lane concat.
    head = jnp.dot(h2, wh_ref[...], preferred_element_type=jnp.float32)  # (2B, 2)
    out_ref[...] = head[:B, :] + head[B:, :] + bh_ref[...]


# ----------------------------------------------------------------------------
# Parameters (PyTorch layout) + kernel-layout prepacking
# ----------------------------------------------------------------------------
def init_params(key):
    """PyTorch-layout parameters for nn.LSTM x2 and nn.Linear x2."""
    H, I = HIDDEN_SIZE, INPUT_SIZE
    k_lstm = 1.0 / math.sqrt(H)
    k_fc = 1.0 / math.sqrt(2 * H)
    keys = jax.random.split(key, 12)
    u = lambda k, shape, s: jax.random.uniform(k, shape, jnp.float32, -s, s)
    return dict(
        w_ih_f=u(keys[0], (4 * H, I), k_lstm), w_hh_f=u(keys[1], (4 * H, H), k_lstm),
        b_ih_f=u(keys[2], (4 * H,), k_lstm),   b_hh_f=u(keys[3], (4 * H,), k_lstm),
        w_ih_b=u(keys[4], (4 * H, I), k_lstm), w_hh_b=u(keys[5], (4 * H, H), k_lstm),
        b_ih_b=u(keys[6], (4 * H,), k_lstm),   b_hh_b=u(keys[7], (4 * H,), k_lstm),
        fc1_w=u(keys[8], (1, 2 * H), k_fc),    fc1_b=u(keys[9], (1,), k_fc),
        fc2_w=u(keys[10], (1, 2 * H), k_fc),   fc2_b=u(keys[11], (1,), k_fc),
    )


def _pack_gate_matrix(w):
    """(4H, K) PyTorch gate rows [i,f,g,o] -> (K, GW) padded cols in order [i,f,o,g]."""
    H = HIDDEN_SIZE
    K = w.shape[1]
    wi, wf, wg, wo = w[0:H], w[H:2 * H], w[2 * H:3 * H], w[3 * H:4 * H]
    out = jnp.zeros((K, GW), jnp.float32)
    for slot, blk in enumerate((wi, wf, wo, wg)):
        out = out.at[:, slot * GP: slot * GP + H].set(blk.T)
    return out


def _pack_gate_vector(b):
    """(4H,) PyTorch gate order [i,f,g,o] -> (GW,) padded, order [i,f,o,g]."""
    H = HIDDEN_SIZE
    bi, bf, bg, bo = b[0:H], b[H:2 * H], b[2 * H:3 * H], b[3 * H:4 * H]
    out = jnp.zeros((GW,), jnp.float32)
    for slot, blk in enumerate((bi, bf, bo, bg)):
        out = out.at[slot * GP: slot * GP + H].set(blk)
    return out


def prepack_params(p):
    """Convert PyTorch-layout params into the padded / fused kernel layout."""
    H = HIDDEN_SIZE
    wx_f = _pack_gate_matrix(p["w_ih_f"])                       # (I, GW)
    wx_b = _pack_gate_matrix(p["w_ih_b"])
    bx_f = _pack_gate_vector(p["b_ih_f"] + p["b_hh_f"])         # (GW,)
    bx_b = _pack_gate_vector(p["b_ih_b"] + p["b_hh_b"])

    whh_f = _pack_gate_matrix(p["w_hh_f"])                      # (H, GW)
    whh_b = _pack_gate_matrix(p["w_hh_b"])
    whh_bd = jnp.zeros((2 * GP, GW), jnp.float32)
    whh_bd = whh_bd.at[0:H].set(whh_f).at[GP:GP + H].set(whh_b)

    # Fused heads: fc weight (1, 2H); first H cols act on h_f, last H on h_b.
    w_heads = jnp.zeros((2 * GP, 2), jnp.float32)
    w_heads = w_heads.at[0:H, 0].set(p["fc1_w"][0, :H])
    w_heads = w_heads.at[GP:GP + H, 0].set(p["fc1_w"][0, H:])
    w_heads = w_heads.at[0:H, 1].set(p["fc2_w"][0, :H])
    w_heads = w_heads.at[GP:GP + H, 1].set(p["fc2_w"][0, H:])
    b_heads = jnp.stack([p["fc1_b"][0], p["fc2_b"][0]]).reshape(1, 2)

    return dict(wx_f=wx_f, wx_b=wx_b, bx_f=bx_f, bx_b=bx_b,
                whh_bd=whh_bd, w_heads=w_heads, b_heads=b_heads)


# ----------------------------------------------------------------------------
# Wrapper
# ----------------------------------------------------------------------------
def bilstm_forward(x, h0_f, c0_f, h0_b, c0_b, packed):
    """x: (B, 1, T, I); h0_*/c0_*: (1, B, H)  -- matches the PyTorch signature."""
    H = HIDDEN_SIZE
    x = jnp.squeeze(x, axis=1).astype(jnp.float32)          # (B, T, I)
    B, T, _ = x.shape
    x_tmaj = jnp.transpose(x, (1, 0, 2))                    # (T, B, I)

    # Hoisted input projection (outside the serial recurrence): one XLA matmul
    # per direction, bias folded in. Backward direction consumes the reversed sequence.
    pre_f = jnp.einsum("tbi,ig->tbg", x_tmaj, packed["wx_f"]) + packed["bx_f"]
    pre_b = jnp.einsum("tbi,ig->tbg", x_tmaj[::-1], packed["wx_b"]) + packed["bx_b"]
    pre = jnp.concatenate([pre_f, pre_b], axis=1)           # (T, 2B, GW)

    # Block-diagonal stacked initial states: rows [0,B)=forward, [B,2B)=backward.
    h2_0 = jnp.zeros((2 * B, 2 * GP), jnp.float32)
    h2_0 = h2_0.at[:B, 0:H].set(h0_f[0]).at[B:, GP:GP + H].set(h0_b[0])
    c_0 = jnp.zeros((2 * B, GP), jnp.float32)
    c_0 = c_0.at[:B, 0:H].set(c0_f[0]).at[B:, 0:H].set(c0_b[0])
    dmask = jnp.zeros((2 * B, 2 * GP), jnp.float32)
    dmask = dmask.at[:B, 0:GP].set(1.0).at[B:, GP:].set(1.0)

    vmem = lambda: pl.BlockSpec(memory_space=pltpu.MemorySpace.VMEM)
    out = pl.pallas_call(
        bilstm_kernel,
        out_shape=jax.ShapeDtypeStruct((B, 2), jnp.float32),
        in_specs=[vmem() for _ in range(7)],
        out_specs=vmem(),
    )(pre, h2_0, c_0, packed["whh_bd"], dmask, packed["w_heads"], packed["b_heads"])

    price = out[:, 0:1]
    volume = out[:, 1:2]
    return price, volume


# ----------------------------------------------------------------------------
# Pure-JAX reference (PyTorch semantics, unpacked params) for correctness check
# ----------------------------------------------------------------------------
def bilstm_reference(x, h0_f, c0_f, h0_b, c0_b, p):
    H = HIDDEN_SIZE
    x = jnp.squeeze(x, axis=1)                              # (B, T, I)

    def run(x_seq, h0, c0, w_ih, w_hh, b_ih, b_hh):
        def step(carry, xt):
            h, c = carry
            gates = xt @ w_ih.T + b_ih + h @ w_hh.T + b_hh  # (B, 4H), order [i,f,g,o]
            i = jax.nn.sigmoid(gates[:, 0:H])
            f = jax.nn.sigmoid(gates[:, H:2 * H])
            g = jnp.tanh(gates[:, 2 * H:3 * H])
            o = jax.nn.sigmoid(gates[:, 3 * H:4 * H])
            c = f * c + i * g
            h = o * jnp.tanh(c)
            return (h, c), None
        (h, _), _ = lax.scan(step, (h0, c0), jnp.transpose(x_seq, (1, 0, 2)))
        return h

    h_f = run(x, h0_f[0], c0_f[0], p["w_ih_f"], p["w_hh_f"], p["b_ih_f"], p["b_hh_f"])
    h_b = run(jnp.flip(x, axis=1), h0_b[0], c0_b[0],
              p["w_ih_b"], p["w_hh_b"], p["b_ih_b"], p["b_hh_b"])
    h = jnp.concatenate([h_f, h_b], axis=1)
    price = h @ p["fc1_w"].T + p["fc1_b"]
    volume = h @ p["fc2_w"].T + p["fc2_b"]
    return price, volume


if __name__ == "__main__":
    B, T = 2, 8
    key = jax.random.PRNGKey(0)
    kx, kh1, kc1, kh2, kc2 = jax.random.split(key, 5)

    x = jax.random.normal(kx, (B, 1, T, INPUT_SIZE), jnp.float32)
    h0_f = jax.random.normal(kh1, (1, B, HIDDEN_SIZE), jnp.float32)
    c0_f = jax.random.normal(kc1, (1, B, HIDDEN_SIZE), jnp.float32)
    h0_b = jax.random.normal(kh2, (1, B, HIDDEN_SIZE), jnp.float32)
    c0_b = jax.random.normal(kc2, (1, B, HIDDEN_SIZE), jnp.float32)

    params = init_params(jax.random.PRNGKey(42))
    packed = prepack_params(params)

    price, volume = bilstm_forward(x, h0_f, c0_f, h0_b, c0_b, packed)
    jax.block_until_ready((price, volume))

    price_ref, volume_ref = bilstm_reference(x, h0_f, c0_f, h0_b, c0_b, params)
    assert jnp.allclose(price, price_ref, atol=1e-5), "price mismatch vs reference"
    assert jnp.allclose(volume, volume_ref, atol=1e-5), "volume mismatch vs reference"

    print("KERNEL_OK")
</pallas_src>

<mosaic_0001>
module attributes {stable_mosaic.version = 11 : i64} {
  func.func @bilstm_kernel(%arg0: memref<8x4x512xf32, #tpu.memory_space<vmem>>, %arg1: memref<4x256xf32, #tpu.memory_space<vmem>>, %arg2: memref<4x128xf32, #tpu.memory_space<vmem>>, %arg3: memref<256x512xf32, #tpu.memory_space<vmem>>, %arg4: memref<4x256xf32, #tpu.memory_space<vmem>>, %arg5: memref<256x2xf32, #tpu.memory_space<vmem>>, %arg6: memref<1x2xf32, #tpu.memory_space<vmem>>, %arg7: memref<2x2xf32, #tpu.memory_space<vmem>>) attributes {dimension_semantics = [], scalar_prefetch = 0 : i64, scratch_operands = 0 : i64, tpu.core_type = #tpu.core_type<tc>} {
    %c0 = arith.constant 0 : index
    %c0_0 = arith.constant 0 : index
    %0 = vector.load %arg3[%c0, %c0_0] : memref<256x512xf32, #tpu.memory_space<vmem>>, vector<256x512xf32>
    %c0_1 = arith.constant 0 : index
    %c0_2 = arith.constant 0 : index
    %1 = vector.load %arg4[%c0_1, %c0_2] : memref<4x256xf32, #tpu.memory_space<vmem>>, vector<4x256xf32>
    %c0_3 = arith.constant 0 : index
    %c0_4 = arith.constant 0 : index
    %2 = vector.load %arg1[%c0_3, %c0_4] : memref<4x256xf32, #tpu.memory_space<vmem>>, vector<4x256xf32>
    %c0_5 = arith.constant 0 : index
    %c0_6 = arith.constant 0 : index
    %3 = vector.load %arg2[%c0_5, %c0_6] : memref<4x128xf32, #tpu.memory_space<vmem>>, vector<4x128xf32>
    %c0_7 = arith.constant 0 : index
    %c0_8 = arith.constant 0 : index
    %c0_9 = arith.constant 0 : index
    %4 = vector.load %arg0[%c0_7, %c0_8, %c0_9] : memref<8x4x512xf32, #tpu.memory_space<vmem>>, vector<1x4x512xf32>
    %5 = vector.shape_cast %4 : vector<1x4x512xf32> to vector<4x512xf32>
    %cst = arith.constant dense<0.000000e+00> : vector<4x512xf32>
    %6 = tpu.matmul %2, %0, %cst {dimension_numbers = #tpu.dot_dimension_numbers<[1], [0], [0], [1], [0, 0, 1, 1], [], []>} : vector<4x256xf32>, vector<256x512xf32>, vector<4x512xf32> -> vector<4x512xf32>
    %7 = arith.addf %5, %6 : vector<4x512xf32>
    %8 = vector.extract_strided_slice %7 {offsets = [0, 0], sizes = [4, 384], strides = [1, 1]} : vector<4x512xf32> to vector<4x384xf32>
    %9 = arith.negf %8 : vector<4x384xf32>
    %10 = math.exp %9 : vector<4x384xf32>
    %cst_10 = arith.constant 1.000000e+00 : f32
    %11 = vector.broadcast %cst_10 : f32 to vector<4x384xf32>
    %12 = arith.addf %11, %10 : vector<4x384xf32>
    %13 = arith.divf %11, %12 : vector<4x384xf32>
    %14 = vector.extract_strided_slice %7 {offsets = [0, 384], sizes = [4, 128], strides = [1, 1]} : vector<4x512xf32> to vector<4x128xf32>
    %15 = math.tanh %14 : vector<4x128xf32>
    %16 = vector.extract_strided_slice %13 {offsets = [0, 0], sizes = [4, 128], strides = [1, 1]} : vector<4x384xf32> to vector<4x128xf32>
    %17 = vector.extract_strided_slice %13 {offsets = [0, 128], sizes = [4, 128], strides = [1, 1]} : vector<4x384xf32> to vector<4x128xf32>
    %18 = vector.extract_strided_slice %13 {offsets = [0, 256], sizes = [4, 128], strides = [1, 1]} : vector<4x384xf32> to vector<4x128xf32>
    %19 = arith.mulf %17, %3 : vector<4x128xf32>
    %20 = arith.mulf %16, %15 : vector<4x128xf32>
    %21 = arith.addf %19, %20 : vector<4x128xf32>
    %22 = math.tanh %21 : vector<4x128xf32>
    %23 = arith.mulf %18, %22 : vector<4x128xf32>
    %24 = tpu.concatenate %23, %23 in 1 : vector<4x128xf32>, vector<4x128xf32> -> vector<4x256xf32>
    %25 = arith.mulf %24, %1 : vector<4x256xf32>
    %c1 = arith.constant 1 : index
    %c0_11 = arith.constant 0 : index
    %c0_12 = arith.constant 0 : index
    %26 = vector.load %arg0[%c1, %c0_11, %c0_12] : memref<8x4x512xf32, #tpu.memory_space<vmem>>, vector<1x4x512xf32>
    %27 = vector.shape_cast %26 : vector<1x4x512xf32> to vector<4x512xf32>
    %cst_13 = arith.constant dense<0.000000e+00> : vector<4x512xf32>
    %28 = tpu.matmul %25, %0, %cst_13 {dimension_numbers = #tpu.dot_dimension_numbers<[1], [0], [0], [1], [0, 0, 1, 1], [], []>} : vector<4x256xf32>, vector<256x512xf32>, vector<4x512xf32> -> vector<4x512xf32>
    %29 = arith.addf %27, %28 : vector<4x512xf32>
    %30 = vector.extract_strided_slice %29 {offsets = [0, 0], sizes = [4, 384], strides = [1, 1]} : vector<4x512xf32> to vector<4x384xf32>
    %31 = arith.negf %30 : vector<4x384xf32>
    %32 = math.exp %31 : vector<4x384xf32>
    %cst_14 = arith.constant 1.000000e+00 : f32
    %33 = vector.broadcast %cst_14 : f32 to vector<4x384xf32>
    %34 = arith.addf %33, %32 : vector<4x384xf32>
    %35 = arith.divf %33, %34 : vector<4x384xf32>
    %36 = vector.extract_strided_slice %29 {offsets = [0, 384], sizes = [4, 128], strides = [1, 1]} : vector<4x512xf32> to vector<4x128xf32>
    %37 = math.tanh %36 : vector<4x128xf32>
    %38 = vector.extract_strided_slice %35 {offsets = [0, 0], sizes = [4, 128], strides = [1, 1]} : vector<4x384xf32> to vector<4x128xf32>
    %39 = vector.extract_strided_slice %35 {offsets = [0, 128], sizes = [4, 128], strides = [1, 1]} : vector<4x384xf32> to vector<4x128xf32>
    %40 = vector.extract_strided_slice %35 {offsets = [0, 256], sizes = [4, 128], strides = [1, 1]} : vector<4x384xf32> to vector<4x128xf32>
    %41 = arith.mulf %39, %21 : vector<4x128xf32>
    %42 = arith.mulf %38, %37 : vector<4x128xf32>
    %43 = arith.addf %41, %42 : vector<4x128xf32>
    %44 = math.tanh %43 : vector<4x128xf32>
    %45 = arith.mulf %40, %44 : vector<4x128xf32>
    %46 = tpu.concatenate %45, %45 in 1 : vector<4x128xf32>, vector<4x128xf32> -> vector<4x256xf32>
    %47 = arith.mulf %46, %1 : vector<4x256xf32>
    %c2 = arith.constant 2 : index
    %c0_15 = arith.constant 0 : index
    %c0_16 = arith.constant 0 : index
    %48 = vector.load %arg0[%c2, %c0_15, %c0_16] : memref<8x4x512xf32, #tpu.memory_space<vmem>>, vector<1x4x512xf32>
    %49 = vector.shape_cast %48 : vector<1x4x512xf32> to vector<4x512xf32>
    %cst_17 = arith.constant dense<0.000000e+00> : vector<4x512xf32>
    %50 = tpu.matmul %47, %0, %cst_17 {dimension_numbers = #tpu.dot_dimension_numbers<[1], [0], [0], [1], [0, 0, 1, 1], [], []>} : vector<4x256xf32>, vector<256x512xf32>, vector<4x512xf32> -> vector<4x512xf32>
    %51 = arith.addf %49, %50 : vector<4x512xf32>
    %52 = vector.extract_strided_slice %51 {offsets = [0, 0], sizes = [4, 384], strides = [1, 1]} : vector<4x512xf32> to vector<4x384xf32>
    %53 = arith.negf %52 : vector<4x384xf32>
    %54 = math.exp %53 : vector<4x384xf32>
    %cst_18 = arith.constant 1.000000e+00 : f32
    %55 = vector.broadcast %cst_18 : f32 to vector<4x384xf32>
    %56 = arith.addf %55, %54 : vector<4x384xf32>
    %57 = arith.divf %55, %56 : vector<4x384xf32>
    %58 = vector.extract_strided_slice %51 {offsets = [0, 384], sizes = [4, 128], strides = [1, 1]} : vector<4x512xf32> to vector<4x128xf32>
    %59 = math.tanh %58 : vector<4x128xf32>
    %60 = vector.extract_strided_slice %57 {offsets = [0, 0], sizes = [4, 128], strides = [1, 1]} : vector<4x384xf32> to vector<4x128xf32>
    %61 = vector.extract_strided_slice %57 {offsets = [0, 128], sizes = [4, 128], strides = [1, 1]} : vector<4x384xf32> to vector<4x128xf32>
    %62 = vector.extract_strided_slice %57 {offsets = [0, 256], sizes = [4, 128], strides = [1, 1]} : vector<4x384xf32> to vector<4x128xf32>
    %63 = arith.mulf %61, %43 : vector<4x128xf32>
    %64 = arith.mulf %60, %59 : vector<4x128xf32>
    %65 = arith.addf %63, %64 : vector<4x128xf32>
    %66 = math.tanh %65 : vector<4x128xf32>
    %67 = arith.mulf %62, %66 : vector<4x128xf32>
    %68 = tpu.concatenate %67, %67 in 1 : vector<4x128xf32>, vector<4x128xf32> -> vector<4x256xf32>
    %69 = arith.mulf %68, %1 : vector<4x256xf32>
    %c3 = arith.constant 3 : index
    %c0_19 = arith.constant 0 : index
    %c0_20 = arith.constant 0 : index
    %70 = vector.load %arg0[%c3, %c0_19, %c0_20] : memref<8x4x512xf32, #tpu.memory_space<vmem>>, vector<1x4x512xf32>
    %71 = vector.shape_cast %70 : vector<1x4x512xf32> to vector<4x512xf32>
    %cst_21 = arith.constant dense<0.000000e+00> : vector<4x512xf32>
    %72 = tpu.matmul %69, %0, %cst_21 {dimension_numbers = #tpu.dot_dimension_numbers<[1], [0], [0], [1], [0, 0, 1, 1], [], []>} : vector<4x256xf32>, vector<256x512xf32>, vector<4x512xf32> -> vector<4x512xf32>
    %73 = arith.addf %71, %72 : vector<4x512xf32>
    %74 = vector.extract_strided_slice %73 {offsets = [0, 0], sizes = [4, 384], strides = [1, 1]} : vector<4x512xf32> to vector<4x384xf32>
    %75 = arith.negf %74 : vector<4x384xf32>
    %76 = math.exp %75 : vector<4x384xf32>
    %cst_22 = arith.constant 1.000000e+00 : f32
    %77 = vector.broadcast %cst_22 : f32 to vector<4x384xf32>
    %78 = arith.addf %77, %76 : vector<4x384xf32>
    %79 = arith.divf %77, %78 : vector<4x384xf32>
    %80 = vector.extract_strided_slice %73 {offsets = [0, 384], sizes = [4, 128], strides = [1, 1]} : vector<4x512xf32> to vector<4x128xf32>
    %81 = math.tanh %80 : vector<4x128xf32>
    %82 = vector.extract_strided_slice %79 {offsets = [0, 0], sizes = [4, 128], strides = [1, 1]} : vector<4x384xf32> to vector<4x128xf32>
    %83 = vector.extract_strided_slice %79 {offsets = [0, 128], sizes = [4, 128], strides = [1, 1]} : vector<4x384xf32> to vector<4x128xf32>
    %84 = vector.extract_strided_slice %79 {offsets = [0, 256], sizes = [4, 128], strides = [1, 1]} : vector<4x384xf32> to vector<4x128xf32>
    %85 = arith.mulf %83, %65 : vector<4x128xf32>
    %86 = arith.mulf %82, %81 : vector<4x128xf32>
    %87 = arith.addf %85, %86 : vector<4x128xf32>
    %88 = math.tanh %87 : vector<4x128xf32>
    %89 = arith.mulf %84, %88 : vector<4x128xf32>
    %90 = tpu.concatenate %89, %89 in 1 : vector<4x128xf32>, vector<4x128xf32> -> vector<4x256xf32>
    %91 = arith.mulf %90, %1 : vector<4x256xf32>
    %c4 = arith.constant 4 : index
    %c0_23 = arith.constant 0 : index
    %c0_24 = arith.constant 0 : index
    %92 = vector.load %arg0[%c4, %c0_23, %c0_24] : memref<8x4x512xf32, #tpu.memory_space<vmem>>, vector<1x4x512xf32>
    %93 = vector.shape_cast %92 : vector<1x4x512xf32> to vector<4x512xf32>
    %cst_25 = arith.constant dense<0.000000e+00> : vector<4x512xf32>
    %94 = tpu.matmul %91, %0, %cst_25 {dimension_numbers = #tpu.dot_dimension_numbers<[1], [0], [0], [1], [0, 0, 1, 1], [], []>} : vector<4x256xf32>, vector<256x512xf32>, vector<4x512xf32> -> vector<4x512xf32>
    %95 = arith.addf %93, %94 : vector<4x512xf32>
    %96 = vector.extract_strided_slice %95 {offsets = [0, 0], sizes = [4, 384], strides = [1, 1]} : vector<4x512xf32> to vector<4x384xf32>
    %97 = arith.negf %96 : vector<4x384xf32>
    %98 = math.exp %97 : vector<4x384xf32>
    %cst_26 = arith.constant 1.000000e+00 : f32
    %99 = vector.broadcast %cst_26 : f32 to vector<4x384xf32>
    %100 = arith.addf %99, %98 : vector<4x384xf32>
    %101 = arith.divf %99, %100 : vector<4x384xf32>
    %102 = vector.extract_strided_slice %95 {offsets = [0, 384], sizes = [4, 128], strides = [1, 1]} : vector<4x512xf32> to vector<4x128xf32>
    %103 = math.tanh %102 : vector<4x128xf32>
    %104 = vector.extract_strided_slice %101 {offsets = [0, 0], sizes = [4, 128], strides = [1, 1]} : vector<4x384xf32> to vector<4x128xf32>
    %105 = vector.extract_strided_slice %101 {offsets = [0, 128], sizes = [4, 128], strides = [1, 1]} : vector<4x384xf32> to vector<4x128xf32>
    %106 = vector.extract_strided_slice %101 {offsets = [0, 256], sizes = [4, 128], strides = [1, 1]} : vector<4x384xf32> to vector<4x128xf32>
    %107 = arith.mulf %105, %87 : vector<4x128xf32>
    %108 = arith.mulf %104, %103 : vector<4x128xf32>
    %109 = arith.addf %107, %108 : vector<4x128xf32>
    %110 = math.tanh %109 : vector<4x128xf32>
    %111 = arith.mulf %106, %110 : vector<4x128xf32>
    %112 = tpu.concatenate %111, %111 in 1 : vector<4x128xf32>, vector<4x128xf32> -> vector<4x256xf32>
    %113 = arith.mulf %112, %1 : vector<4x256xf32>
    %c5 = arith.constant 5 : index
    %c0_27 = arith.constant 0 : index
    %c0_28 = arith.constant 0 : index
    %114 = vector.load %arg0[%c5, %c0_27, %c0_28] : memref<8x4x512xf32, #tpu.memory_space<vmem>>, vector<1x4x512xf32>
    %115 = vector.shape_cast %114 : vector<1x4x512xf32> to vector<4x512xf32>
    %cst_29 = arith.constant dense<0.000000e+00> : vector<4x512xf32>
    %116 = tpu.matmul %113, %0, %cst_29 {dimension_numbers = #tpu.dot_dimension_numbers<[1], [0], [0], [1], [0, 0, 1, 1], [], []>} : vector<4x256xf32>, vector<256x512xf32>, vector<4x512xf32> -> vector<4x512xf32>
    %117 = arith.addf %115, %116 : vector<4x512xf32>
    %118 = vector.extract_strided_slice %117 {offsets = [0, 0], sizes = [4, 384], strides = [1, 1]} : vector<4x512xf32> to vector<4x384xf32>
    %119 = arith.negf %118 : vector<4x384xf32>
    %120 = math.exp %119 : vector<4x384xf32>
    %cst_30 = arith.constant 1.000000e+00 : f32
    %121 = vector.broadcast %cst_30 : f32 to vector<4x384xf32>
    %122 = arith.addf %121, %120 : vector<4x384xf32>
    %123 = arith.divf %121, %122 : vector<4x384xf32>
    %124 = vector.extract_strided_slice %117 {offsets = [0, 384], sizes = [4, 128], strides = [1, 1]} : vector<4x512xf32> to vector<4x128xf32>
    %125 = math.tanh %124 : vector<4x128xf32>
    %126 = vector.extract_strided_slice %123 {offsets = [0, 0], sizes = [4, 128], strides = [1, 1]} : vector<4x384xf32> to vector<4x128xf32>
    %127 = vector.extract_strided_slice %123 {offsets = [0, 128], sizes = [4, 128], strides = [1, 1]} : vector<4x384xf32> to vector<4x128xf32>
    %128 = vector.extract_strided_slice %123 {offsets = [0, 256], sizes = [4, 128], strides = [1, 1]} : vector<4x384xf32> to vector<4x128xf32>
    %129 = arith.mulf %127, %109 : vector<4x128xf32>
    %130 = arith.mulf %126, %125 : vector<4x128xf32>
    %131 = arith.addf %129, %130 : vector<4x128xf32>
    %132 = math.tanh %131 : vector<4x128xf32>
    %133 = arith.mulf %128, %132 : vector<4x128xf32>
    %134 = tpu.concatenate %133, %133 in 1 : vector<4x128xf32>, vector<4x128xf32> -> vector<4x256xf32>
    %135 = arith.mulf %134, %1 : vector<4x256xf32>
    %c6 = arith.constant 6 : index
    %c0_31 = arith.constant 0 : index
    %c0_32 = arith.constant 0 : index
    %136 = vector.load %arg0[%c6, %c0_31, %c0_32] : memref<8x4x512xf32, #tpu.memory_space<vmem>>, vector<1x4x512xf32>
    %137 = vector.shape_cast %136 : vector<1x4x512xf32> to vector<4x512xf32>
    %cst_33 = arith.constant dense<0.000000e+00> : vector<4x512xf32>
    %138 = tpu.matmul %135, %0, %cst_33 {dimension_numbers = #tpu.dot_dimension_numbers<[1], [0], [0], [1], [0, 0, 1, 1], [], []>} : vector<4x256xf32>, vector<256x512xf32>, vector<4x512xf32> -> vector<4x512xf32>
    %139 = arith.addf %137, %138 : vector<4x512xf32>
    %140 = vector.extract_strided_slice %139 {offsets = [0, 0], sizes = [4, 384], strides = [1, 1]} : vector<4x512xf32> to vector<4x384xf32>
    %141 = arith.negf %140 : vector<4x384xf32>
    %142 = math.exp %141 : vector<4x384xf32>
    %cst_34 = arith.constant 1.000000e+00 : f32
    %143 = vector.broadcast %cst_34 : f32 to vector<4x384xf32>
    %144 = arith.addf %143, %142 : vector<4x384xf32>
    %145 = arith.divf %143, %144 : vector<4x384xf32>
    %146 = vector.extract_strided_slice %139 {offsets = [0, 384], sizes = [4, 128], strides = [1, 1]} : vector<4x512xf32> to vector<4x128xf32>
    %147 = math.tanh %146 : vector<4x128xf32>
    %148 = vector.extract_strided_slice %145 {offsets = [0, 0], sizes = [4, 128], strides = [1, 1]} : vector<4x384xf32> to vector<4x128xf32>
    %149 = vector.extract_strided_slice %145 {offsets = [0, 128], sizes = [4, 128], strides = [1, 1]} : vector<4x384xf32> to vector<4x128xf32>
    %150 = vector.extract_strided_slice %145 {offsets = [0, 256], sizes = [4, 128], strides = [1, 1]} : vector<4x384xf32> to vector<4x128xf32>
    %151 = arith.mulf %149, %131 : vector<4x128xf32>
    %152 = arith.mulf %148, %147 : vector<4x128xf32>
    %153 = arith.addf %151, %152 : vector<4x128xf32>
    %154 = math.tanh %153 : vector<4x128xf32>
    %155 = arith.mulf %150, %154 : vector<4x128xf32>
    %156 = tpu.concatenate %155, %155 in 1 : vector<4x128xf32>, vector<4x128xf32> -> vector<4x256xf32>
    %157 = arith.mulf %156, %1 : vector<4x256xf32>
    %c7 = arith.constant 7 : index
    %c0_35 = arith.constant 0 : index
    %c0_36 = arith.constant 0 : index
    %158 = vector.load %arg0[%c7, %c0_35, %c0_36] : memref<8x4x512xf32, #tpu.memory_space<vmem>>, vector<1x4x512xf32>
    %159 = vector.shape_cast %158 : vector<1x4x512xf32> to vector<4x512xf32>
    %cst_37 = arith.constant dense<0.000000e+00> : vector<4x512xf32>
    %160 = tpu.matmul %157, %0, %cst_37 {dimension_numbers = #tpu.dot_dimension_numbers<[1], [0], [0], [1], [0, 0, 1, 1], [], []>} : vector<4x256xf32>, vector<256x512xf32>, vector<4x512xf32> -> vector<4x512xf32>
    %161 = arith.addf %159, %160 : vector<4x512xf32>
    %162 = vector.extract_strided_slice %161 {offsets = [0, 0], sizes = [4, 384], strides = [1, 1]} : vector<4x512xf32> to vector<4x384xf32>
    %163 = arith.negf %162 : vector<4x384xf32>
    %164 = math.exp %163 : vector<4x384xf32>
    %cst_38 = arith.constant 1.000000e+00 : f32
    %165 = vector.broadcast %cst_38 : f32 to vector<4x384xf32>
    %166 = arith.addf %165, %164 : vector<4x384xf32>
    %167 = arith.divf %165, %166 : vector<4x384xf32>
    %168 = vector.extract_strided_slice %161 {offsets = [0, 384], sizes = [4, 128], strides = [1, 1]} : vector<4x512xf32> to vector<4x128xf32>
    %169 = math.tanh %168 : vector<4x128xf32>
    %170 = vector.extract_strided_slice %167 {offsets = [0, 0], sizes = [4, 128], strides = [1, 1]} : vector<4x384xf32> to vector<4x128xf32>
    %171 = vector.extract_strided_slice %167 {offsets = [0, 128], sizes = [4, 128], strides = [1, 1]} : vector<4x384xf32> to vector<4x128xf32>
    %172 = vector.extract_strided_slice %167 {offsets = [0, 256], sizes = [4, 128], strides = [1, 1]} : vector<4x384xf32> to vector<4x128xf32>
    %173 = arith.mulf %171, %153 : vector<4x128xf32>
    %174 = arith.mulf %170, %169 : vector<4x128xf32>
    %175 = arith.addf %173, %174 : vector<4x128xf32>
    %176 = math.tanh %175 : vector<4x128xf32>
    %177 = arith.mulf %172, %176 : vector<4x128xf32>
    %178 = tpu.concatenate %177, %177 in 1 : vector<4x128xf32>, vector<4x128xf32> -> vector<4x256xf32>
    %179 = arith.mulf %178, %1 : vector<4x256xf32>
    %c0_39 = arith.constant 0 : index
    %c0_40 = arith.constant 0 : index
    %180 = vector.load %arg5[%c0_39, %c0_40] : memref<256x2xf32, #tpu.memory_space<vmem>>, vector<256x2xf32>
    %cst_41 = arith.constant dense<0.000000e+00> : vector<4x2xf32>
    %181 = tpu.matmul %179, %180, %cst_41 {dimension_numbers = #tpu.dot_dimension_numbers<[1], [0], [0], [1], [0, 0, 1, 1], [], []>} : vector<4x256xf32>, vector<256x2xf32>, vector<4x2xf32> -> vector<4x2xf32>
    %182 = vector.extract_strided_slice %181 {offsets = [0, 0], sizes = [2, 2], strides = [1, 1]} : vector<4x2xf32> to vector<2x2xf32>
    %183 = vector.extract_strided_slice %181 {offsets = [2, 0], sizes = [2, 2], strides = [1, 1]} : vector<4x2xf32> to vector<2x2xf32>
    %184 = arith.addf %182, %183 : vector<2x2xf32>
    %c0_42 = arith.constant 0 : index
    %c0_43 = arith.constant 0 : index
    %185 = vector.load %arg6[%c0_42, %c0_43] : memref<1x2xf32, #tpu.memory_space<vmem>>, vector<1x2xf32>
    %186 = vector.broadcast %185 : vector<1x2xf32> to vector<2x2xf32>
    %187 = arith.addf %184, %186 : vector<2x2xf32>
    %c0_44 = arith.constant 0 : index
    %c0_45 = arith.constant 0 : index
    %188 = vector.load %arg7[%c0_44, %c0_45] : memref<2x2xf32, #tpu.memory_space<vmem>>, vector<2x2xf32>
    tpu.vector_store %arg7[%c0_44, %c0_45], %187 {strides = array<i32>} : memref<2x2xf32, #tpu.memory_space<vmem>>, vector<2x2xf32>,
    return
  }
}

</mosaic_0001>

<bundles_post_ra>
// kernel: tpu_custom_call.1
= control target key start
LH: loop header
LB: loop body
LE: loop exit
PB: predicated region body
PF: predicated region fallthrough
CT: control target
= control target key end

     0   :  { %12 = vsyncpa [#allocation3], 0  ;;  %s3900_s0 = inlined_call_operand.vmem [shape: f32[8,4,512], index: 0, kind: input, shape index: {}]   ;;  %s3901_s1 = inlined_call_operand.vmem [shape: f32[4,256], index: 1, kind: input, shape index: {}]   ;;  %s3902_s2 = inlined_call_operand.vmem [shape: f32[4,128], index: 2, kind: input, shape index: {}]   ;;  %s3903_s3 = inlined_call_operand.hbm [shape: f32[256,512], index: 3, kind: input, shape index: {}]   ;;  %s3904_s4 = inlined_call_operand.vmem [shape: f32[4,256], index: 4, kind: input, shape index: {}]   ;;  %s3905_s5 = inlined_call_operand.vmem [shape: f32[256,2], index: 5, kind: input, shape index: {}]   ;;  %s3906_s6 = inlined_call_operand.vmem [shape: f32[1,2], index: 6, kind: input, shape index: {}]   ;;  %s3907_s7 = inlined_call_operand.hbm [shape: f32[2,2], index: 7, kind: output, shape index: {}]  }
   0x1   :  { %13 = vsyncpa [#allocation4], 0  ;;  %s2187_s24 = smov [#allocation2]  }
   0x2   :  { %s25_s25 = sshll.u32 %s2187_s24, 4  ;;  %s26_s25 = int_to_ptr.vmem [resolvable:$true] %s25_s25 }
   0x3   :  { %s2151_s26 = scalar_lea.vmem %s26_s25, 16384  ;;  %p2156_p1 = scmp.lt.s32.totalorder %s26_s25, %s26_s25 }
   0x4   :  { %p2152_p0 = scmp.ne.s32.totalorder %s26_s25, %s2151_s26  ;;  %p2157_p2 = scmp.lt.s32.totalorder %s2151_s26, %s2151_s26 }
   0x6   :  { %p2158_p3 = por %p2157_p2, %p2156_p1 }
   0x8   :  { %p2159_p4 = pnand %p2158_p3, %p2152_p0 }
   0xa   :  { %2162 = shalt.err (!%p2159_p4)
}
   0xb   :  { %s2188_s27 = smov 512   ;;  %s2189_s28 = smov 32  }
   0xc   :  { %31 = dma.hbm_to_vmem [thread:$0]  %s3903_s3, 16384, %s26_s25, [#allocation3], %s2188_s27, %s2188_s27, %s2189_s28  }
   0xd   :  { %2183 = dma.done.wait [#allocation3], 16384  }
   0xe   :  { %2184 = vsyncadd [#allocation3], 4294950912  ;;  %v2234_v0 = vld [vmem:[#allocation2 + $0x1e8] sm:$0xff]  ;;  %v2236_v1 = vld [vmem:[#allocation2 + $0x1e0] sm:$0xff]  ;;  %s2190_s28 = smov [#allocation5]   ;;  %vm1739_vm0 = vcmask 9216  }
   0xf   :  { %v2238_v2 = vld [vmem:[#allocation2 + $0x1c8] sm:$0xff]  ;;  %177 = vmatprep.subr.mxu0 %v2234_v0  ;;  %v2241_v3 = vld [vmem:[#allocation2 + $0x1c0] sm:$0xff]  ;;  %v2255_v8 = vld [vmem:[#allocation2 + $0x1f8] sm:$0xff]  ;;  %s1747_s29 = sshll.u32 %s2190_s28, 4  ;;  %s1748_s29 = int_to_ptr.vmem [resolvable:$true] %s1747_s29 }
  0x10   :  { %178 = vmatpush1.msra.mxu0 %v2236_v1  ;;  %v2244_v4 = vld [vmem:[#allocation2 + $0x1a8] sm:$0xff]  ;;  %v2247_v5 = vld [vmem:[#allocation2 + $0x1a0] sm:$0xff]  ;;  %248 = vmatprep.subr.mxu1 %v2255_v8  ;;  %v2261_v10 = vld [vmem:[#allocation2 + $0x1f0] sm:$0xff]  ;;  %s2163_s30 = scalar_lea.vmem %s1748_s29, 32  ;;  %p2168_p6 = scmp.lt.s32.totalorder %s1748_s29, %s1748_s29 }
  0x11   :  { %179 = vmatprep.subr.mxu0 %v2238_v2  ;;  %v2250_v6 = vld [vmem:[#allocation2 + $0x188] sm:$0xff]  ;;  %v2253_v7 = vld [vmem:[#allocation2 + $0x180] sm:$0xff]  ;;  %249 = vmatpush1.msra.mxu1 %v2261_v10  ;;  %v2267_v12 = vld [vmem:[#allocation2 + $0x1d8] sm:$0xff]  ;;  %p2164_p5 = scmp.ne.s32.totalorder %s1748_s29, %s2163_s30  ;;  %p2169_p7 = scmp.lt.s32.totalorder %s2163_s30, %s2163_s30 }
  0x12   :  { %180 = vmatpush1.msra.mxu0 %v2241_v3  ;;  %v2258_v9 = vld [vmem:[#allocation2 + $0x168] sm:$0xff]  ;;  %v2264_v11 = vld [vmem:[#allocation2 + $0x160] sm:$0xff]  ;;  %v2269_v13 = vld [vmem:[#allocation2 + $0x1d0] sm:$0xff]  ;;  %250 = vmatprep.subr.mxu1 %v2267_v12 }
  0x13   :  { %181 = vmatprep.subr.mxu0 %v2244_v4  ;;  %v2272_v14 = vld [vmem:[#allocation2 + $0x148] sm:$0xff]  ;;  %v2275_v15 = vld [vmem:[#allocation2 + $0x1b8] sm:$0xff]  ;;  %v2278_v16 = vld [vmem:[#allocation2 + $0x140] sm:$0xff]  ;;  %251 = vmatpush1.msra.mxu1 %v2269_v13  ;;  %p2170_p8 = por %p2169_p7, %p2168_p6 }
  0x14   :  { %182 = vmatpush1.msra.mxu0 %v2247_v5  ;;  %v2281_v17 = vld [vmem:[#allocation2 + $0x1b0] sm:$0xff]  ;;  %v2283_v18 = vld [vmem:[#allocation2 + $0x198] sm:$0xff]  ;;  %v2286_v19 = vld [vmem:[#allocation2 + $0x128] sm:$0xff]  ;;  %252 = vmatprep.subr.mxu1 %v2275_v15 }
  0x15   :  { %183 = vmatprep.subr.mxu0 %v2250_v6  ;;  %v2289_v20 = vld [vmem:[#allocation2 + $0x190] sm:$0xff]  ;;  %v2292_v21 = vld [vmem:[#allocation2 + $0x120] sm:$0xff]  ;;  %253 = vmatpush1.msra.mxu1 %v2281_v17  ;;  %v2295_v22 = vld [vmem:[#allocation2 + $0x178] sm:$0xff]  ;;  %p2171_p9 = pnand %p2170_p8, %p2164_p5 }
  0x16   :  { %184 = vmatpush1.msra.mxu0 %v2253_v7  ;;  %v2298_v23 = vld [vmem:[#allocation2 + $0x108] sm:$0xff]  ;;  %254 = vmatprep.subr.mxu1 %v2283_v18  ;;  %v2301_v24 = vld [vmem:[#allocation2 + $0x170] sm:$0xff]  ;;  %v2304_v25 = vld [vmem:[#allocation2 + $0x100] sm:$0xff] }
  0x17   :  { %185 = vmatprep.subr.mxu0 %v2258_v9  ;;  %255 = vmatpush1.msra.mxu1 %v2289_v20  ;;  %v2307_v26 = vld [vmem:[#allocation2 + $0x158] sm:$0xff]  ;;  %v2310_v27 = vld [vmem:[#allocation2 + $0xe8] sm:$0xff]  ;;  %v2313_v28 = vld [vmem:[#allocation2 + $0x150] sm:$0xff] }
  0x18   :  { %186 = vmatpush1.msra.mxu0 %v2264_v11  ;;  %256 = vmatprep.subr.mxu1 %v2295_v22  ;;  %v2316_v29 = vld [vmem:[#allocation2 + $0xe0] sm:$0xff]  ;;  %v2319_v30 = vld [vmem:[#allocation2 + $0x138] sm:$0xff]  ;;  %v2322_v31 = vld [vmem:[#allocation2 + $0xc8] sm:$0xff] }
  0x19   :  { %187 = vmatprep.subr.mxu0 %v2272_v14  ;;  %257 = vmatpush1.msra.mxu1 %v2301_v24  ;;  %v2325_v32 = vld [vmem:[#allocation2 + $0x130] sm:$0xff]  ;;  %v2328_v33 = vld [vmem:[#allocation2 + $0xc0] sm:$0xff]  ;;  %v2331_v34 = vld [vmem:[#allocation2 + $0x118] sm:$0xff] }
  0x1a   :  { %188 = vmatpush1.msra.mxu0 %v2278_v16  ;;  %258 = vmatprep.subr.mxu1 %v2307_v26  ;;  %v2334_v35 = vld [vmem:[#allocation2 + $0xa8] sm:$0xff]  ;;  %v2337_v36 = vld [vmem:[#allocation2 + $0x110] sm:$0xff]  ;;  %v2340_v37 = vld [vmem:[#allocation2 + $0xa0] sm:$0xff] }
  0x1b   :  { %189 = vmatprep.subr.mxu0 %v2286_v19  ;;  %259 = vmatpush1.msra.mxu1 %v2313_v28  ;;  %4297 = vst [vmem:[#allocation8_spill] sm:$0xff] %v2340_v37  ;;  %v2343_v38 = vld [vmem:[#allocation2 + $0xf8] sm:$0xff]  ;;  %v2346_v39 = vld [vmem:[#allocation2 + $0x88] sm:$0xff]  ;;  %v2349_v40 = vld [vmem:[#allocation2 + $0xf0] sm:$0xff] }
  0x1c   :  { %190 = vmatpush1.msra.mxu0 %v2292_v21  ;;  %260 = vmatprep.subr.mxu1 %v2319_v30  ;;  %4298 = vst [vmem:[#allocation9_spill] sm:$0xff] %v2346_v39  ;;  %v2352_v41 = vld [vmem:[#allocation2 + $0x80] sm:$0xff]  ;;  %v2355_v42 = vld [vmem:[#allocation2 + $0xd8] sm:$0xff]  ;;  %v2358_v43 = vld [vmem:[#allocation2 + $0x68] sm:$0xff] }
  0x1d   :  { %191 = vmatprep.subr.mxu0 %v2298_v23  ;;  %261 = vmatpush1.msra.mxu1 %v2325_v32  ;;  %4299 = vst [vmem:[#allocation10_spill] sm:$0xff] %v2352_v41  ;;  %4300 = vst [vmem:[#allocation11_spill] sm:$0xff] %v2358_v43  ;;  %v2361_v44 = vld [vmem:[#allocation2 + $0xd0] sm:$0xff]  ;;  %v2364_v45 = vld [vmem:[#allocation2 + $0x60] sm:$0xff] }
  0x1e   :  { %192 = vmatpush1.msra.mxu0 %v2304_v25  ;;  %262 = vmatprep.subr.mxu1 %v2331_v34  ;;  %4301 = vst [vmem:[#allocation12_spill] sm:$0xff] %v2364_v45  ;;  %v2367_v46 = vld [vmem:[#allocation2 + $0xb8] sm:$0xff]  ;;  %v2370_v47 = vld [vmem:[#allocation2 + $0x48] sm:$0xff]  ;;  %v2373_v48 = vld [vmem:[#allocation2 + $0xb0] sm:$0xff] }
  0x1f   :  { %193 = vmatprep.subr.mxu0 %v2310_v27  ;;  %263 = vmatpush1.msra.mxu1 %v2337_v36  ;;  %4302 = vst [vmem:[#allocation13_spill] sm:$0xff] %v2370_v47  ;;  %4303 = vst [vmem:[#allocation14_spill] sm:$0xff] %v2373_v48  ;;  %v2376_v49 = vld [vmem:[#allocation2 + $0x40] sm:$0xff]  ;;  %v2379_v50 = vld [vmem:[#allocation2 + $0x98] sm:$0xff] }
  0x20   :  { %194 = vmatpush1.msra.mxu0 %v2316_v29  ;;  %264 = vmatprep.subr.mxu1 %v2343_v38  ;;  %4304 = vst [vmem:[#allocation15_spill] sm:$0xff] %v2376_v49  ;;  %4305 = vst [vmem:[#allocation16_spill] sm:$0xff] %v2379_v50  ;;  %v2382_v51 = vld [vmem:[#allocation2 + $0x28] sm:$0xff]  ;;  %v2385_v52 = vld [vmem:[#allocation2 + $0x90] sm:$0xff] }
  0x21   :  { %195 = vmatprep.subr.mxu0 %v2322_v31  ;;  %265 = vmatpush1.msra.mxu1 %v2349_v40  ;;  %4306 = vst [vmem:[#allocation17_spill] sm:$0xff] %v2382_v51  ;;  %4307 = vst [vmem:[#allocation18_spill] sm:$0xff] %v2385_v52  ;;  %v2388_v53 = vld [vmem:[#allocation2 + $0x20] sm:$0xff]  ;;  %v2391_v54 = vld [vmem:[#allocation2 + $0x78] sm:$0xff] }
  0x22   :  { %196 = vmatpush1.msra.mxu0 %v2328_v33  ;;  %266 = vmatprep.subr.mxu1 %v2355_v42  ;;  %4308 = vst [vmem:[#allocation19_spill] sm:$0xff] %v2388_v53  ;;  %4309 = vst [vmem:[#allocation20_spill] sm:$0xff] %v2391_v54  ;;  %v2394_v55 = vld [vmem:[#allocation2 + $0x8] sm:$0xff]  ;;  %v2397_v56 = vld [vmem:[#allocation2 + $0x70] sm:$0xff] }
  0x23   :  { %197 = vmatprep.subr.mxu0 %v2334_v35  ;;  %267 = vmatpush1.msra.mxu1 %v2361_v44  ;;  %4310 = vst [vmem:[#allocation21_spill] sm:$0xff] %v2394_v55  ;;  %4311 = vst [vmem:[#allocation22_spill] sm:$0xff] %v2397_v56  ;;  %v2400_v57 = vld [vmem:[#allocation2] sm:$0xff]  ;;  %v2403_v58 = vld [vmem:[#allocation2 + $0x58] sm:$0xff] }
  0x24   :  { %198 = vmatpush1.msra.mxu0 %v2340_v37  ;;  %268 = vmatprep.subr.mxu1 %v2367_v46  ;;  %4312 = vst [vmem:[#allocation23_spill] sm:$0xff] %v2400_v57  ;;  %4313 = vst [vmem:[#allocation24_spill] sm:$0xff] %v2403_v58  ;;  %v2406_v59 = vld [vmem:[#allocation2 + $0x3e8] sm:$0xff]  ;;  %v2409_v60 = vld [vmem:[#allocation2 + $0x50] sm:$0xff] }
  0x25   :  { %199 = vmatprep.subr.mxu0 %v2346_v39  ;;  %269 = vmatpush1.msra.mxu1 %v2373_v48  ;;  %4314 = vst [vmem:[#allocation25_spill] sm:$0xff] %v2406_v59  ;;  %4315 = vst [vmem:[#allocation26_spill] sm:$0xff] %v2409_v60  ;;  %v2412_v61 = vld [vmem:[#allocation2 + $0x3e0] sm:$0xff]  ;;  %v2415_v62 = vld [vmem:[#allocation2 + $0x38] sm:$0xff] }
  0x26   :  { %200 = vmatpush1.msra.mxu0 %v2352_v41  ;;  %270 = vmatprep.subr.mxu1 %v2379_v50  ;;  %4316 = vst [vmem:[#allocation27_spill] sm:$0xff] %v2412_v61  ;;  %4317 = vst [vmem:[#allocation28_spill] sm:$0xff] %v2415_v62  ;;  %v2418_v63 = vld [vmem:[#allocation2 + $0x3c8] sm:$0xff] }
  0x27   :  { %201 = vmatprep.subr.mxu0 %v2358_v43  ;;  %271 = vmatpush1.msra.mxu1 %v2385_v52  ;;  %4318 = vst [vmem:[#allocation29_spill] sm:$0xff] %v2418_v63 }
  0x28   :  { %202 = vmatpush1.msra.mxu0 %v2364_v45  ;;  %272 = vmatprep.subr.mxu1 %v2391_v54  ;;  %v2546_v54 = vld [vmem:[#allocation2 + $0x2f8] sm:$0xff] }
  0x29   :  { %203 = vmatprep.subr.mxu0 %v2370_v47  ;;  %273 = vmatpush1.msra.mxu1 %v2397_v56  ;;  %v2430_v56 = vld [vmem:[#allocation2 + $0x3a8] sm:$0xff]  ;;  %4358 = vst [vmem:[#allocation69_spill] sm:$0xff] %v2546_v54 }
  0x2a   :  { %204 = vmatpush1.msra.mxu0 %v2376_v49  ;;  %274 = vmatprep.subr.mxu1 %v2403_v58  ;;  %4322 = vst [vmem:[#allocation33_spill] sm:$0xff] %v2430_v56  ;;  %v2436_v58 = vld [vmem:[#allocation2 + $0x3a0] sm:$0xff] }
  0x2b   :  { %205 = vmatprep.subr.mxu0 %v2382_v51  ;;  %v2424_v51 = vld [vmem:[#allocation2 + $0x3c0] sm:$0xff]  ;;  %275 = vmatpush1.msra.mxu1 %v2409_v60  ;;  %4324 = vst [vmem:[#allocation35_spill] sm:$0xff] %v2436_v58  ;;  %v2442_v60 = vld [vmem:[#allocation2 + $0x388] sm:$0xff] }
  0x2c   :  { %206 = vmatpush1.msra.mxu0 %v2388_v53  ;;  %v2421_v53 = vld [vmem:[#allocation2 + $0x30] sm:$0xff]  ;;  %4320 = vst [vmem:[#allocation31_spill] sm:$0xff] %v2424_v51  ;;  %276 = vmatprep.subr.mxu1 %v2415_v62  ;;  %4326 = vst [vmem:[#allocation37_spill] sm:$0xff] %v2442_v60  ;;  %v2448_v62 = vld [vmem:[#allocation2 + $0x380] sm:$0xff] }
  0x2d   :  { %207 = vmatprep.subr.mxu0 %v2394_v55  ;;  %4319 = vst [vmem:[#allocation30_spill] sm:$0xff] %v2421_v53  ;;  %v2427_v55 = vld [vmem:[#allocation2 + $0x18] sm:$0xff]  ;;  %277 = vmatpush1.msra.mxu1 %v2421_v53  ;;  %4328 = vst [vmem:[#allocation39_spill] sm:$0xff] %v2448_v62  ;;  %v2454_v53 = vld [vmem:[#allocation2 + $0x368] sm:$0xff] }
  0x2e   :  { %208 = vmatpush1.msra.mxu0 %v2400_v57  ;;  %4321 = vst [vmem:[#allocation32_spill] sm:$0xff] %v2427_v55  ;;  %v2433_v57 = vld [vmem:[#allocation2 + $0x10] sm:$0xff]  ;;  %278 = vmatprep.subr.mxu1 %v2427_v55  ;;  %4330 = vst [vmem:[#allocation41_spill] sm:$0xff] %v2454_v53  ;;  %v2460_v55 = vld [vmem:[#allocation2 + $0x360] sm:$0xff] }
  0x2f   :  { %209 = vmatprep.subr.mxu0 %v2406_v59  ;;  %4323 = vst [vmem:[#allocation34_spill] sm:$0xff] %v2433_v57  ;;  %v2439_v59 = vld [vmem:[#allocation2 + $0x3f8] sm:$0xff]  ;;  %279 = vmatpush1.msra.mxu1 %v2433_v57  ;;  %4332 = vst [vmem:[#allocation43_spill] sm:$0xff] %v2460_v55  ;;  %v2466_v57 = vld [vmem:[#allocation2 + $0x348] sm:$0xff] }
  0x30   :  { %210 = vmatpush2.msra.mxu0 %v2412_v61  ;;  %4325 = vst [vmem:[#allocation36_spill] sm:$0xff] %v2439_v59  ;;  %v2445_v61 = vld [vmem:[#allocation2 + $0x3f0] sm:$0xff]  ;;  %280 = vmatprep.subr.mxu1 %v2439_v59  ;;  %4334 = vst [vmem:[#allocation45_spill] sm:$0xff] %v2466_v57  ;;  %v2472_v59 = vld [vmem:[#allocation2 + $0x340] sm:$0xff] }
  0x31   :  { %211 = vmatprep.subr.mxu0 %v2418_v63  ;;  %4327 = vst [vmem:[#allocation38_spill] sm:$0xff] %v2445_v61  ;;  %v2451_v63 = vld [vmem:[#allocation2 + $0x3d8] sm:$0xff]  ;;  %281 = vmatpush2.msra.mxu1 %v2445_v61  ;;  %4336 = vst [vmem:[#allocation47_spill] sm:$0xff] %v2472_v59  ;;  %v2478_v61 = vld [vmem:[#allocation2 + $0x328] sm:$0xff] }
  0x32   :  { %212 = vmatpush2.msra.mxu0 %v2424_v51  ;;  %4329 = vst [vmem:[#allocation40_spill] sm:$0xff] %v2451_v63  ;;  %v2457_v51 = vld [vmem:[#allocation2 + $0x3d0] sm:$0xff]  ;;  %282 = vmatprep.subr.mxu1 %v2451_v63  ;;  %4338 = vst [vmem:[#allocation49_spill] sm:$0xff] %v2478_v61  ;;  %v2484_v63 = vld [vmem:[#allocation2 + $0x320] sm:$0xff] }
  0x33   :  { %213 = vmatprep.subr.mxu0 %v2430_v56  ;;  %4331 = vst [vmem:[#allocation42_spill] sm:$0xff] %v2457_v51  ;;  %v2463_v56 = vld [vmem:[#allocation2 + $0x3b8] sm:$0xff]  ;;  %283 = vmatpush2.msra.mxu1 %v2457_v51  ;;  %4340 = vst [vmem:[#allocation51_spill] sm:$0xff] %v2484_v63  ;;  %v2490_v51 = vld [vmem:[#allocation2 + $0x308] sm:$0xff] }
  0x34   :  { %214 = vmatpush2.msra.mxu0 %v2436_v58  ;;  %4333 = vst [vmem:[#allocation44_spill] sm:$0xff] %v2463_v56  ;;  %v2469_v58 = vld [vmem:[#allocation2 + $0x3b0] sm:$0xff]  ;;  %284 = vmatprep.subr.mxu1 %v2463_v56  ;;  %4342 = vst [vmem:[#allocation53_spill] sm:$0xff] %v2490_v51  ;;  %v2496_v56 = vld [vmem:[#allocation2 + $0x300] sm:$0xff] }
  0x35   :  { %215 = vmatprep.subr.mxu0 %v2442_v60  ;;  %4335 = vst [vmem:[#allocation46_spill] sm:$0xff] %v2469_v58  ;;  %v2475_v60 = vld [vmem:[#allocation2 + $0x398] sm:$0xff]  ;;  %285 = vmatpush2.msra.mxu1 %v2469_v58  ;;  %4344 = vst [vmem:[#allocation55_spill] sm:$0xff] %v2496_v56  ;;  %v2502_v58 = vld [vmem:[#allocation2 + $0x2e8] sm:$0xff] }
  0x36   :  { %216 = vmatpush2.msra.mxu0 %v2448_v62  ;;  %4337 = vst [vmem:[#allocation48_spill] sm:$0xff] %v2475_v60  ;;  %v2481_v62 = vld [vmem:[#allocation2 + $0x390] sm:$0xff]  ;;  %286 = vmatprep.subr.mxu1 %v2475_v60  ;;  %4346 = vst [vmem:[#allocation57_spill] sm:$0xff] %v2502_v58  ;;  %v2510_v60 = vld [vmem:[%s3901_s1] sm:$0xff] }
  0x37   :  { %217 = vmatprep.subr.mxu0 %v2454_v53  ;;  %4339 = vst [vmem:[#allocation50_spill] sm:$0xff] %v2481_v62  ;;  %v2487_v53 = vld [vmem:[#allocation2 + $0x378] sm:$0xff]  ;;  %287 = vmatpush2.msra.mxu1 %v2481_v62  ;;  %v2525_v49 = vld [vmem:[#allocation2 + $0x2c0] sm:$0xff] }
  0x38   :  { %218 = vmatpush2.msra.mxu0 %v2460_v55  ;;  %4341 = vst [vmem:[#allocation52_spill] sm:$0xff] %v2487_v53  ;;  %v2493_v55 = vld [vmem:[#allocation2 + $0x370] sm:$0xff]  ;;  %288 = vmatprep.subr.mxu1 %v2487_v53  ;;  %v2516_v62 = vld [vmem:[#allocation2 + $0x338] sm:$0xff]  ;;  %4352 = vst [vmem:[#allocation63_spill] sm:$0xff] %v2525_v49 }
  0x39   :  { %219 = vmatprep.subr.mxu0 %v2466_v57  ;;  %4343 = vst [vmem:[#allocation54_spill] sm:$0xff] %v2493_v55  ;;  %v2499_v57 = vld [vmem:[#allocation2 + $0x358] sm:$0xff]  ;;  %289 = vmatpush2.msra.mxu1 %v2493_v55  ;;  %4349 = vst [vmem:[#allocation60_spill] sm:$0xff] %v2516_v62  ;;  %v2522_v53 = vld [vmem:[#allocation2 + $0x330] sm:$0xff]  ;;  %v175_v55 = vcombine.high %v2510_v60, %v2510_v60 }
  0x3a   :  { %220 = vmatpush2.msra.mxu0 %v2472_v59  ;;  %4345 = vst [vmem:[#allocation56_spill] sm:$0xff] %v2499_v57  ;;  %v2505_v59 = vld [vmem:[#allocation2 + $0x350] sm:$0xff]  ;;  %290 = vmatprep.subr.mxu1 %v2499_v57  ;;  %4351 = vst [vmem:[#allocation62_spill] sm:$0xff] %v2522_v53  ;;  %v2537_v57 = vld [vmem:[#allocation2 + $0x2a0] sm:$0xff] }
  0x3b   :  { %221 = vmatprep.subr.mxu0 %v2478_v61  ;;  %4347 = vst [vmem:[#allocation58_spill] sm:$0xff] %v2505_v59  ;;  %v2513_v61 = vld [vmem:[#allocation2 + $0x2e0] sm:$0xff]  ;;  %291 = vmatpush2.msra.mxu1 %v2505_v59  ;;  %4355 = vst [vmem:[#allocation66_spill] sm:$0xff] %v2537_v57  ;;  %v2543_v59 = vld [vmem:[#allocation2 + $0x288] sm:$0xff] }
  0x3c   :  { %222 = vmatpush2.msra.mxu0 %v2484_v63  ;;  %4348 = vst [vmem:[#allocation59_spill] sm:$0xff] %v2513_v61  ;;  %v2519_v63 = vld [vmem:[#allocation2 + $0x2c8] sm:$0xff]  ;;  %292 = vmatprep.subr.mxu1 %v2516_v62  ;;  %4357 = vst [vmem:[#allocation68_spill] sm:$0xff] %v2543_v59 }
  0x3d   :  { %223 = vmatprep.subr.mxu0 %v2490_v51  ;;  %4350 = vst [vmem:[#allocation61_spill] sm:$0xff] %v2519_v63  ;;  %v2528_v51 = vld [vmem:[#allocation2 + $0x318] sm:$0xff]  ;;  %293 = vmatpush2.msra.mxu1 %v2522_v53  ;;  %v2554_v53 = vld [vmem:[#allocation2 + $0x268] sm:$0xff] }
  0x3e   :  { %224 = vmatpush2.msra.mxu0 %v2496_v56  ;;  %4353 = vst [vmem:[#allocation64_spill] sm:$0xff] %v2528_v51  ;;  %v2533_v56 = vld [vmem:[#allocation2 + $0x2a8] sm:$0xff]  ;;  %294 = vmatprep.subr.mxu1 %v2528_v51  ;;  %4361 = vst [vmem:[#allocation72_spill] sm:$0xff] %v2554_v53  ;;  %v2560_v51 = vld [vmem:[#allocation2 + $0x260] sm:$0xff] }
  0x3f   :  { %225 = vmatprep.subr.mxu0 %v2502_v58  ;;  %4354 = vst [vmem:[#allocation65_spill] sm:$0xff] %v2533_v56  ;;  %v2540_v58 = vld [vmem:[#allocation2 + $0x310] sm:$0xff]  ;;  %241 = vmatprep.mubr.f32.mxu0 %v175_v55  ;;  %4363 = vst [vmem:[#allocation74_spill] sm:$0xff] %v2560_v51  ;;  %v2566_v62 = vld [vmem:[#allocation2 + $0x248] sm:$0xff] }
  0x40   :  { %226 = vmatpush2.msra.mxu0 %v2513_v61  ;;  %4356 = vst [vmem:[#allocation67_spill] sm:$0xff] %v2540_v58  ;;  %v2549_v61 = vld [vmem:[#allocation2 + $0x280] sm:$0xff]  ;;  %295 = vmatpush2.msra.mxu1 %v2540_v58  ;;  %4365 = vst [vmem:[#allocation76_spill] sm:$0xff] %v2566_v62 }
  0x41   :  { %227 = vmatprep.subr.mxu0 %v2519_v63  ;;  %4359 = vst [vmem:[#allocation70_spill] sm:$0xff] %v2549_v61  ;;  %v2551_v63 = vld [vmem:[#allocation2 + $0x2f0] sm:$0xff]  ;;  %296 = vmatprep.subr.mxu1 %v2546_v54  ;;  %v2572_v58 = vld [vmem:[#allocation2 + $0x240] sm:$0xff]  ;;  %v2578_v54 = vld [vmem:[#allocation2 + $0x228] sm:$0xff] }
  0x42   :  { %228 = vmatpush2.msra.mxu0 %v2525_v49  ;;  %4360 = vst [vmem:[#allocation71_spill] sm:$0xff] %v2551_v63  ;;  %v2557_v49 = vld [vmem:[#allocation2 + $0x2d8] sm:$0xff]  ;;  %297 = vmatpush2.msra.mxu1 %v2551_v63  ;;  %4367 = vst [vmem:[#allocation78_spill] sm:$0xff] %v2572_v58  ;;  %v2584_v63 = vld [vmem:[#allocation2 + $0x220] sm:$0xff] }
  0x43   :  { %229 = vmatprep.subr.mxu0 %v2533_v56  ;;  %4362 = vst [vmem:[#allocation73_spill] sm:$0xff] %v2557_v49  ;;  %v2563_v56 = vld [vmem:[#allocation2 + $0x2d0] sm:$0xff]  ;;  %298 = vmatprep.subr.mxu1 %v2557_v49  ;;  %4368 = vst [vmem:[#allocation79_spill] sm:$0xff] %v2578_v54  ;;  %v2590_v49 = vld [vmem:[#allocation2 + $0x208] sm:$0xff] }
  0x44   :  { %230 = vmatpush2.msra.mxu0 %v2537_v57  ;;  %4364 = vst [vmem:[#allocation75_spill] sm:$0xff] %v2563_v56  ;;  %v2569_v57 = vld [vmem:[#allocation2 + $0x2b8] sm:$0xff]  ;;  %299 = vmatpush2.msra.mxu1 %v2563_v56  ;;  %4369 = vst [vmem:[#allocation80_spill] sm:$0xff] %v2584_v63  ;;  %v2596_v56 = vld [vmem:[#allocation2 + $0x200] sm:$0xff] }
  0x45   :  { %231 = vmatprep.subr.mxu0 %v2543_v59  ;;  %4366 = vst [vmem:[#allocation77_spill] sm:$0xff] %v2569_v57  ;;  %v2575_v59 = vld [vmem:[#allocation2 + $0x2b0] sm:$0xff]  ;;  %300 = vmatprep.subr.mxu1 %v2569_v57  ;;  %4371 = vst [vmem:[#allocation82_spill] sm:$0xff] %v2590_v49  ;;  %v2603_v57 = vld [vmem:[#allocation2 + $0x258] sm:$0xff] }
  0x46   :  { %232 = vmatpush2.msra.mxu0 %v2549_v61  ;;  %v2581_v61 = vld [vmem:[#allocation2 + $0x298] sm:$0xff]  ;;  %301 = vmatpush2.msra.mxu1 %v2575_v59  ;;  %4372 = vst [vmem:[#allocation83_spill] sm:$0xff] %v2596_v56  ;;  %4374 = vst [vmem:[#allocation85_spill] sm:$0xff] %v2603_v57 }
  0x47   :  { %233 = vmatprep.subr.mxu0 %v2554_v53  ;;  %v2587_v53 = vld [vmem:[#allocation2 + $0x290] sm:$0xff]  ;;  %302 = vmatprep.subr.mxu1 %v2581_v61 }
  0x48   :  { %234 = vmatpush2.msra.mxu0 %v2560_v51  ;;  %4370 = vst [vmem:[#allocation81_spill] sm:$0xff] %v2587_v53  ;;  %v2593_v51 = vld [vmem:[#allocation2 + $0x278] sm:$0xff]  ;;  %303 = vmatpush2.msra.mxu1 %v2587_v53 }
  0x49   :  { %235 = vmatprep.subr.mxu0 %v2566_v62  ;;  %v2599_v62 = vld [vmem:[#allocation2 + $0x270] sm:$0xff]  ;;  %304 = vmatprep.subr.mxu1 %v2593_v51  ;;  %v2618_v53 = vld [vmem:[#allocation2 + $0x218] sm:$0xff] }
  0x4a   :  { %236 = vmatpush2.msra.mxu0 %v2572_v58  ;;  %4373 = vst [vmem:[#allocation84_spill] sm:$0xff] %v2599_v62  ;;  %v2607_v58 = vld [vmem:[#allocation2 + $0x250] sm:$0xff]  ;;  %305 = vmatpush2.msra.mxu1 %v2599_v62  ;;  %4378 = vst [vmem:[#allocation89_spill] sm:$0xff] %v2618_v53 }
  0x4b   :  { %237 = vmatprep.subr.mxu0 %v2578_v54  ;;  %4375 = vst [vmem:[#allocation86_spill] sm:$0xff] %v2607_v58  ;;  %v2611_v54 = vld [vmem:[#allocation2 + $0x238] sm:$0xff]  ;;  %306 = vmatprep.subr.mxu1 %v2603_v57 }
  0x4c   :  { %238 = vmatpush2.msra.mxu0 %v2584_v63  ;;  %4376 = vst [vmem:[#allocation87_spill] sm:$0xff] %v2611_v54  ;;  %v2615_v63 = vld [vmem:[#allocation2 + $0x230] sm:$0xff]  ;;  %307 = vmatpush2.msra.mxu1 %v2607_v58 }
  0x4d   :  { %239 = vmatprep.subr.mxu0 %v2590_v49  ;;  %4377 = vst [vmem:[#allocation88_spill] sm:$0xff] %v2615_v63  ;;  %312 = vmatprep.mubr.f32.mxu1 %v175_v55  ;;  %v2621_v49 = vld [vmem:[#allocation2 + $0x210] sm:$0xff]  ;;  %v4380_v55 = vld [vmem:[#allocation20_spill] sm:$0xff] }
  0x4e   :  { %240 = vmatpush2.msra.mxu0 %v2596_v56  ;;  %308 = vmatprep.subr.mxu1 %v2611_v54  ;;  %4379 = vst [vmem:[#allocation90_spill] sm:$0xff] %v2621_v49 }
  0x4f   :  { %242 = vmatmul.mubr.f32.vlgmr.msra.gmra.mxu0 %v2510_v60  ;;  %361 = vmatprep.subr.mxu0 %v2234_v0 }
  0x50   :  { %309 = vmatpush2.msra.mxu1 %v2615_v63  ;;  %362 = vmatpush1.msra.mxu0 %v2236_v1 }
  0x51   :  { %310 = vmatprep.subr.mxu1 %v2618_v53  ;;  %363 = vmatprep.subr.mxu0 %v2238_v2 }
  0x52   :  { %311 = vmatpush2.msra.mxu1 %v2621_v49  ;;  %364 = vmatpush1.msra.mxu0 %v2241_v3 }
  0x53   :  { %313 = vmatmul.mubr.f32.vlgmr.msra.gmra.mxu1 %v2510_v60  ;;  %432 = vmatprep.subr.mxu1 %v2255_v8  ;;  %v4381_v60 = vld [vmem:[#allocation15_spill] sm:$0xff] }
  0x54   :  { %433 = vmatpush1.msra.mxu1 %v2261_v10  ;;  %365 = vmatprep.subr.mxu0 %v2244_v4 }
  0x55   :  { %434 = vmatprep.subr.mxu1 %v2267_v12  ;;  %366 = vmatpush1.msra.mxu0 %v2247_v5 }
  0x56   :  { %435 = vmatpush1.msra.mxu1 %v2269_v13  ;;  %367 = vmatprep.subr.mxu0 %v2250_v6 }
  0x57   :  { %436 = vmatprep.subr.mxu1 %v2275_v15  ;;  %368 = vmatpush1.msra.mxu0 %v2253_v7 }
  0x58   :  { %437 = vmatpush1.msra.mxu1 %v2281_v17  ;;  %369 = vmatprep.subr.mxu0 %v2258_v9 }
  0x59   :  { %438 = vmatprep.subr.mxu1 %v2283_v18  ;;  %370 = vmatpush1.msra.mxu0 %v2264_v11 }
  0x5a   :  { %439 = vmatpush1.msra.mxu1 %v2289_v20  ;;  %371 = vmatprep.subr.mxu0 %v2272_v14 }
  0x5b   :  { %440 = vmatprep.subr.mxu1 %v2295_v22  ;;  %372 = vmatpush1.msra.mxu0 %v2278_v16 }
  0x5c   :  { %441 = vmatpush1.msra.mxu1 %v2301_v24  ;;  %373 = vmatprep.subr.mxu0 %v2286_v19 }
  0x5d   :  { %442 = vmatprep.subr.mxu1 %v2307_v26  ;;  %374 = vmatpush1.msra.mxu0 %v2292_v21 }
  0x5e   :  { %443 = vmatpush1.msra.mxu1 %v2313_v28  ;;  %375 = vmatprep.subr.mxu0 %v2298_v23 }
  0x5f   :  { %444 = vmatprep.subr.mxu1 %v2319_v30  ;;  %376 = vmatpush1.msra.mxu0 %v2304_v25 }
  0x60   :  { %445 = vmatpush1.msra.mxu1 %v2325_v32  ;;  %377 = vmatprep.subr.mxu0 %v2310_v27 }
  0x61   :  { %446 = vmatprep.subr.mxu1 %v2331_v34  ;;  %378 = vmatpush1.msra.mxu0 %v2316_v29 }
  0x62   :  { %447 = vmatpush1.msra.mxu1 %v2337_v36  ;;  %379 = vmatprep.subr.mxu0 %v2322_v31 }
  0x63   :  { %448 = vmatprep.subr.mxu1 %v2343_v38  ;;  %380 = vmatpush1.msra.mxu0 %v2328_v33 }
  0x64   :  { %449 = vmatpush1.msra.mxu1 %v2349_v40  ;;  %381 = vmatprep.subr.mxu0 %v2334_v35 }
  0x65   :  { %450 = vmatprep.subr.mxu1 %v2355_v42  ;;  %382 = vmatpush1.msra.mxu0 %v2340_v37  ;;  %v4383_v37 = vld [vmem:[#allocation17_spill] sm:$0xff] }
  0x66   :  { %451 = vmatpush1.msra.mxu1 %v2361_v44  ;;  %383 = vmatprep.subr.mxu0 %v2346_v39  ;;  %v4382_v39 = vld [vmem:[#allocation22_spill] sm:$0xff] }
  0x67   :  { %452 = vmatprep.subr.mxu1 %v2367_v46  ;;  %384 = vmatpush1.msra.mxu0 %v2352_v41  ;;  %v4384_v41 = vld [vmem:[#allocation24_spill] sm:$0xff] }
  0x68   :  { %453 = vmatpush1.msra.mxu1 %v2373_v48  ;;  %385 = vmatprep.subr.mxu0 %v2358_v43  ;;  %v4385_v48 = vld [vmem:[#allocation19_spill] sm:$0xff]  ;;  %v4386_v43 = vld [vmem:[#allocation26_spill] sm:$0xff] }
  0x69   :  { %454 = vmatprep.subr.mxu1 %v2379_v50  ;;  %386 = vmatpush1.msra.mxu0 %v2364_v45  ;;  %v4387_v50 = vld [vmem:[#allocation21_spill] sm:$0xff]  ;;  %v4388_v45 = vld [vmem:[#allocation28_spill] sm:$0xff] }
  0x6a   :  { %455 = vmatpush1.msra.mxu1 %v2385_v52  ;;  %387 = vmatprep.subr.mxu0 %v2370_v47  ;;  %v4389_v52 = vld [vmem:[#allocation23_spill] sm:$0xff]  ;;  %v4390_v47 = vld [vmem:[#allocation30_spill] sm:$0xff] }
  0x6b   :  { %456 = vmatprep.subr.mxu1 %v4380_v55  ;;  %388 = vmatpush1.msra.mxu0 %v4381_v60  ;;  %v4391_v55 = vld [vmem:[#allocation25_spill] sm:$0xff]  ;;  %v4392_v60 = vld [vmem:[#allocation32_spill] sm:$0xff] }
  0x6c   :  { %457 = vmatpush1.msra.mxu1 %v4382_v39  ;;  %389 = vmatprep.subr.mxu0 %v4383_v37  ;;  %v4393_v39 = vld [vmem:[#allocation27_spill] sm:$0xff]  ;;  %v4394_v37 = vld [vmem:[#allocation34_spill] sm:$0xff] }
  0x6d   :  { %458 = vmatprep.subr.mxu1 %v4384_v41  ;;  %390 = vmatpush1.msra.mxu0 %v4385_v48  ;;  %v4395_v41 = vld [vmem:[#allocation29_spill] sm:$0xff]  ;;  %v4396_v48 = vld [vmem:[#allocation36_spill] sm:$0xff] }
  0x6e   :  { %459 = vmatpush1.msra.mxu1 %v4386_v43  ;;  %391 = vmatprep.subr.mxu0 %v4387_v50  ;;  %v4397_v43 = vld [vmem:[#allocation31_spill] sm:$0xff]  ;;  %v4398_v50 = vld [vmem:[#allocation38_spill] sm:$0xff] }
  0x6f   :  { %460 = vmatprep.subr.mxu1 %v4388_v45  ;;  %392 = vmatpush1.msra.mxu0 %v4389_v52  ;;  %v4399_v45 = vld [vmem:[#allocation33_spill] sm:$0xff]  ;;  %v4400_v52 = vld [vmem:[#allocation40_spill] sm:$0xff] }
  0x70   :  { %461 = vmatpush1.msra.mxu1 %v4390_v47  ;;  %393 = vmatprep.subr.mxu0 %v4391_v55  ;;  %v4401_v47 = vld [vmem:[#allocation35_spill] sm:$0xff]  ;;  %v4402_v55 = vld [vmem:[#allocation42_spill] sm:$0xff] }
  0x71   :  { %462 = vmatprep.subr.mxu1 %v4392_v60  ;;  %394 = vmatpush2.msra.mxu0 %v4393_v39  ;;  %v4403_v60 = vld [vmem:[#allocation37_spill] sm:$0xff]  ;;  %v4404_v39 = vld [vmem:[#allocation44_spill] sm:$0xff] }
  0x72   :  { %463 = vmatpush1.msra.mxu1 %v4394_v37  ;;  %395 = vmatprep.subr.mxu0 %v4395_v41  ;;  %v4405_v37 = vld [vmem:[#allocation39_spill] sm:$0xff]  ;;  %v4406_v41 = vld [vmem:[#allocation46_spill] sm:$0xff] }
  0x73   :  { %464 = vmatprep.subr.mxu1 %v4396_v48  ;;  %396 = vmatpush2.msra.mxu0 %v4397_v43  ;;  %v4407_v48 = vld [vmem:[#allocation41_spill] sm:$0xff]  ;;  %v4408_v43 = vld [vmem:[#allocation48_spill] sm:$0xff] }
  0x74   :  { %465 = vmatpush2.msra.mxu1 %v4398_v50  ;;  %397 = vmatprep.subr.mxu0 %v4399_v45  ;;  %v4409_v50 = vld [vmem:[#allocation43_spill] sm:$0xff]  ;;  %v4410_v45 = vld [vmem:[#allocation50_spill] sm:$0xff] }
  0x75   :  { %466 = vmatprep.subr.mxu1 %v4400_v52  ;;  %398 = vmatpush2.msra.mxu0 %v4401_v47  ;;  %v4411_v52 = vld [vmem:[#allocation45_spill] sm:$0xff]  ;;  %v4412_v47 = vld [vmem:[#allocation52_spill] sm:$0xff] }
  0x76   :  { %467 = vmatpush2.msra.mxu1 %v4402_v55  ;;  %399 = vmatprep.subr.mxu0 %v4403_v60  ;;  %v4413_v55 = vld [vmem:[#allocation47_spill] sm:$0xff]  ;;  %v4414_v60 = vld [vmem:[#allocation54_spill] sm:$0xff] }
  0x77   :  { %468 = vmatprep.subr.mxu1 %v4404_v39  ;;  %400 = vmatpush2.msra.mxu0 %v4405_v37  ;;  %v4415_v39 = vld [vmem:[#allocation49_spill] sm:$0xff]  ;;  %v4416_v37 = vld [vmem:[#allocation56_spill] sm:$0xff] }
  0x78   :  { %469 = vmatpush2.msra.mxu1 %v4406_v41  ;;  %401 = vmatprep.subr.mxu0 %v4407_v48  ;;  %v4417_v41 = vld [vmem:[#allocation51_spill] sm:$0xff]  ;;  %v4418_v48 = vld [vmem:[#allocation58_spill] sm:$0xff] }
  0x79   :  { %470 = vmatprep.subr.mxu1 %v4408_v43  ;;  %402 = vmatpush2.msra.mxu0 %v4409_v50  ;;  %v4419_v43 = vld [vmem:[#allocation53_spill] sm:$0xff]  ;;  %v4420_v50 = vld [vmem:[#allocation60_spill] sm:$0xff] }
  0x7a   :  { %471 = vmatpush2.msra.mxu1 %v4410_v45  ;;  %403 = vmatprep.subr.mxu0 %v4411_v52  ;;  %v4421_v45 = vld [vmem:[#allocation55_spill] sm:$0xff]  ;;  %v4422_v52 = vld [vmem:[#allocation62_spill] sm:$0xff] }
  0x7b   :  { %472 = vmatprep.subr.mxu1 %v4412_v47  ;;  %404 = vmatpush2.msra.mxu0 %v4413_v55  ;;  %v4423_v47 = vld [vmem:[#allocation57_spill] sm:$0xff]  ;;  %v4424_v55 = vld [vmem:[#allocation64_spill] sm:$0xff] }
  0x7c   :  { %473 = vmatpush2.msra.mxu1 %v4414_v60  ;;  %405 = vmatprep.subr.mxu0 %v4415_v39  ;;  %v4425_v60 = vld [vmem:[#allocation59_spill] sm:$0xff] }
  0x7d   :  { %474 = vmatprep.subr.mxu1 %v4416_v37  ;;  %406 = vmatpush2.msra.mxu0 %v4417_v41  ;;  %v4426_v39 = vld [vmem:[#allocation67_spill] sm:$0xff]  ;;  %v4427_v37 = vld [vmem:[#allocation61_spill] sm:$0xff] }
  0x7e   :  { %475 = vmatpush2.msra.mxu1 %v4418_v48  ;;  %407 = vmatprep.subr.mxu0 %v4419_v43  ;;  %v4428_v41 = vld [vmem:[#allocation69_spill] sm:$0xff]  ;;  %v4429_v48 = vld [vmem:[#allocation63_spill] sm:$0xff] }
  0x7f   :  { %476 = vmatprep.subr.mxu1 %v4420_v50  ;;  %408 = vmatpush2.msra.mxu0 %v4421_v45  ;;  %v4430_v43 = vld [vmem:[#allocation71_spill] sm:$0xff]  ;;  %v4431_v50 = vld [vmem:[#allocation65_spill] sm:$0xff] }
  0x80   :  { %477 = vmatpush2.msra.mxu1 %v4422_v52  ;;  %409 = vmatprep.subr.mxu0 %v4423_v47  ;;  %v4432_v45 = vld [vmem:[#allocation73_spill] sm:$0xff]  ;;  %v4433_v52 = vld [vmem:[#allocation66_spill] sm:$0xff]  ;;  %v4434_v47 = vld [vmem:[#allocation75_spill] sm:$0xff] }
  0x81   :  { %478 = vmatprep.subr.mxu1 %v4424_v55  ;;  %410 = vmatpush2.msra.mxu0 %v4425_v60  ;;  %v4435_v55 = vld [vmem:[#allocation68_spill] sm:$0xff]  ;;  %v4436_v60 = vld [vmem:[#allocation77_spill] sm:$0xff] }
  0x82   :  { %479 = vmatpush2.msra.mxu1 %v4426_v39  ;;  %411 = vmatprep.subr.mxu0 %v4427_v37  ;;  %v4437_v39 = vld [vmem:[#allocation70_spill] sm:$0xff]  ;;  %v4438_v37 = vld [vmem:[#allocation72_spill] sm:$0xff] }
  0x83   :  { %480 = vmatprep.subr.mxu1 %v4428_v41  ;;  %412 = vmatpush2.msra.mxu0 %v4429_v48  ;;  %v4439_v48 = vld [vmem:[#allocation74_spill] sm:$0xff] }
  0x84   :  { %481 = vmatpush2.msra.mxu1 %v4430_v43  ;;  %413 = vmatprep.subr.mxu0 %v4431_v50  ;;  %v4440_v50 = vld [vmem:[#allocation81_spill] sm:$0xff] }
  0x85   :  { %482 = vmatprep.subr.mxu1 %v4432_v45  ;;  %414 = vmatpush2.msra.mxu0 %v4433_v52  ;;  %v4441_v45 = vld [vmem:[#allocation76_spill] sm:$0xff]  ;;  %v4442_v52 = vld [vmem:[#allocation78_spill] sm:$0xff] }
  0x86   :  { %483 = vmatpush2.msra.mxu1 %v4434_v47  ;;  %415 = vmatprep.subr.mxu0 %v4435_v55  ;;  %v4443_v55 = vld [vmem:[#allocation79_spill] sm:$0xff] }
  0x87   :  { %484 = vmatprep.subr.mxu1 %v4436_v60  ;;  %416 = vmatpush2.msra.mxu0 %v4437_v39  ;;  %v4444_v39 = vld [vmem:[#allocation80_spill] sm:$0xff] }
  0x88   :  { %485 = vmatpush2.msra.mxu1 %v2575_v59  ;;  %417 = vmatprep.subr.mxu0 %v4438_v37  ;;  %v4445_v37 = vld [vmem:[#allocation82_spill] sm:$0xff] }
  0x89   :  { %486 = vmatprep.subr.mxu1 %v2581_v61  ;;  %418 = vmatpush2.msra.mxu0 %v4439_v48 }
  0x8a   :  { %487 = vmatpush2.msra.mxu1 %v4440_v50  ;;  %419 = vmatprep.subr.mxu0 %v4441_v45 }
  0x8b   :  { %488 = vmatprep.subr.mxu1 %v2593_v51  ;;  %420 = vmatpush2.msra.mxu0 %v4442_v52 }
  0x8c   :  { %489 = vmatpush2.msra.mxu1 %v2599_v62  ;;  %421 = vmatprep.subr.mxu0 %v4443_v55 }
  0x8d   :  { %490 = vmatprep.subr.mxu1 %v2603_v57  ;;  %422 = vmatpush2.msra.mxu0 %v4444_v39  ;;  %v172_v39 = vld [vmem:[%s3900_s0] sm:$0xff] }
  0x8e   :  { %491 = vmatpush2.msra.mxu1 %v2607_v58  ;;  %423 = vmatprep.subr.mxu0 %v4445_v37 }
  0x8f   :  { %492 = vmatprep.subr.mxu1 %v2611_v54  ;;  %424 = vmatpush2.msra.mxu0 %v2596_v56 }
  0x90   :  { %493 = vmatpush2.msra.mxu1 %v2615_v63  ;;  %542 = vmatprep.subr.mxu0 %v2234_v0  ;;  %v173_v0 = vld [vmem:[%s3900_s0 + $0x8] sm:$0xff] }
  0x91   :  { %494 = vmatprep.subr.mxu1 %v2618_v53 }
  0x92   :  { %495 = vmatpush2.msra.mxu1 %v2621_v49 }
  0x93   :  { %613 = vmatprep.subr.mxu1 %v2255_v8 }
 0x10f   :  { %v243_v55 = vpop.f32.mrf.mxu0 }
 0x111   :  { %v245_v37 = vpop.f32.mrf.mxu0 }
 0x112   :  { %v323_v58 = vcombine.low %v243_v55, %v245_v37 }
 0x113   :  { %v314_v52 = vpop.f32.mrf.mxu1 }
 0x114   :  { %v327_v54 = vadd.f32 %v323_v58, %v172_v39 }
 0x115   :  { %v316_v57 = vpop.f32.mrf.mxu1 }
 0x116   :  { %v1756_v56 = vmul.f32 -1.442695, %v327_v54  ;;  %v324_v63 = vcombine.low %v314_v52, %v316_v57  ;;  %v171_v54 = vld [vmem:[%s3902_s2] sm:$0xf] }
 0x118   :  { %1828 = vpow2.f32 %v1756_v56  ;;  %v328_v49 = vadd.f32 %v324_v63, %v173_v0 }
 0x11a   :  { %v1757_v53 = vmul.f32 -1.442695, %v328_v49  ;;  %v342_v8 = vrot.slane %v328_v49, 4 }
 0x11c   :  { %1830 = vpow2.f32 %v1757_v53 }
 0x11d   :  { %1832 = vtanh.f32 %v342_v8  ;;  %v4486_v8 = vld [vmem:[#allocation43_spill] sm:$0xff] }
 0x125   :  { %v1829_v45 = vpop.eup %1828 }
 0x126   :  { %v335_v62 = vadd.f32 1.0, %v1829_v45  ;;  %v2772_v45 = vld [vmem:[%s3904_s4] sm:$0xff] }
 0x127   :  { %v2776_v53 = vcombine.high %v2772_v45, %v2772_v45 }
 0x128   :  { %1834 = vrcp.f32 %v335_v62 }
 0x129   :  { %v1831_v48 = vpop.eup %1830 }
 0x12a   :  { %v1833_v37 = vpop.eup %1832  ;;  %v336_v56 = vadd.f32 1.0, %v1831_v48 }
 0x12c   :  { %1836 = vrcp.f32 %v336_v56  ;;  %v4491_v56 = vld [vmem:[#allocation58_spill] sm:$0xff] }
 0x135   :  { %v1835_v39 = vpop.eup %1834 }
 0x136   :  { %v346_v52 = vrot.slane %v1835_v39, 4  ;;  %v349_v58 = vmul.f32 %v1835_v39, %v1833_v37  ;;  %v4487_v37 = vld [vmem:[#allocation54_spill] sm:$0xff]  ;;  %v4488_v39 = vld [vmem:[#allocation45_spill] sm:$0xff] }
 0x138   :  { %v348_v57 = vmul.f32 %v346_v52, %v171_v54  ;;  %v4489_v54 = vld [vmem:[#allocation56_spill] sm:$0xff]  ;;  %v4490_v52 = vld [vmem:[#allocation47_spill] sm:$0xff] }
 0x139   :  { %v1837_v49 = vpop.eup %1836 }
 0x13a   :  { %v2766_v55 = vadd.f32 %v349_v58, %v348_v57  ;;  %v4492_v57 = vld [vmem:[#allocation49_spill] sm:$0xff]  ;;  %v4493_v58 = vld [vmem:[#allocation60_spill] sm:$0xff] }
 0x13c   :  { %1838 = vtanh.f32 %v2766_v55 }
 0x149   :  { %v1839_v62 = vpop.eup %1838 }
 0x14a   :  { %v352_v63 = vmul.f32 %v1839_v62, %v1837_v49  ;;  %v4494_v49 = vld [vmem:[#allocation51_spill] sm:$0xff]  ;;  %v4495_v62 = vld [vmem:[#allocation62_spill] sm:$0xff] }
 0x14c   :  { %v357_v48 = vmul.f32 %v2776_v53, %v352_v63  ;;  %v356_v0 = vmul.f32 %v352_v63, %v2772_v45  ;;  %v4496_v63 = vld [vmem:[#allocation53_spill] sm:$0xff] }
 0x14e   :  { %425 = vmatprep.mubr.f32.mxu0 %v357_v48  ;;  %496 = vmatprep.mubr.f32.mxu1 %v357_v48  ;;  %v4497_v48 = vld [vmem:[#allocation64_spill] sm:$0xff] }
 0x14f   :  { %426 = vmatmul.mubr.f32.vlgmr.msra.gmra.mxu0 %v356_v0  ;;  %497 = vmatmul.mubr.f32.vlgmr.msra.gmra.mxu1 %v356_v0  ;;  %v4498_v0 = vld [vmem:[#allocation55_spill] sm:$0xff] }
 0x150   :  { %543 = vmatpush1.msra.mxu0 %v2236_v1  ;;  %614 = vmatpush1.msra.mxu1 %v2261_v10  ;;  %v4446_v1 = vld [vmem:[#allocation8_spill] sm:$0xff] }
 0x151   :  { %544 = vmatprep.subr.mxu0 %v2238_v2  ;;  %615 = vmatprep.subr.mxu1 %v2267_v12  ;;  %v4447_v2 = vld [vmem:[#allocation14_spill] sm:$0xff]  ;;  %v4454_v10 = vld [vmem:[#allocation12_spill] sm:$0xff]  ;;  %v4456_v12 = vld [vmem:[#allocation13_spill] sm:$0xff] }
 0x152   :  { %545 = vmatpush1.msra.mxu0 %v2241_v3  ;;  %616 = vmatpush1.msra.mxu1 %v2269_v13  ;;  %v4448_v3 = vld [vmem:[#allocation9_spill] sm:$0xff]  ;;  %v4457_v13 = vld [vmem:[#allocation24_spill] sm:$0xff] }
 0x153   :  { %546 = vmatprep.subr.mxu0 %v2244_v4  ;;  %617 = vmatprep.subr.mxu1 %v2275_v15  ;;  %v4449_v4 = vld [vmem:[#allocation16_spill] sm:$0xff]  ;;  %v4459_v15 = vld [vmem:[#allocation26_spill] sm:$0xff] }
 0x154   :  { %547 = vmatpush1.msra.mxu0 %v2247_v5  ;;  %618 = vmatpush1.msra.mxu1 %v2281_v17  ;;  %v4450_v5 = vld [vmem:[#allocation10_spill] sm:$0xff]  ;;  %v4461_v17 = vld [vmem:[#allocation28_spill] sm:$0xff] }
 0x155   :  { %548 = vmatprep.subr.mxu0 %v2250_v6  ;;  %619 = vmatprep.subr.mxu1 %v2283_v18  ;;  %v4451_v6 = vld [vmem:[#allocation18_spill] sm:$0xff]  ;;  %v4462_v18 = vld [vmem:[#allocation19_spill] sm:$0xff] }
 0x156   :  { %549 = vmatpush1.msra.mxu0 %v2253_v7  ;;  %620 = vmatpush1.msra.mxu1 %v2289_v20  ;;  %v4452_v7 = vld [vmem:[#allocation11_spill] sm:$0xff]  ;;  %v4464_v20 = vld [vmem:[#allocation21_spill] sm:$0xff] }
 0x157   :  { %550 = vmatprep.subr.mxu0 %v2258_v9  ;;  %621 = vmatprep.subr.mxu1 %v2295_v22  ;;  %v4453_v9 = vld [vmem:[#allocation20_spill] sm:$0xff]  ;;  %v4466_v22 = vld [vmem:[#allocation23_spill] sm:$0xff] }
 0x158   :  { %551 = vmatpush1.msra.mxu0 %v2264_v11  ;;  %622 = vmatpush1.msra.mxu1 %v2301_v24  ;;  %v4455_v11 = vld [vmem:[#allocation22_spill] sm:$0xff]  ;;  %v4468_v24 = vld [vmem:[#allocation25_spill] sm:$0xff] }
 0x159   :  { %552 = vmatprep.subr.mxu0 %v2272_v14  ;;  %623 = vmatprep.subr.mxu1 %v2307_v26  ;;  %v4458_v14 = vld [vmem:[#allocation15_spill] sm:$0xff] }
 0x15a   :  { %553 = vmatpush1.msra.mxu0 %v2278_v16  ;;  %624 = vmatpush1.msra.mxu1 %v2313_v28  ;;  %v4460_v16 = vld [vmem:[#allocation17_spill] sm:$0xff]  ;;  %v4470_v26 = vld [vmem:[#allocation27_spill] sm:$0xff] }
 0x15b   :  { %554 = vmatprep.subr.mxu0 %v2286_v19  ;;  %625 = vmatprep.subr.mxu1 %v2319_v30  ;;  %v4463_v19 = vld [vmem:[#allocation30_spill] sm:$0xff]  ;;  %v4472_v28 = vld [vmem:[#allocation29_spill] sm:$0xff]  ;;  %v4474_v30 = vld [vmem:[#allocation31_spill] sm:$0xff] }
 0x15c   :  { %555 = vmatpush1.msra.mxu0 %v2292_v21  ;;  %626 = vmatpush1.msra.mxu1 %v2325_v32  ;;  %v4465_v21 = vld [vmem:[#allocation32_spill] sm:$0xff]  ;;  %v4476_v32 = vld [vmem:[#allocation33_spill] sm:$0xff] }
 0x15d   :  { %556 = vmatprep.subr.mxu0 %v2298_v23  ;;  %627 = vmatprep.subr.mxu1 %v2331_v34  ;;  %v4467_v23 = vld [vmem:[#allocation34_spill] sm:$0xff]  ;;  %v4478_v34 = vld [vmem:[#allocation35_spill] sm:$0xff] }
 0x15e   :  { %557 = vmatpush1.msra.mxu0 %v2304_v25  ;;  %628 = vmatpush1.msra.mxu1 %v2337_v36  ;;  %v4469_v25 = vld [vmem:[#allocation36_spill] sm:$0xff]  ;;  %v4480_v36 = vld [vmem:[#allocation37_spill] sm:$0xff] }
 0x15f   :  { %558 = vmatprep.subr.mxu0 %v2310_v27  ;;  %629 = vmatprep.subr.mxu1 %v2343_v38  ;;  %v4471_v27 = vld [vmem:[#allocation38_spill] sm:$0xff]  ;;  %v4481_v38 = vld [vmem:[#allocation48_spill] sm:$0xff] }
 0x160   :  { %559 = vmatpush1.msra.mxu0 %v2316_v29  ;;  %630 = vmatpush1.msra.mxu1 %v2349_v40  ;;  %v4473_v29 = vld [vmem:[#allocation40_spill] sm:$0xff]  ;;  %v4482_v40 = vld [vmem:[#allocation39_spill] sm:$0xff] }
 0x161   :  { %560 = vmatprep.subr.mxu0 %v2322_v31  ;;  %631 = vmatprep.subr.mxu1 %v2355_v42  ;;  %v4475_v31 = vld [vmem:[#allocation42_spill] sm:$0xff] }
 0x162   :  { %561 = vmatpush1.msra.mxu0 %v2328_v33  ;;  %632 = vmatpush1.msra.mxu1 %v2361_v44  ;;  %v4477_v33 = vld [vmem:[#allocation44_spill] sm:$0xff]  ;;  %v4483_v42 = vld [vmem:[#allocation50_spill] sm:$0xff]  ;;  %v4484_v44 = vld [vmem:[#allocation41_spill] sm:$0xff] }
 0x163   :  { %562 = vmatprep.subr.mxu0 %v2334_v35  ;;  %633 = vmatprep.subr.mxu1 %v2367_v46  ;;  %v4479_v35 = vld [vmem:[#allocation46_spill] sm:$0xff]  ;;  %v4485_v46 = vld [vmem:[#allocation52_spill] sm:$0xff] }
 0x164   :  { %563 = vmatpush1.msra.mxu0 %v4446_v1  ;;  %634 = vmatpush1.msra.mxu1 %v4447_v2  ;;  %v4499_v1 = vld [vmem:[#allocation67_spill] sm:$0xff]  ;;  %v4500_v2 = vld [vmem:[#allocation57_spill] sm:$0xff] }
 0x165   :  { %564 = vmatprep.subr.mxu0 %v4448_v3  ;;  %635 = vmatprep.subr.mxu1 %v4449_v4  ;;  %v4501_v3 = vld [vmem:[#allocation59_spill] sm:$0xff]  ;;  %v4502_v4 = vld [vmem:[#allocation61_spill] sm:$0xff] }
 0x166   :  { %565 = vmatpush1.msra.mxu0 %v4450_v5  ;;  %636 = vmatpush1.msra.mxu1 %v4451_v6  ;;  %v4503_v5 = vld [vmem:[#allocation73_spill] sm:$0xff]  ;;  %v4504_v6 = vld [vmem:[#allocation63_spill] sm:$0xff] }
 0x167   :  { %566 = vmatprep.subr.mxu0 %v4452_v7  ;;  %637 = vmatprep.subr.mxu1 %v4453_v9  ;;  %v4505_v7 = vld [vmem:[#allocation65_spill] sm:$0xff]  ;;  %v4506_v9 = vld [vmem:[#allocation66_spill] sm:$0xff] }
 0x168   :  { %567 = vmatpush1.msra.mxu0 %v4454_v10  ;;  %638 = vmatpush1.msra.mxu1 %v4455_v11  ;;  %v4507_v10 = vld [vmem:[#allocation68_spill] sm:$0xff]  ;;  %v4508_v11 = vld [vmem:[#allocation70_spill] sm:$0xff] }
 0x169   :  { %568 = vmatprep.subr.mxu0 %v4456_v12  ;;  %639 = vmatprep.subr.mxu1 %v4457_v13  ;;  %v4509_v12 = vld [vmem:[#allocation72_spill] sm:$0xff]  ;;  %v4510_v13 = vld [vmem:[#allocation74_spill] sm:$0xff] }
 0x16a   :  { %569 = vmatpush1.msra.mxu0 %v4458_v14  ;;  %640 = vmatpush1.msra.mxu1 %v4459_v15  ;;  %v4511_v14 = vld [vmem:[#allocation84_spill] sm:$0xff] }
 0x16b   :  { %570 = vmatprep.subr.mxu0 %v4460_v16  ;;  %641 = vmatprep.subr.mxu1 %v4461_v17  ;;  %v4512_v15 = vld [vmem:[#allocation76_spill] sm:$0xff]  ;;  %v4513_v16 = vld [vmem:[#allocation85_spill] sm:$0xff]  ;;  %v4514_v17 = vld [vmem:[#allocation78_spill] sm:$0xff] }
 0x16c   :  { %571 = vmatpush1.msra.mxu0 %v4462_v18  ;;  %642 = vmatpush1.msra.mxu1 %v4463_v19  ;;  %v4515_v18 = vld [vmem:[#allocation86_spill] sm:$0xff]  ;;  %v4516_v19 = vld [vmem:[#allocation79_spill] sm:$0xff] }
 0x16d   :  { %572 = vmatprep.subr.mxu0 %v4464_v20  ;;  %643 = vmatprep.subr.mxu1 %v4465_v21  ;;  %v4517_v20 = vld [vmem:[#allocation87_spill] sm:$0xff]  ;;  %v4518_v21 = vld [vmem:[#allocation80_spill] sm:$0xff] }
 0x16e   :  { %573 = vmatpush1.msra.mxu0 %v4466_v22  ;;  %644 = vmatpush1.msra.mxu1 %v4467_v23  ;;  %v4519_v22 = vld [vmem:[#allocation88_spill] sm:$0xff]  ;;  %v4520_v23 = vld [vmem:[#allocation82_spill] sm:$0xff] }
 0x16f   :  { %574 = vmatprep.subr.mxu0 %v4468_v24  ;;  %645 = vmatprep.subr.mxu1 %v4469_v25  ;;  %v4521_v24 = vld [vmem:[#allocation89_spill] sm:$0xff]  ;;  %v4522_v25 = vld [vmem:[#allocation83_spill] sm:$0xff] }
 0x170   :  { %575 = vmatpush2.msra.mxu0 %v4470_v26  ;;  %646 = vmatpush2.msra.mxu1 %v4471_v27  ;;  %v4523_v26 = vld [vmem:[#allocation90_spill] sm:$0xff]  ;;  %v2906_v27 = vld [vmem:[#allocation2 + $0x1e8] sm:$0xff] }
 0x171   :  { %576 = vmatprep.subr.mxu0 %v4472_v28  ;;  %647 = vmatprep.subr.mxu1 %v4473_v29  ;;  %4524 = vst [vmem:[#allocation69_spill] sm:$0xff] %v2906_v27  ;;  %v2909_v28 = vld [vmem:[#allocation2 + $0x1f8] sm:$0xff] }
 0x172   :  { %577 = vmatpush2.msra.mxu0 %v4474_v30  ;;  %648 = vmatpush2.msra.mxu1 %v4475_v31  ;;  %4525 = vst [vmem:[#allocation71_spill] sm:$0xff] %v2909_v28  ;;  %v1758_v30 = vld [vmem:[%s3900_s0 + $0x10] sm:$0xff] }
 0x173   :  { %578 = vmatprep.subr.mxu0 %v4476_v32  ;;  %649 = vmatprep.subr.mxu1 %v4477_v33 }
 0x174   :  { %579 = vmatpush2.msra.mxu0 %v4478_v34  ;;  %650 = vmatpush2.msra.mxu1 %v4479_v35 }
 0x175   :  { %580 = vmatprep.subr.mxu0 %v4480_v36  ;;  %651 = vmatprep.subr.mxu1 %v4481_v38 }
 0x176   :  { %581 = vmatpush2.msra.mxu0 %v4482_v40  ;;  %652 = vmatpush2.msra.mxu1 %v4483_v42  ;;  %v1759_v40 = vld [vmem:[%s3900_s0 + $0x18] sm:$0xff] }
 0x177   :  { %582 = vmatprep.subr.mxu0 %v4484_v44  ;;  %653 = vmatprep.subr.mxu1 %v4485_v46 }
 0x178   :  { %583 = vmatpush2.msra.mxu0 %v4486_v8  ;;  %654 = vmatpush2.msra.mxu1 %v4487_v37 }
 0x179   :  { %584 = vmatprep.subr.mxu0 %v4488_v39  ;;  %655 = vmatprep.subr.mxu1 %v4489_v54 }
 0x17a   :  { %585 = vmatpush2.msra.mxu0 %v4490_v52  ;;  %656 = vmatpush2.msra.mxu1 %v4491_v56 }
 0x17b   :  { %586 = vmatprep.subr.mxu0 %v4492_v57  ;;  %657 = vmatprep.subr.mxu1 %v4493_v58 }
 0x17c   :  { %587 = vmatpush2.msra.mxu0 %v4494_v49  ;;  %658 = vmatpush2.msra.mxu1 %v4495_v62 }
 0x17d   :  { %588 = vmatprep.subr.mxu0 %v4496_v63  ;;  %659 = vmatprep.subr.mxu1 %v4497_v48 }
 0x17e   :  { %589 = vmatpush2.msra.mxu0 %v4498_v0  ;;  %660 = vmatpush2.msra.mxu1 %v4499_v1 }
 0x17f   :  { %590 = vmatprep.subr.mxu0 %v4500_v2  ;;  %661 = vmatprep.subr.mxu1 %v4428_v41 }
 0x180   :  { %591 = vmatpush2.msra.mxu0 %v4501_v3  ;;  %662 = vmatpush2.msra.mxu1 %v4430_v43 }
 0x181   :  { %592 = vmatprep.subr.mxu0 %v4502_v4  ;;  %663 = vmatprep.subr.mxu1 %v4503_v5 }
 0x182   :  { %593 = vmatpush2.msra.mxu0 %v4504_v6  ;;  %664 = vmatpush2.msra.mxu1 %v4434_v47 }
 0x183   :  { %594 = vmatprep.subr.mxu0 %v4505_v7  ;;  %665 = vmatprep.subr.mxu1 %v4436_v60 }
 0x184   :  { %595 = vmatpush2.msra.mxu0 %v4506_v9  ;;  %666 = vmatpush2.msra.mxu1 %v2575_v59 }
 0x185   :  { %596 = vmatprep.subr.mxu0 %v4507_v10  ;;  %667 = vmatprep.subr.mxu1 %v2581_v61 }
 0x186   :  { %597 = vmatpush2.msra.mxu0 %v4508_v11  ;;  %668 = vmatpush2.msra.mxu1 %v4440_v50 }
 0x187   :  { %598 = vmatprep.subr.mxu0 %v4509_v12  ;;  %669 = vmatprep.subr.mxu1 %v2593_v51 }
 0x188   :  { %599 = vmatpush2.msra.mxu0 %v4510_v13  ;;  %670 = vmatpush2.msra.mxu1 %v4511_v14 }
 0x189   :  { %600 = vmatprep.subr.mxu0 %v4512_v15  ;;  %671 = vmatprep.subr.mxu1 %v4513_v16 }
 0x18a   :  { %601 = vmatpush2.msra.mxu0 %v4514_v17  ;;  %672 = vmatpush2.msra.mxu1 %v4515_v18 }
 0x18b   :  { %602 = vmatprep.subr.mxu0 %v4516_v19  ;;  %673 = vmatprep.subr.mxu1 %v4517_v20 }
 0x18c   :  { %603 = vmatpush2.msra.mxu0 %v4518_v21  ;;  %674 = vmatpush2.msra.mxu1 %v4519_v22 }
 0x18d   :  { %604 = vmatprep.subr.mxu0 %v4520_v23  ;;  %675 = vmatprep.subr.mxu1 %v4521_v24 }
 0x18e   :  { %605 = vmatpush2.msra.mxu0 %v4522_v25  ;;  %676 = vmatpush2.msra.mxu1 %v4523_v26 }
 0x18f   :  { %723 = vmatprep.subr.mxu0 %v2906_v27  ;;  %794 = vmatprep.subr.mxu1 %v2909_v28 }
 0x20f   :  { %v427_v29 = vpop.f32.mrf.mxu0  ;;  %v498_v33 = vpop.f32.mrf.mxu1 }
 0x211   :  { %v429_v31 = vpop.f32.mrf.mxu0  ;;  %v500_v36 = vpop.f32.mrf.mxu1 }
 0x212   :  { %v507_v32 = vcombine.low %v427_v29, %v429_v31  ;;  %v508_v38 = vcombine.low %v498_v33, %v500_v36  ;;  %v2924_v36 = vld [vmem:[#allocation2 + $0x1e0] sm:$0xff] }
 0x214   :  { %v511_v34 = vadd.f32 %v1758_v30, %v507_v32  ;;  %v512_v42 = vadd.f32 %v1759_v40, %v508_v38  ;;  %v2930_v38 = vld [vmem:[#allocation2 + $0x1c8] sm:$0xff]  ;;  %v2933_v40 = vld [vmem:[#allocation2 + $0x1d8] sm:$0xff] }
 0x216   :  { %v1760_v35 = vmul.f32 -1.442695, %v511_v34  ;;  %v1761_v44 = vmul.f32 -1.442695, %v512_v42  ;;  %v526_v52 = vrot.slane %v512_v42, 4  ;;  %v2936_v42 = vld [vmem:[#allocation2 + $0x1c0] sm:$0xff] }
 0x218   :  { %1840 = vpow2.f32 %v1760_v35 }
 0x219   :  { %1842 = vpow2.f32 %v1761_v44  ;;  %v2939_v44 = vld [vmem:[#allocation2 + $0x1d0] sm:$0xff] }
 0x225   :  { %v1841_v8 = vpop.eup %1840 }
 0x226   :  { %v519_v39 = vadd.f32 1.0, %v1841_v8  ;;  %v1843_v57 = vpop.eup %1842  ;;  %v2942_v8 = vld [vmem:[#allocation2 + $0x1a8] sm:$0xff] }
 0x227   :  { %v520_v2 = vadd.f32 1.0, %v1843_v57  ;;  %v2951_v57 = vld [vmem:[#allocation2 + $0x1b0] sm:$0xff] }
 0x228   :  { %1844 = vrcp.f32 %v519_v39  ;;  %v2945_v39 = vld [vmem:[#allocation2 + $0x1b8] sm:$0xff] }
 0x229   :  { %1846 = vtanh.f32 %v526_v52  ;;  %v2948_v52 = vld [vmem:[#allocation2 + $0x1a0] sm:$0xff] }
 0x22a   :  { %1848 = vrcp.f32 %v520_v2  ;;  %v2963_v2 = vld [vmem:[#allocation2 + $0x190] sm:$0xff] }
 0x235   :  { %v1845_v49 = vpop.eup %1844 }
 0x236   :  { %v530_v63 = vrot.slane %v1845_v49, 4  ;;  %v1847_v0 = vpop.eup %1846 }
 0x237   :  { %v533_v29 = vmul.f32 %v1847_v0, %v1845_v49  ;;  %v1849_v31 = vpop.eup %1848  ;;  %v2954_v49 = vld [vmem:[#allocation2 + $0x188] sm:$0xff]  ;;  %v2960_v0 = vld [vmem:[#allocation2 + $0x180] sm:$0xff] }
 0x238   :  { %v532_v3 = vmul.f32 %v530_v63, %v2766_v55  ;;  %v2927_v55 = vld [vmem:[#allocation2 + $0x1f0] sm:$0xff]  ;;  %v2957_v63 = vld [vmem:[#allocation2 + $0x198] sm:$0xff] }
 0x23a   :  { %v2919_v30 = vadd.f32 %v533_v29, %v532_v3  ;;  %v2966_v3 = vld [vmem:[#allocation2 + $0x168] sm:$0xff]  ;;  %v2969_v29 = vld [vmem:[#allocation2 + $0x178] sm:$0xff] }
 0x23b   :  { %4526 = vst [vmem:[#allocation75_spill] sm:$0xff] %v2969_v29 }
 0x23c   :  { %1850 = vtanh.f32 %v2919_v30 }
 0x249   :  { %v1851_v32 = vpop.eup %1850 }
 0x24a   :  { %v536_v33 = vmul.f32 %v1851_v32, %v1849_v31  ;;  %v2972_v31 = vld [vmem:[#allocation2 + $0x160] sm:$0xff]  ;;  %v2975_v32 = vld [vmem:[#allocation2 + $0x170] sm:$0xff] }
 0x24b   :  { %4527 = vst [vmem:[#allocation77_spill] sm:$0xff] %v2972_v31  ;;  %4528 = vst [vmem:[#allocation81_spill] sm:$0xff] %v2975_v32 }
 0x24c   :  { %v538_v34 = vmul.f32 %v536_v33, %v2776_v53  ;;  %v537_v35 = vmul.f32 %v536_v33, %v2772_v45  ;;  %v2978_v33 = vld [vmem:[#allocation2 + $0x148] sm:$0xff] }
 0x24d   :  { %4529 = vst [vmem:[#allocation8_spill] sm:$0xff] %v2978_v33 }
 0x24e   :  { %606 = vmatprep.mubr.f32.mxu0 %v538_v34  ;;  %677 = vmatprep.mubr.f32.mxu1 %v538_v34  ;;  %v2981_v34 = vld [vmem:[#allocation2 + $0x158] sm:$0xff] }
 0x24f   :  { %607 = vmatmul.mubr.f32.vlgmr.msra.gmra.mxu0 %v537_v35  ;;  %678 = vmatmul.mubr.f32.vlgmr.msra.gmra.mxu1 %v537_v35  ;;  %4530 = vst [vmem:[#allocation14_spill] sm:$0xff] %v2981_v34  ;;  %v2984_v35 = vld [vmem:[#allocation2 + $0x140] sm:$0xff] }
 0x250   :  { %724 = vmatpush1.msra.mxu0 %v2924_v36  ;;  %795 = vmatpush1.msra.mxu1 %v2927_v55  ;;  %4531 = vst [vmem:[#allocation9_spill] sm:$0xff] %v2984_v35 }
 0x251   :  { %725 = vmatprep.subr.mxu0 %v2930_v38  ;;  %796 = vmatprep.subr.mxu1 %v2933_v40 }
 0x252   :  { %726 = vmatpush1.msra.mxu0 %v2936_v42  ;;  %797 = vmatpush1.msra.mxu1 %v2939_v44 }
 0x253   :  { %727 = vmatprep.subr.mxu0 %v2942_v8  ;;  %798 = vmatprep.subr.mxu1 %v2945_v39 }
 0x254   :  { %728 = vmatpush1.msra.mxu0 %v2948_v52  ;;  %799 = vmatpush1.msra.mxu1 %v2951_v57 }
 0x255   :  { %729 = vmatprep.subr.mxu0 %v2954_v49  ;;  %800 = vmatprep.subr.mxu1 %v2957_v63 }
 0x256   :  { %730 = vmatpush1.msra.mxu0 %v2960_v0  ;;  %801 = vmatpush1.msra.mxu1 %v2963_v2 }
 0x257   :  { %731 = vmatprep.subr.mxu0 %v2966_v3  ;;  %802 = vmatprep.subr.mxu1 %v2969_v29  ;;  %v2987_v29 = vld [vmem:[#allocation2 + $0x150] sm:$0xff] }
 0x258   :  { %732 = vmatpush1.msra.mxu0 %v2972_v31  ;;  %803 = vmatpush1.msra.mxu1 %v2975_v32  ;;  %4532 = vst [vmem:[#allocation16_spill] sm:$0xff] %v2987_v29  ;;  %v2990_v31 = vld [vmem:[#allocation2 + $0x128] sm:$0xff]  ;;  %v2993_v32 = vld [vmem:[#allocation2 + $0x138] sm:$0xff] }
 0x259   :  { %733 = vmatprep.subr.mxu0 %v2978_v33  ;;  %804 = vmatprep.subr.mxu1 %v2981_v34  ;;  %4533 = vst [vmem:[#allocation10_spill] sm:$0xff] %v2990_v31  ;;  %4534 = vst [vmem:[#allocation18_spill] sm:$0xff] %v2993_v32  ;;  %v2996_v33 = vld [vmem:[#allocation2 + $0x120] sm:$0xff]  ;;  %v2999_v34 = vld [vmem:[#allocation2 + $0x130] sm:$0xff] }
 0x25a   :  { %734 = vmatpush1.msra.mxu0 %v2984_v35  ;;  %805 = vmatpush1.msra.mxu1 %v2987_v29  ;;  %4535 = vst [vmem:[#allocation11_spill] sm:$0xff] %v2996_v33  ;;  %4536 = vst [vmem:[#allocation20_spill] sm:$0xff] %v2999_v34  ;;  %v3002_v35 = vld [vmem:[#allocation2 + $0x108] sm:$0xff]  ;;  %v3005_v29 = vld [vmem:[#allocation2 + $0x118] sm:$0xff] }
 0x25b   :  { %735 = vmatprep.subr.mxu0 %v2990_v31  ;;  %806 = vmatprep.subr.mxu1 %v2993_v32  ;;  %4537 = vst [vmem:[#allocation12_spill] sm:$0xff] %v3002_v35  ;;  %4538 = vst [vmem:[#allocation22_spill] sm:$0xff] %v3005_v29  ;;  %v3008_v31 = vld [vmem:[#allocation2 + $0x100] sm:$0xff]  ;;  %v3011_v32 = vld [vmem:[#allocation2 + $0x110] sm:$0xff] }
 0x25c   :  { %736 = vmatpush1.msra.mxu0 %v2996_v33  ;;  %807 = vmatpush1.msra.mxu1 %v2999_v34  ;;  %4539 = vst [vmem:[#allocation13_spill] sm:$0xff] %v3008_v31  ;;  %4540 = vst [vmem:[#allocation24_spill] sm:$0xff] %v3011_v32  ;;  %v3014_v33 = vld [vmem:[#allocation2 + $0xe8] sm:$0xff]  ;;  %v3017_v34 = vld [vmem:[#allocation2 + $0xf8] sm:$0xff] }
 0x25d   :  { %737 = vmatprep.subr.mxu0 %v3002_v35  ;;  %808 = vmatprep.subr.mxu1 %v3005_v29  ;;  %4541 = vst [vmem:[#allocation15_spill] sm:$0xff] %v3014_v33  ;;  %4542 = vst [vmem:[#allocation26_spill] sm:$0xff] %v3017_v34  ;;  %v3020_v35 = vld [vmem:[#allocation2 + $0xe0] sm:$0xff]  ;;  %v3023_v29 = vld [vmem:[#allocation2 + $0xf0] sm:$0xff] }
 0x25e   :  { %738 = vmatpush1.msra.mxu0 %v3008_v31  ;;  %809 = vmatpush1.msra.mxu1 %v3011_v32  ;;  %4543 = vst [vmem:[#allocation17_spill] sm:$0xff] %v3020_v35  ;;  %4544 = vst [vmem:[#allocation28_spill] sm:$0xff] %v3023_v29  ;;  %v3026_v31 = vld [vmem:[#allocation2 + $0xc8] sm:$0xff]  ;;  %v3029_v32 = vld [vmem:[#allocation2 + $0xd8] sm:$0xff] }
 0x25f   :  { %739 = vmatprep.subr.mxu0 %v3014_v33  ;;  %810 = vmatprep.subr.mxu1 %v3017_v34  ;;  %4545 = vst [vmem:[#allocation19_spill] sm:$0xff] %v3026_v31  ;;  %4546 = vst [vmem:[#allocation30_spill] sm:$0xff] %v3029_v32  ;;  %v3032_v33 = vld [vmem:[#allocation2 + $0xc0] sm:$0xff]  ;;  %v3035_v34 = vld [vmem:[#allocation2 + $0xd0] sm:$0xff] }
 0x260   :  { %740 = vmatpush1.msra.mxu0 %v3020_v35  ;;  %811 = vmatpush1.msra.mxu1 %v3023_v29  ;;  %4547 = vst [vmem:[#allocation21_spill] sm:$0xff] %v3032_v33  ;;  %4548 = vst [vmem:[#allocation32_spill] sm:$0xff] %v3035_v34  ;;  %v3038_v35 = vld [vmem:[#allocation2 + $0xa8] sm:$0xff]  ;;  %v3041_v29 = vld [vmem:[#allocation2 + $0xb8] sm:$0xff] }
 0x261   :  { %741 = vmatprep.subr.mxu0 %v3026_v31  ;;  %812 = vmatprep.subr.mxu1 %v3029_v32  ;;  %4549 = vst [vmem:[#allocation23_spill] sm:$0xff] %v3038_v35  ;;  %4550 = vst [vmem:[#allocation34_spill] sm:$0xff] %v3041_v29  ;;  %v3044_v31 = vld [vmem:[#allocation2 + $0xa0] sm:$0xff]  ;;  %v3047_v32 = vld [vmem:[#allocation2 + $0xb0] sm:$0xff] }
 0x262   :  { %742 = vmatpush1.msra.mxu0 %v3032_v33  ;;  %813 = vmatpush1.msra.mxu1 %v3035_v34  ;;  %4551 = vst [vmem:[#allocation25_spill] sm:$0xff] %v3044_v31  ;;  %4552 = vst [vmem:[#allocation36_spill] sm:$0xff] %v3047_v32  ;;  %v3050_v33 = vld [vmem:[#allocation2 + $0x88] sm:$0xff]  ;;  %v3053_v34 = vld [vmem:[#allocation2 + $0x98] sm:$0xff] }
 0x263   :  { %743 = vmatprep.subr.mxu0 %v3038_v35  ;;  %814 = vmatprep.subr.mxu1 %v3041_v29  ;;  %4553 = vst [vmem:[#allocation27_spill] sm:$0xff] %v3050_v33  ;;  %4554 = vst [vmem:[#allocation38_spill] sm:$0xff] %v3053_v34  ;;  %v3056_v35 = vld [vmem:[#allocation2 + $0x80] sm:$0xff]  ;;  %v3059_v29 = vld [vmem:[#allocation2 + $0x90] sm:$0xff] }
 0x264   :  { %744 = vmatpush1.msra.mxu0 %v3044_v31  ;;  %815 = vmatpush1.msra.mxu1 %v3047_v32  ;;  %4555 = vst [vmem:[#allocation29_spill] sm:$0xff] %v3056_v35  ;;  %4556 = vst [vmem:[#allocation40_spill] sm:$0xff] %v3059_v29  ;;  %v3062_v31 = vld [vmem:[#allocation2 + $0x68] sm:$0xff]  ;;  %v3065_v32 = vld [vmem:[#allocation2 + $0x78] sm:$0xff] }
 0x265   :  { %745 = vmatprep.subr.mxu0 %v3050_v33  ;;  %816 = vmatprep.subr.mxu1 %v3053_v34  ;;  %4557 = vst [vmem:[#allocation31_spill] sm:$0xff] %v3062_v31  ;;  %4558 = vst [vmem:[#allocation42_spill] sm:$0xff] %v3065_v32  ;;  %v3068_v33 = vld [vmem:[#allocation2 + $0x60] sm:$0xff]  ;;  %v3071_v34 = vld [vmem:[#allocation2 + $0x70] sm:$0xff] }
 0x266   :  { %746 = vmatpush1.msra.mxu0 %v3056_v35  ;;  %817 = vmatpush1.msra.mxu1 %v3059_v29  ;;  %4559 = vst [vmem:[#allocation33_spill] sm:$0xff] %v3068_v33  ;;  %4560 = vst [vmem:[#allocation44_spill] sm:$0xff] %v3071_v34  ;;  %v3074_v35 = vld [vmem:[#allocation2 + $0x48] sm:$0xff]  ;;  %v3077_v29 = vld [vmem:[#allocation2 + $0x58] sm:$0xff] }
 0x267   :  { %747 = vmatprep.subr.mxu0 %v3062_v31  ;;  %818 = vmatprep.subr.mxu1 %v3065_v32  ;;  %4561 = vst [vmem:[#allocation35_spill] sm:$0xff] %v3074_v35  ;;  %4562 = vst [vmem:[#allocation46_spill] sm:$0xff] %v3077_v29  ;;  %v3080_v31 = vld [vmem:[#allocation2 + $0x40] sm:$0xff]  ;;  %v3083_v32 = vld [vmem:[#allocation2 + $0x50] sm:$0xff] }
 0x268   :  { %748 = vmatpush1.msra.mxu0 %v3068_v33  ;;  %819 = vmatpush1.msra.mxu1 %v3071_v34  ;;  %4563 = vst [vmem:[#allocation37_spill] sm:$0xff] %v3080_v31  ;;  %4564 = vst [vmem:[#allocation48_spill] sm:$0xff] %v3083_v32  ;;  %v3086_v33 = vld [vmem:[#allocation2 + $0x28] sm:$0xff]  ;;  %v3089_v34 = vld [vmem:[#allocation2 + $0x38] sm:$0xff] }
 0x269   :  { %749 = vmatprep.subr.mxu0 %v3074_v35  ;;  %820 = vmatprep.subr.mxu1 %v3077_v29  ;;  %4565 = vst [vmem:[#allocation39_spill] sm:$0xff] %v3086_v33  ;;  %4566 = vst [vmem:[#allocation50_spill] sm:$0xff] %v3089_v34  ;;  %v3092_v35 = vld [vmem:[#allocation2 + $0x20] sm:$0xff]  ;;  %v3095_v29 = vld [vmem:[#allocation2 + $0x30] sm:$0xff] }
 0x26a   :  { %750 = vmatpush1.msra.mxu0 %v3080_v31  ;;  %821 = vmatpush1.msra.mxu1 %v3083_v32  ;;  %4567 = vst [vmem:[#allocation41_spill] sm:$0xff] %v3092_v35  ;;  %4568 = vst [vmem:[#allocation52_spill] sm:$0xff] %v3095_v29  ;;  %v3098_v31 = vld [vmem:[#allocation2 + $0x8] sm:$0xff]  ;;  %v3101_v32 = vld [vmem:[#allocation2 + $0x18] sm:$0xff] }
 0x26b   :  { %751 = vmatprep.subr.mxu0 %v3086_v33  ;;  %822 = vmatprep.subr.mxu1 %v3089_v34  ;;  %4569 = vst [vmem:[#allocation43_spill] sm:$0xff] %v3098_v31  ;;  %4570 = vst [vmem:[#allocation54_spill] sm:$0xff] %v3101_v32  ;;  %v3104_v33 = vld [vmem:[#allocation2] sm:$0xff]  ;;  %v3107_v34 = vld [vmem:[#allocation2 + $0x10] sm:$0xff] }
 0x26c   :  { %752 = vmatpush1.msra.mxu0 %v3092_v35  ;;  %823 = vmatpush1.msra.mxu1 %v3095_v29  ;;  %4571 = vst [vmem:[#allocation45_spill] sm:$0xff] %v3104_v33  ;;  %4572 = vst [vmem:[#allocation56_spill] sm:$0xff] %v3107_v34  ;;  %v3110_v35 = vld [vmem:[#allocation2 + $0x3e8] sm:$0xff]  ;;  %v3113_v29 = vld [vmem:[#allocation2 + $0x3f8] sm:$0xff] }
 0x26d   :  { %753 = vmatprep.subr.mxu0 %v3098_v31  ;;  %824 = vmatprep.subr.mxu1 %v3101_v32  ;;  %4573 = vst [vmem:[#allocation47_spill] sm:$0xff] %v3110_v35  ;;  %4574 = vst [vmem:[#allocation58_spill] sm:$0xff] %v3113_v29  ;;  %v3116_v31 = vld [vmem:[#allocation2 + $0x3e0] sm:$0xff]  ;;  %v3119_v32 = vld [vmem:[#allocation2 + $0x3f0] sm:$0xff] }
 0x26e   :  { %754 = vmatpush1.msra.mxu0 %v3104_v33  ;;  %825 = vmatpush1.msra.mxu1 %v3107_v34  ;;  %4575 = vst [vmem:[#allocation49_spill] sm:$0xff] %v3116_v31  ;;  %4576 = vst [vmem:[#allocation60_spill] sm:$0xff] %v3119_v32  ;;  %v3122_v33 = vld [vmem:[#allocation2 + $0x3c8] sm:$0xff]  ;;  %v3125_v34 = vld [vmem:[#allocation2 + $0x3d8] sm:$0xff] }
 0x26f   :  { %755 = vmatprep.subr.mxu0 %v3110_v35  ;;  %826 = vmatprep.subr.mxu1 %v3113_v29  ;;  %4577 = vst [vmem:[#allocation51_spill] sm:$0xff] %v3122_v33  ;;  %4578 = vst [vmem:[#allocation62_spill] sm:$0xff] %v3125_v34  ;;  %v3128_v35 = vld [vmem:[#allocation2 + $0x3c0] sm:$0xff]  ;;  %v3131_v29 = vld [vmem:[#allocation2 + $0x3d0] sm:$0xff] }
 0x270   :  { %756 = vmatpush2.msra.mxu0 %v3116_v31  ;;  %827 = vmatpush2.msra.mxu1 %v3119_v32  ;;  %4579 = vst [vmem:[#allocation53_spill] sm:$0xff] %v3128_v35  ;;  %4580 = vst [vmem:[#allocation64_spill] sm:$0xff] %v3131_v29  ;;  %v3134_v31 = vld [vmem:[#allocation2 + $0x3a8] sm:$0xff]  ;;  %v3137_v32 = vld [vmem:[#allocation2 + $0x3b8] sm:$0xff] }
 0x271   :  { %757 = vmatprep.subr.mxu0 %v3122_v33  ;;  %828 = vmatprep.subr.mxu1 %v3125_v34  ;;  %4581 = vst [vmem:[#allocation55_spill] sm:$0xff] %v3134_v31  ;;  %4582 = vst [vmem:[#allocation67_spill] sm:$0xff] %v3137_v32  ;;  %v3140_v33 = vld [vmem:[#allocation2 + $0x3a0] sm:$0xff]  ;;  %v3143_v34 = vld [vmem:[#allocation2 + $0x3b0] sm:$0xff] }
 0x272   :  { %758 = vmatpush2.msra.mxu0 %v3128_v35  ;;  %829 = vmatpush2.msra.mxu1 %v3131_v29  ;;  %4583 = vst [vmem:[#allocation57_spill] sm:$0xff] %v3140_v33  ;;  %4584 = vst [vmem:[#allocation59_spill] sm:$0xff] %v3143_v34  ;;  %v3146_v35 = vld [vmem:[#allocation2 + $0x388] sm:$0xff]  ;;  %v3149_v29 = vld [vmem:[#allocation2 + $0x398] sm:$0xff] }
 0x273   :  { %759 = vmatprep.subr.mxu0 %v3134_v31  ;;  %830 = vmatprep.subr.mxu1 %v3137_v32  ;;  %4585 = vst [vmem:[#allocation61_spill] sm:$0xff] %v3146_v35  ;;  %4586 = vst [vmem:[#allocation73_spill] sm:$0xff] %v3149_v29  ;;  %v3152_v31 = vld [vmem:[#allocation2 + $0x380] sm:$0xff]  ;;  %v3155_v32 = vld [vmem:[#allocation2 + $0x390] sm:$0xff] }
 0x274   :  { %760 = vmatpush2.msra.mxu0 %v3140_v33  ;;  %831 = vmatpush2.msra.mxu1 %v3143_v34  ;;  %4587 = vst [vmem:[#allocation63_spill] sm:$0xff] %v3152_v31  ;;  %4588 = vst [vmem:[#allocation65_spill] sm:$0xff] %v3155_v32  ;;  %v3158_v33 = vld [vmem:[#allocation2 + $0x368] sm:$0xff]  ;;  %v3162_v34 = vld [vmem:[#allocation2 + $0x360] sm:$0xff] }
 0x275   :  { %761 = vmatprep.subr.mxu0 %v3146_v35  ;;  %832 = vmatprep.subr.mxu1 %v3149_v29  ;;  %4589 = vst [vmem:[#allocation66_spill] sm:$0xff] %v3158_v33  ;;  %4590 = vst [vmem:[#allocation68_spill] sm:$0xff] %v3162_v34  ;;  %v3166_v29 = vld [vmem:[#allocation2 + $0x348] sm:$0xff] }
 0x276   :  { %762 = vmatpush2.msra.mxu0 %v3152_v31  ;;  %833 = vmatpush2.msra.mxu1 %v3155_v32  ;;  %4591 = vst [vmem:[#allocation70_spill] sm:$0xff] %v3166_v29  ;;  %v3170_v31 = vld [vmem:[#allocation2 + $0x340] sm:$0xff] }
 0x277   :  { %763 = vmatprep.subr.mxu0 %v3158_v33  ;;  %834 = vmatprep.subr.mxu1 %v4485_v46  ;;  %4592 = vst [vmem:[#allocation72_spill] sm:$0xff] %v3170_v31  ;;  %v3174_v33 = vld [vmem:[#allocation2 + $0x328] sm:$0xff]  ;;  %v3178_v46 = vld [vmem:[#allocation2 + $0x320] sm:$0xff] }
 0x278   :  { %764 = vmatpush2.msra.mxu0 %v3162_v34  ;;  %835 = vmatpush2.msra.mxu1 %v4487_v37  ;;  %4593 = vst [vmem:[#allocation74_spill] sm:$0xff] %v3174_v33  ;;  %4594 = vst [vmem:[#allocation84_spill] sm:$0xff] %v3178_v46  ;;  %v3182_v37 = vld [vmem:[#allocation2 + $0x308] sm:$0xff] }
 0x279   :  { %765 = vmatprep.subr.mxu0 %v3166_v29  ;;  %836 = vmatprep.subr.mxu1 %v4489_v54  ;;  %4595 = vst [vmem:[#allocation76_spill] sm:$0xff] %v3182_v37  ;;  %v3186_v54 = vld [vmem:[#allocation2 + $0x300] sm:$0xff] }
 0x27a   :  { %766 = vmatpush2.msra.mxu0 %v3170_v31  ;;  %837 = vmatpush2.msra.mxu1 %v4491_v56  ;;  %4596 = vst [vmem:[#allocation85_spill] sm:$0xff] %v3186_v54  ;;  %v3190_v56 = vld [vmem:[#allocation2 + $0x2e8] sm:$0xff] }
 0x27b   :  { %767 = vmatprep.subr.mxu0 %v3174_v33  ;;  %838 = vmatprep.subr.mxu1 %v4493_v58  ;;  %4597 = vst [vmem:[#allocation78_spill] sm:$0xff] %v3190_v56  ;;  %v3194_v58 = vld [vmem:[#allocation2 + $0x2e0] sm:$0xff] }
 0x27c   :  { %768 = vmatpush2.msra.mxu0 %v3178_v46  ;;  %839 = vmatpush2.msra.mxu1 %v4495_v62  ;;  %4598 = vst [vmem:[#allocation86_spill] sm:$0xff] %v3194_v58 }
 0x27d   :  { %769 = vmatprep.subr.mxu0 %v3182_v37  ;;  %840 = vmatprep.subr.mxu1 %v4497_v48  ;;  %v1763_v48 = vld [vmem:[%s3900_s0 + $0x28] sm:$0xff] }
 0x27e   :  { %770 = vmatpush2.msra.mxu0 %v3186_v54  ;;  %841 = vmatpush2.msra.mxu1 %v4499_v1 }
 0x27f   :  { %771 = vmatprep.subr.mxu0 %v3190_v56  ;;  %842 = vmatprep.subr.mxu1 %v4428_v41 }
 0x280   :  { %772 = vmatpush2.msra.mxu0 %v3194_v58  ;;  %843 = vmatpush2.msra.mxu1 %v4430_v43  ;;  %v1762_v43 = vld [vmem:[%s3900_s0 + $0x20] sm:$0xff] }
 0x281   :  { %773 = vmatprep.subr.mxu0 %v4502_v4  ;;  %844 = vmatprep.subr.mxu1 %v4503_v5 }
 0x282   :  { %774 = vmatpush2.msra.mxu0 %v4504_v6  ;;  %845 = vmatpush2.msra.mxu1 %v4434_v47 }
 0x283   :  { %775 = vmatprep.subr.mxu0 %v4505_v7  ;;  %846 = vmatprep.subr.mxu1 %v4436_v60 }
 0x284   :  { %776 = vmatpush2.msra.mxu0 %v4506_v9  ;;  %847 = vmatpush2.msra.mxu1 %v2575_v59 }
 0x285   :  { %777 = vmatprep.subr.mxu0 %v4507_v10  ;;  %848 = vmatprep.subr.mxu1 %v2581_v61 }
 0x286   :  { %778 = vmatpush2.msra.mxu0 %v4508_v11  ;;  %849 = vmatpush2.msra.mxu1 %v4440_v50 }
 0x287   :  { %779 = vmatprep.subr.mxu0 %v4509_v12  ;;  %850 = vmatprep.subr.mxu1 %v2593_v51 }
 0x288   :  { %780 = vmatpush2.msra.mxu0 %v4510_v13  ;;  %851 = vmatpush2.msra.mxu1 %v4511_v14 }
 0x289   :  { %781 = vmatprep.subr.mxu0 %v4512_v15  ;;  %852 = vmatprep.subr.mxu1 %v4513_v16 }
 0x28a   :  { %782 = vmatpush2.msra.mxu0 %v4514_v17  ;;  %853 = vmatpush2.msra.mxu1 %v4515_v18 }
 0x28b   :  { %783 = vmatprep.subr.mxu0 %v4516_v19  ;;  %854 = vmatprep.subr.mxu1 %v4517_v20 }
 0x28c   :  { %784 = vmatpush2.msra.mxu0 %v4518_v21  ;;  %855 = vmatpush2.msra.mxu1 %v4519_v22  ;;  %v4599_v22 = vld [vmem:[#allocation75_spill] sm:$0xff] }
 0x28d   :  { %785 = vmatprep.subr.mxu0 %v4520_v23  ;;  %856 = vmatprep.subr.mxu1 %v4521_v24  ;;  %v4600_v23 = vld [vmem:[#allocation77_spill] sm:$0xff] }
 0x28e   :  { %786 = vmatpush2.msra.mxu0 %v4522_v25  ;;  %857 = vmatpush2.msra.mxu1 %v4523_v26  ;;  %v4601_v24 = vld [vmem:[#allocation81_spill] sm:$0xff]  ;;  %v4602_v25 = vld [vmem:[#allocation8_spill] sm:$0xff]  ;;  %v4603_v26 = vld [vmem:[#allocation14_spill] sm:$0xff] }
 0x28f   :  { %904 = vmatprep.subr.mxu0 %v2906_v27  ;;  %975 = vmatprep.subr.mxu1 %v2909_v28 }
 0x30f   :  { %v608_v41 = vpop.f32.mrf.mxu0  ;;  %v679_v51 = vpop.f32.mrf.mxu1 }
 0x311   :  { %v610_v47 = vpop.f32.mrf.mxu0  ;;  %v681_v60 = vpop.f32.mrf.mxu1 }
 0x312   :  { %v688_v50 = vcombine.low %v608_v41, %v610_v47  ;;  %v689_v62 = vcombine.low %v679_v51, %v681_v60  ;;  %v4605_v41 = vld [vmem:[#allocation16_spill] sm:$0xff]  ;;  %v4607_v47 = vld [vmem:[#allocation18_spill] sm:$0xff]  ;;  %v4612_v60 = vld [vmem:[#allocation13_spill] sm:$0xff] }
 0x313   :  { %v4609_v51 = vld [vmem:[#allocation20_spill] sm:$0xff] }
 0x314   :  { %v692_v59 = vadd.f32 %v1762_v43, %v688_v50  ;;  %v693_v1 = vadd.f32 %v1763_v48, %v689_v62  ;;  %v4606_v43 = vld [vmem:[#allocation10_spill] sm:$0xff]  ;;  %v4608_v50 = vld [vmem:[#allocation11_spill] sm:$0xff]  ;;  %v4613_v62 = vld [vmem:[#allocation24_spill] sm:$0xff] }
 0x315   :  { %v4614_v48 = vld [vmem:[#allocation15_spill] sm:$0xff] }
 0x316   :  { %v1764_v61 = vmul.f32 -1.442695, %v692_v59  ;;  %v1765_v4 = vmul.f32 -1.442695, %v693_v1  ;;  %v707_v7 = vrot.slane %v693_v1, 4  ;;  %v4610_v59 = vld [vmem:[#allocation12_spill] sm:$0xff] }
 0x317   :  { %v4615_v1 = vld [vmem:[#allocation26_spill] sm:$0xff] }
 0x318   :  { %1852 = vpow2.f32 %v1764_v61  ;;  %v4611_v61 = vld [vmem:[#allocation22_spill] sm:$0xff] }
 0x319   :  { %1854 = vpow2.f32 %v1765_v4  ;;  %v4616_v4 = vld [vmem:[#allocation17_spill] sm:$0xff] }
 0x325   :  { %v1853_v5 = vpop.eup %1852 }
 0x326   :  { %v700_v6 = vadd.f32 1.0, %v1853_v5  ;;  %v1855_v9 = vpop.eup %1854  ;;  %v4617_v5 = vld [vmem:[#allocation28_spill] sm:$0xff] }
 0x327   :  { %v701_v13 = vadd.f32 1.0, %v1855_v9  ;;  %v4620_v9 = vld [vmem:[#allocation21_spill] sm:$0xff] }
 0x328   :  { %1856 = vrcp.f32 %v700_v6  ;;  %v4618_v6 = vld [vmem:[#allocation19_spill] sm:$0xff] }
 0x329   :  { %1858 = vtanh.f32 %v707_v7  ;;  %v4619_v7 = vld [vmem:[#allocation30_spill] sm:$0xff] }
 0x32a   :  { %1860 = vrcp.f32 %v701_v13  ;;  %v4624_v13 = vld [vmem:[#allocation25_spill] sm:$0xff] }
 0x335   :  { %v1857_v10 = vpop.eup %1856 }
 0x336   :  { %v711_v11 = vrot.slane %v1857_v10, 4  ;;  %v1859_v12 = vpop.eup %1858 }
 0x337   :  { %v714_v15 = vmul.f32 %v1859_v12, %v1857_v10  ;;  %v1861_v17 = vpop.eup %1860  ;;  %v4621_v10 = vld [vmem:[#allocation32_spill] sm:$0xff]  ;;  %v4623_v12 = vld [vmem:[#allocation34_spill] sm:$0xff] }
 0x338   :  { %v713_v14 = vmul.f32 %v711_v11, %v2919_v30  ;;  %v4604_v30 = vld [vmem:[#allocation9_spill] sm:$0xff]  ;;  %v4622_v11 = vld [vmem:[#allocation23_spill] sm:$0xff] }
 0x33a   :  { %v3235_v16 = vadd.f32 %v714_v15, %v713_v14  ;;  %v4625_v14 = vld [vmem:[#allocation36_spill] sm:$0xff]  ;;  %v4626_v15 = vld [vmem:[#allocation27_spill] sm:$0xff] }
 0x33c   :  { %1862 = vtanh.f32 %v3235_v16 }
 0x349   :  { %v1863_v18 = vpop.eup %1862 }
 0x34a   :  { %v717_v19 = vmul.f32 %v1863_v18, %v1861_v17  ;;  %v4627_v17 = vld [vmem:[#allocation38_spill] sm:$0xff]  ;;  %v4628_v18 = vld [vmem:[#allocation29_spill] sm:$0xff] }
 0x34c   :  { %v719_v20 = vmul.f32 %v717_v19, %v2776_v53  ;;  %v718_v21 = vmul.f32 %v717_v19, %v2772_v45  ;;  %v4629_v19 = vld [vmem:[#allocation40_spill] sm:$0xff] }
 0x34e   :  { %787 = vmatprep.mubr.f32.mxu0 %v719_v20  ;;  %858 = vmatprep.mubr.f32.mxu1 %v719_v20  ;;  %v4630_v20 = vld [vmem:[#allocation31_spill] sm:$0xff] }
 0x34f   :  { %788 = vmatmul.mubr.f32.vlgmr.msra.gmra.mxu0 %v718_v21  ;;  %859 = vmatmul.mubr.f32.vlgmr.msra.gmra.mxu1 %v718_v21  ;;  %v4631_v21 = vld [vmem:[#allocation42_spill] sm:$0xff] }
 0x350   :  { %905 = vmatpush1.msra.mxu0 %v2924_v36  ;;  %976 = vmatpush1.msra.mxu1 %v2927_v55 }
 0x351   :  { %906 = vmatprep.subr.mxu0 %v2930_v38  ;;  %977 = vmatprep.subr.mxu1 %v2933_v40 }
 0x352   :  { %907 = vmatpush1.msra.mxu0 %v2936_v42  ;;  %978 = vmatpush1.msra.mxu1 %v2939_v44 }
 0x353   :  { %908 = vmatprep.subr.mxu0 %v2942_v8  ;;  %979 = vmatprep.subr.mxu1 %v2945_v39 }
 0x354   :  { %909 = vmatpush1.msra.mxu0 %v2948_v52  ;;  %980 = vmatpush1.msra.mxu1 %v2951_v57 }
 0x355   :  { %910 = vmatprep.subr.mxu0 %v2954_v49  ;;  %981 = vmatprep.subr.mxu1 %v2957_v63 }
 0x356   :  { %911 = vmatpush1.msra.mxu0 %v2960_v0  ;;  %982 = vmatpush1.msra.mxu1 %v2963_v2 }
 0x357   :  { %912 = vmatprep.subr.mxu0 %v2966_v3  ;;  %983 = vmatprep.subr.mxu1 %v4599_v22 }
 0x358   :  { %913 = vmatpush1.msra.mxu0 %v4600_v23  ;;  %984 = vmatpush1.msra.mxu1 %v4601_v24 }
 0x359   :  { %914 = vmatprep.subr.mxu0 %v4602_v25  ;;  %985 = vmatprep.subr.mxu1 %v4603_v26 }
 0x35a   :  { %915 = vmatpush1.msra.mxu0 %v4604_v30  ;;  %986 = vmatpush1.msra.mxu1 %v4605_v41 }
 0x35b   :  { %916 = vmatprep.subr.mxu0 %v4606_v43  ;;  %987 = vmatprep.subr.mxu1 %v4607_v47 }
 0x35c   :  { %917 = vmatpush1.msra.mxu0 %v4608_v50  ;;  %988 = vmatpush1.msra.mxu1 %v4609_v51 }
 0x35d   :  { %918 = vmatprep.subr.mxu0 %v4610_v59  ;;  %989 = vmatprep.subr.mxu1 %v4611_v61 }
 0x35e   :  { %919 = vmatpush1.msra.mxu0 %v4612_v60  ;;  %990 = vmatpush1.msra.mxu1 %v4613_v62 }
 0x35f   :  { %920 = vmatprep.subr.mxu0 %v4614_v48  ;;  %991 = vmatprep.subr.mxu1 %v4615_v1 }
 0x360   :  { %921 = vmatpush1.msra.mxu0 %v4616_v4  ;;  %992 = vmatpush1.msra.mxu1 %v4617_v5 }
 0x361   :  { %922 = vmatprep.subr.mxu0 %v4618_v6  ;;  %993 = vmatprep.subr.mxu1 %v4619_v7 }
 0x362   :  { %923 = vmatpush1.msra.mxu0 %v4620_v9  ;;  %994 = vmatpush1.msra.mxu1 %v4621_v10  ;;  %v4632_v10 = vld [vmem:[#allocation33_spill] sm:$0xff] }
 0x363   :  { %924 = vmatprep.subr.mxu0 %v4622_v11  ;;  %995 = vmatprep.subr.mxu1 %v4623_v12  ;;  %v4633_v11 = vld [vmem:[#allocation44_spill] sm:$0xff]  ;;  %v4634_v12 = vld [vmem:[#allocation35_spill] sm:$0xff] }
 0x364   :  { %925 = vmatpush1.msra.mxu0 %v4624_v13  ;;  %996 = vmatpush1.msra.mxu1 %v4625_v14  ;;  %v4635_v13 = vld [vmem:[#allocation46_spill] sm:$0xff]  ;;  %v4636_v14 = vld [vmem:[#allocation37_spill] sm:$0xff] }
 0x365   :  { %926 = vmatprep.subr.mxu0 %v4626_v15  ;;  %997 = vmatprep.subr.mxu1 %v4627_v17  ;;  %v4637_v15 = vld [vmem:[#allocation48_spill] sm:$0xff]  ;;  %v4638_v17 = vld [vmem:[#allocation39_spill] sm:$0xff] }
 0x366   :  { %927 = vmatpush1.msra.mxu0 %v4628_v18  ;;  %998 = vmatpush1.msra.mxu1 %v4629_v19  ;;  %v4639_v18 = vld [vmem:[#allocation50_spill] sm:$0xff]  ;;  %v4640_v19 = vld [vmem:[#allocation41_spill] sm:$0xff] }
 0x367   :  { %928 = vmatprep.subr.mxu0 %v4630_v20  ;;  %999 = vmatprep.subr.mxu1 %v4631_v21  ;;  %v4641_v20 = vld [vmem:[#allocation52_spill] sm:$0xff]  ;;  %v4642_v21 = vld [vmem:[#allocation43_spill] sm:$0xff] }
 0x368   :  { %929 = vmatpush1.msra.mxu0 %v4632_v10  ;;  %1000 = vmatpush1.msra.mxu1 %v4633_v11  ;;  %v4643_v10 = vld [vmem:[#allocation54_spill] sm:$0xff]  ;;  %v4644_v11 = vld [vmem:[#allocation45_spill] sm:$0xff] }
 0x369   :  { %930 = vmatprep.subr.mxu0 %v4634_v12  ;;  %1001 = vmatprep.subr.mxu1 %v4635_v13  ;;  %v4645_v12 = vld [vmem:[#allocation56_spill] sm:$0xff]  ;;  %v4646_v13 = vld [vmem:[#allocation47_spill] sm:$0xff] }
 0x36a   :  { %931 = vmatpush1.msra.mxu0 %v4636_v14  ;;  %1002 = vmatpush1.msra.mxu1 %v4637_v15  ;;  %v4647_v14 = vld [vmem:[#allocation58_spill] sm:$0xff]  ;;  %v4648_v15 = vld [vmem:[#allocation49_spill] sm:$0xff] }
 0x36b   :  { %932 = vmatprep.subr.mxu0 %v4638_v17  ;;  %1003 = vmatprep.subr.mxu1 %v4639_v18  ;;  %v4649_v17 = vld [vmem:[#allocation60_spill] sm:$0xff]  ;;  %v4650_v18 = vld [vmem:[#allocation51_spill] sm:$0xff] }
 0x36c   :  { %933 = vmatpush1.msra.mxu0 %v4640_v19  ;;  %1004 = vmatpush1.msra.mxu1 %v4641_v20  ;;  %v4651_v19 = vld [vmem:[#allocation62_spill] sm:$0xff]  ;;  %v4652_v20 = vld [vmem:[#allocation53_spill] sm:$0xff] }
 0x36d   :  { %934 = vmatprep.subr.mxu0 %v4642_v21  ;;  %1005 = vmatprep.subr.mxu1 %v4643_v10  ;;  %v4653_v21 = vld [vmem:[#allocation64_spill] sm:$0xff]  ;;  %v4654_v10 = vld [vmem:[#allocation55_spill] sm:$0xff] }
 0x36e   :  { %935 = vmatpush1.msra.mxu0 %v4644_v11  ;;  %1006 = vmatpush1.msra.mxu1 %v4645_v12  ;;  %v4655_v11 = vld [vmem:[#allocation67_spill] sm:$0xff]  ;;  %v4656_v12 = vld [vmem:[#allocation57_spill] sm:$0xff] }
 0x36f   :  { %936 = vmatprep.subr.mxu0 %v4646_v13  ;;  %1007 = vmatprep.subr.mxu1 %v4647_v14  ;;  %v4657_v13 = vld [vmem:[#allocation59_spill] sm:$0xff] }
 0x370   :  { %937 = vmatpush2.msra.mxu0 %v4648_v15  ;;  %1008 = vmatpush2.msra.mxu1 %v4649_v17  ;;  %v4658_v15 = vld [vmem:[#allocation73_spill] sm:$0xff]  ;;  %v4659_v17 = vld [vmem:[#allocation63_spill] sm:$0xff] }
 0x371   :  { %938 = vmatprep.subr.mxu0 %v4650_v18  ;;  %1009 = vmatprep.subr.mxu1 %v4651_v19  ;;  %v4660_v19 = vld [vmem:[#allocation66_spill] sm:$0xff] }
 0x372   :  { %939 = vmatpush2.msra.mxu0 %v4652_v20  ;;  %1010 = vmatpush2.msra.mxu1 %v4653_v21  ;;  %v3319_v20 = vld [vmem:[#allocation2 + $0x378] sm:$0xff] }
 0x373   :  { %940 = vmatprep.subr.mxu0 %v4654_v10  ;;  %1011 = vmatprep.subr.mxu1 %v4655_v11  ;;  %4661 = vst [vmem:[#allocation79_spill] sm:$0xff] %v3319_v20  ;;  %v3323_v11 = vld [vmem:[#allocation2 + $0x370] sm:$0xff] }
 0x374   :  { %941 = vmatpush2.msra.mxu0 %v4656_v12  ;;  %1012 = vmatpush2.msra.mxu1 %v4657_v13  ;;  %4662 = vst [vmem:[#allocation87_spill] sm:$0xff] %v3323_v11 }
 0x375   :  { %942 = vmatprep.subr.mxu0 %v3146_v35  ;;  %1013 = vmatprep.subr.mxu1 %v4658_v15  ;;  %v3327_v35 = vld [vmem:[#allocation2 + $0x358] sm:$0xff] }
 0x376   :  { %943 = vmatpush2.msra.mxu0 %v4659_v17  ;;  %1014 = vmatpush2.msra.mxu1 %v3155_v32  ;;  %4663 = vst [vmem:[#allocation80_spill] sm:$0xff] %v3327_v35  ;;  %v3331_v32 = vld [vmem:[#allocation2 + $0x350] sm:$0xff] }
 0x377   :  { %944 = vmatprep.subr.mxu0 %v4660_v19  ;;  %1015 = vmatprep.subr.mxu1 %v3319_v20  ;;  %4664 = vst [vmem:[#allocation88_spill] sm:$0xff] %v3331_v32  ;;  %v3335_v20 = vld [vmem:[#allocation2 + $0x338] sm:$0xff] }
 0x378   :  { %945 = vmatpush2.msra.mxu0 %v3162_v34  ;;  %1016 = vmatpush2.msra.mxu1 %v3323_v11  ;;  %4665 = vst [vmem:[#allocation82_spill] sm:$0xff] %v3335_v20  ;;  %v3339_v11 = vld [vmem:[#allocation2 + $0x330] sm:$0xff] }
 0x379   :  { %946 = vmatprep.subr.mxu0 %v3166_v29  ;;  %1017 = vmatprep.subr.mxu1 %v3327_v35  ;;  %4666 = vst [vmem:[#allocation89_spill] sm:$0xff] %v3339_v11  ;;  %v3343_v35 = vld [vmem:[#allocation2 + $0x318] sm:$0xff] }
 0x37a   :  { %947 = vmatpush2.msra.mxu0 %v3170_v31  ;;  %1018 = vmatpush2.msra.mxu1 %v3331_v32  ;;  %4667 = vst [vmem:[#allocation83_spill] sm:$0xff] %v3343_v35  ;;  %v3347_v32 = vld [vmem:[#allocation2 + $0x310] sm:$0xff] }
 0x37b   :  { %948 = vmatprep.subr.mxu0 %v3174_v33  ;;  %1019 = vmatprep.subr.mxu1 %v3335_v20  ;;  %4668 = vst [vmem:[#allocation90_spill] sm:$0xff] %v3347_v32  ;;  %v3351_v20 = vld [vmem:[#allocation2 + $0x2f8] sm:$0xff] }
 0x37c   :  { %949 = vmatpush2.msra.mxu0 %v3178_v46  ;;  %1020 = vmatpush2.msra.mxu1 %v3339_v11  ;;  %4669 = vst [vmem:[#allocation75_spill] sm:$0xff] %v3351_v20  ;;  %v3355_v11 = vld [vmem:[#allocation2 + $0x2f0] sm:$0xff] }
 0x37d   :  { %950 = vmatprep.subr.mxu0 %v3182_v37  ;;  %1021 = vmatprep.subr.mxu1 %v3343_v35  ;;  %4670 = vst [vmem:[#allocation77_spill] sm:$0xff] %v3355_v11  ;;  %v3358_v37 = vld [vmem:[#allocation2 + $0x2c8] sm:$0xff] }
 0x37e   :  { %951 = vmatpush2.msra.mxu0 %v3186_v54  ;;  %1022 = vmatpush2.msra.mxu1 %v3347_v32  ;;  %4671 = vst [vmem:[#allocation81_spill] sm:$0xff] %v3358_v37  ;;  %v3361_v54 = vld [vmem:[#allocation2 + $0x2d8] sm:$0xff]  ;;  %v3364_v32 = vld [vmem:[#allocation2 + $0x2c0] sm:$0xff] }
 0x37f   :  { %952 = vmatprep.subr.mxu0 %v3190_v56  ;;  %1023 = vmatprep.subr.mxu1 %v3351_v20  ;;  %4672 = vst [vmem:[#allocation8_spill] sm:$0xff] %v3361_v54  ;;  %4673 = vst [vmem:[#allocation14_spill] sm:$0xff] %v3364_v32  ;;  %v3367_v56 = vld [vmem:[#allocation2 + $0x2d0] sm:$0xff] }
 0x380   :  { %953 = vmatpush2.msra.mxu0 %v3194_v58  ;;  %1024 = vmatpush2.msra.mxu1 %v3355_v11  ;;  %4674 = vst [vmem:[#allocation9_spill] sm:$0xff] %v3367_v56  ;;  %v3370_v58 = vld [vmem:[#allocation2 + $0x2a8] sm:$0xff]  ;;  %v3373_v11 = vld [vmem:[#allocation2 + $0x2b8] sm:$0xff] }
 0x381   :  { %954 = vmatprep.subr.mxu0 %v3358_v37  ;;  %1025 = vmatprep.subr.mxu1 %v3361_v54  ;;  %4675 = vst [vmem:[#allocation16_spill] sm:$0xff] %v3370_v58  ;;  %4676 = vst [vmem:[#allocation10_spill] sm:$0xff] %v3373_v11  ;;  %v3376_v37 = vld [vmem:[#allocation2 + $0x2a0] sm:$0xff]  ;;  %v3379_v54 = vld [vmem:[#allocation2 + $0x2b0] sm:$0xff] }
 0x382   :  { %955 = vmatpush2.msra.mxu0 %v3364_v32  ;;  %1026 = vmatpush2.msra.mxu1 %v3367_v56  ;;  %4677 = vst [vmem:[#allocation18_spill] sm:$0xff] %v3376_v37  ;;  %4678 = vst [vmem:[#allocation11_spill] sm:$0xff] %v3379_v54  ;;  %v3382_v32 = vld [vmem:[#allocation2 + $0x288] sm:$0xff]  ;;  %v3385_v56 = vld [vmem:[#allocation2 + $0x298] sm:$0xff] }
 0x383   :  { %956 = vmatprep.subr.mxu0 %v3370_v58  ;;  %1027 = vmatprep.subr.mxu1 %v3373_v11  ;;  %4679 = vst [vmem:[#allocation20_spill] sm:$0xff] %v3382_v32  ;;  %4680 = vst [vmem:[#allocation12_spill] sm:$0xff] %v3385_v56  ;;  %v3388_v58 = vld [vmem:[#allocation2 + $0x280] sm:$0xff]  ;;  %v3391_v11 = vld [vmem:[#allocation2 + $0x290] sm:$0xff] }
 0x384   :  { %957 = vmatpush2.msra.mxu0 %v3376_v37  ;;  %1028 = vmatpush2.msra.mxu1 %v3379_v54  ;;  %4681 = vst [vmem:[#allocation22_spill] sm:$0xff] %v3388_v58  ;;  %4682 = vst [vmem:[#allocation13_spill] sm:$0xff] %v3391_v11  ;;  %v3394_v37 = vld [vmem:[#allocation2 + $0x268] sm:$0xff]  ;;  %v3397_v54 = vld [vmem:[#allocation2 + $0x278] sm:$0xff] }
 0x385   :  { %958 = vmatprep.subr.mxu0 %v3382_v32  ;;  %1029 = vmatprep.subr.mxu1 %v3385_v56  ;;  %4683 = vst [vmem:[#allocation24_spill] sm:$0xff] %v3394_v37  ;;  %4684 = vst [vmem:[#allocation15_spill] sm:$0xff] %v3397_v54  ;;  %v3400_v32 = vld [vmem:[#allocation2 + $0x260] sm:$0xff]  ;;  %v3403_v56 = vld [vmem:[#allocation2 + $0x270] sm:$0xff] }
 0x386   :  { %959 = vmatpush2.msra.mxu0 %v3388_v58  ;;  %1030 = vmatpush2.msra.mxu1 %v3391_v11  ;;  %4685 = vst [vmem:[#allocation26_spill] sm:$0xff] %v3400_v32  ;;  %4686 = vst [vmem:[#allocation17_spill] sm:$0xff] %v3403_v56  ;;  %v3406_v58 = vld [vmem:[#allocation2 + $0x248] sm:$0xff]  ;;  %v3409_v11 = vld [vmem:[#allocation2 + $0x258] sm:$0xff] }
 0x387   :  { %960 = vmatprep.subr.mxu0 %v3394_v37  ;;  %1031 = vmatprep.subr.mxu1 %v3397_v54  ;;  %4687 = vst [vmem:[#allocation28_spill] sm:$0xff] %v3406_v58  ;;  %4688 = vst [vmem:[#allocation19_spill] sm:$0xff] %v3409_v11  ;;  %v3412_v37 = vld [vmem:[#allocation2 + $0x240] sm:$0xff]  ;;  %v3415_v54 = vld [vmem:[#allocation2 + $0x250] sm:$0xff] }
 0x388   :  { %961 = vmatpush2.msra.mxu0 %v3400_v32  ;;  %1032 = vmatpush2.msra.mxu1 %v3403_v56  ;;  %4689 = vst [vmem:[#allocation30_spill] sm:$0xff] %v3412_v37  ;;  %4690 = vst [vmem:[#allocation21_spill] sm:$0xff] %v3415_v54  ;;  %v3418_v32 = vld [vmem:[#allocation2 + $0x228] sm:$0xff]  ;;  %v3421_v56 = vld [vmem:[#allocation2 + $0x238] sm:$0xff] }
 0x389   :  { %962 = vmatprep.subr.mxu0 %v3406_v58  ;;  %1033 = vmatprep.subr.mxu1 %v3409_v11  ;;  %4691 = vst [vmem:[#allocation91_spill] sm:$0xff] %v3418_v32  ;;  %4692 = vst [vmem:[#allocation92_spill] sm:$0xff] %v3421_v56  ;;  %v3424_v58 = vld [vmem:[#allocation2 + $0x220] sm:$0xff]  ;;  %v3427_v11 = vld [vmem:[#allocation2 + $0x230] sm:$0xff] }
 0x38a   :  { %963 = vmatpush2.msra.mxu0 %v3412_v37  ;;  %1034 = vmatpush2.msra.mxu1 %v3415_v54  ;;  %4693 = vst [vmem:[#allocation93_spill] sm:$0xff] %v3424_v58  ;;  %4694 = vst [vmem:[#allocation94_spill] sm:$0xff] %v3427_v11  ;;  %v3430_v37 = vld [vmem:[#allocation2 + $0x208] sm:$0xff]  ;;  %v3433_v54 = vld [vmem:[#allocation2 + $0x218] sm:$0xff] }
 0x38b   :  { %964 = vmatprep.subr.mxu0 %v3418_v32  ;;  %1035 = vmatprep.subr.mxu1 %v3421_v56  ;;  %4695 = vst [vmem:[#allocation95_spill] sm:$0xff] %v3430_v37  ;;  %4696 = vst [vmem:[#allocation96_spill] sm:$0xff] %v3433_v54  ;;  %v3436_v32 = vld [vmem:[#allocation2 + $0x200] sm:$0xff]  ;;  %v3439_v56 = vld [vmem:[#allocation2 + $0x210] sm:$0xff] }
 0x38c   :  { %965 = vmatpush2.msra.mxu0 %v3424_v58  ;;  %1036 = vmatpush2.msra.mxu1 %v3427_v11  ;;  %4697 = vst [vmem:[#allocation97_spill] sm:$0xff] %v3436_v32  ;;  %4698 = vst [vmem:[#allocation98_spill] sm:$0xff] %v3439_v56 }
 0x38d   :  { %966 = vmatprep.subr.mxu0 %v3430_v37  ;;  %1037 = vmatprep.subr.mxu1 %v3433_v54  ;;  %v1766_v37 = vld [vmem:[%s3900_s0 + $0x30] sm:$0xff] }
 0x38e   :  { %967 = vmatpush2.msra.mxu0 %v3436_v32  ;;  %1038 = vmatpush2.msra.mxu1 %v3439_v56  ;;  %v1767_v56 = vld [vmem:[%s3900_s0 + $0x38] sm:$0xff] }
 0x38f   :  { %1085 = vmatprep.subr.mxu0 %v2906_v27  ;;  %1156 = vmatprep.subr.mxu1 %v2909_v28 }
 0x40f   :  { %v789_v11 = vpop.f32.mrf.mxu0  ;;  %v860_v54 = vpop.f32.mrf.mxu1 }
 0x411   :  { %v791_v58 = vpop.f32.mrf.mxu0  ;;  %v862_v32 = vpop.f32.mrf.mxu1 }
 0x412   :  { %v869_v20 = vcombine.low %v789_v11, %v791_v58  ;;  %v870_v33 = vcombine.low %v860_v54, %v862_v32 }
 0x414   :  { %v873_v35 = vadd.f32 %v1766_v37, %v869_v20  ;;  %v874_v27 = vadd.f32 %v1767_v56, %v870_v33  ;;  %v4704_v20 = vld [vmem:[#allocation27_spill] sm:$0xff] }
 0x416   :  { %v1768_v46 = vmul.f32 -1.442695, %v873_v35  ;;  %v1769_v31 = vmul.f32 -1.442695, %v874_v27  ;;  %v888_v34 = vrot.slane %v874_v27, 4 }
 0x418   :  { %1864 = vpow2.f32 %v1768_v46 }
 0x419   :  { %1866 = vpow2.f32 %v1769_v31  ;;  %v4700_v31 = vld [vmem:[#allocation23_spill] sm:$0xff] }
 0x425   :  { %v1865_v28 = vpop.eup %1864 }
 0x426   :  { %v881_v29 = vadd.f32 1.0, %v1865_v28  ;;  %v1867_v19 = vpop.eup %1866 }
 0x427   :  { %v882_v35 = vadd.f32 1.0, %v1867_v19  ;;  %v4703_v19 = vld [vmem:[#allocation36_spill] sm:$0xff] }
 0x428   :  { %1868 = vrcp.f32 %v881_v29 }
 0x429   :  { %1870 = vtanh.f32 %v888_v34  ;;  %v4701_v34 = vld [vmem:[#allocation34_spill] sm:$0xff] }
 0x42a   :  { %1872 = vrcp.f32 %v882_v35  ;;  %v4708_v35 = vld [vmem:[#allocation31_spill] sm:$0xff] }
 0x435   :  { %v1869_v58 = vpop.eup %1868 }
 0x436   :  { %v892_v11 = vrot.slane %v1869_v58, 4  ;;  %v1871_v37 = vpop.eup %1870 }
 0x437   :  { %v895_v32 = vmul.f32 %v1871_v37, %v1869_v58  ;;  %v1873_v33 = vpop.eup %1872  ;;  %v4705_v58 = vld [vmem:[#allocation38_spill] sm:$0xff]  ;;  %v4707_v37 = vld [vmem:[#allocation40_spill] sm:$0xff] }
 0x438   :  { %v894_v46 = vmul.f32 %v892_v11, %v3235_v16  ;;  %v4702_v16 = vld [vmem:[#allocation25_spill] sm:$0xff] }
 0x439   :  { %v4706_v11 = vld [vmem:[#allocation29_spill] sm:$0xff] }
 0x43a   :  { %v3451_v54 = vadd.f32 %v895_v32, %v894_v46  ;;  %v4709_v46 = vld [vmem:[#allocation42_spill] sm:$0xff]  ;;  %v4710_v32 = vld [vmem:[#allocation33_spill] sm:$0xff] }
 0x43c   :  { %1874 = vtanh.f32 %v3451_v54 }
 0x449   :  { %v1875_v56 = vpop.eup %1874 }
 0x44a   :  { %v898_v28 = vmul.f32 %v1875_v56, %v1873_v33  ;;  %v4711_v33 = vld [vmem:[#allocation44_spill] sm:$0xff]  ;;  %v4712_v56 = vld [vmem:[#allocation35_spill] sm:$0xff] }
 0x44c   :  { %v900_v27 = vmul.f32 %v898_v28, %v2776_v53  ;;  %v899_v29 = vmul.f32 %v898_v28, %v2772_v45  ;;  %v4699_v45 = vld [vmem:[#allocation32_spill] sm:$0xff]  ;;  %v4713_v28 = vld [vmem:[#allocation46_spill] sm:$0xff] }
 0x44e   :  { %968 = vmatprep.mubr.f32.mxu0 %v900_v27  ;;  %1039 = vmatprep.mubr.f32.mxu1 %v900_v27  ;;  %v4714_v27 = vld [vmem:[#allocation37_spill] sm:$0xff] }
 0x44f   :  { %969 = vmatmul.mubr.f32.vlgmr.msra.gmra.mxu0 %v899_v29  ;;  %1040 = vmatmul.mubr.f32.vlgmr.msra.gmra.mxu1 %v899_v29  ;;  %v4715_v29 = vld [vmem:[#allocation48_spill] sm:$0xff] }
 0x450   :  { %1086 = vmatpush1.msra.mxu0 %v2924_v36  ;;  %1157 = vmatpush1.msra.mxu1 %v2927_v55 }
 0x451   :  { %1087 = vmatprep.subr.mxu0 %v2930_v38  ;;  %1158 = vmatprep.subr.mxu1 %v2933_v40 }
 0x452   :  { %1088 = vmatpush1.msra.mxu0 %v2936_v42  ;;  %1159 = vmatpush1.msra.mxu1 %v2939_v44 }
 0x453   :  { %1089 = vmatprep.subr.mxu0 %v2942_v8  ;;  %1160 = vmatprep.subr.mxu1 %v2945_v39 }
 0x454   :  { %1090 = vmatpush1.msra.mxu0 %v2948_v52  ;;  %1161 = vmatpush1.msra.mxu1 %v2951_v57 }
 0x455   :  { %1091 = vmatprep.subr.mxu0 %v2954_v49  ;;  %1162 = vmatprep.subr.mxu1 %v2957_v63 }
 0x456   :  { %1092 = vmatpush1.msra.mxu0 %v2960_v0  ;;  %1163 = vmatpush1.msra.mxu1 %v2963_v2 }
 0x457   :  { %1093 = vmatprep.subr.mxu0 %v2966_v3  ;;  %1164 = vmatprep.subr.mxu1 %v4599_v22 }
 0x458   :  { %1094 = vmatpush1.msra.mxu0 %v4600_v23  ;;  %1165 = vmatpush1.msra.mxu1 %v4601_v24 }
 0x459   :  { %1095 = vmatprep.subr.mxu0 %v4602_v25  ;;  %1166 = vmatprep.subr.mxu1 %v4603_v26 }
 0x45a   :  { %1096 = vmatpush1.msra.mxu0 %v4604_v30  ;;  %1167 = vmatpush1.msra.mxu1 %v4605_v41 }
 0x45b   :  { %1097 = vmatprep.subr.mxu0 %v4606_v43  ;;  %1168 = vmatprep.subr.mxu1 %v4607_v47 }
 0x45c   :  { %1098 = vmatpush1.msra.mxu0 %v4608_v50  ;;  %1169 = vmatpush1.msra.mxu1 %v4609_v51 }
 0x45d   :  { %1099 = vmatprep.subr.mxu0 %v4610_v59  ;;  %1170 = vmatprep.subr.mxu1 %v4611_v61 }
 0x45e   :  { %1100 = vmatpush1.msra.mxu0 %v4612_v60  ;;  %1171 = vmatpush1.msra.mxu1 %v4613_v62 }
 0x45f   :  { %1101 = vmatprep.subr.mxu0 %v4614_v48  ;;  %1172 = vmatprep.subr.mxu1 %v4615_v1 }
 0x460   :  { %1102 = vmatpush1.msra.mxu0 %v4616_v4  ;;  %1173 = vmatpush1.msra.mxu1 %v4617_v5 }
 0x461   :  { %1103 = vmatprep.subr.mxu0 %v4618_v6  ;;  %1174 = vmatprep.subr.mxu1 %v4619_v7 }
 0x462   :  { %1104 = vmatpush1.msra.mxu0 %v4620_v9  ;;  %1175 = vmatpush1.msra.mxu1 %v4699_v45 }
 0x463   :  { %1105 = vmatprep.subr.mxu0 %v4700_v31  ;;  %1176 = vmatprep.subr.mxu1 %v4701_v34 }
 0x464   :  { %1106 = vmatpush1.msra.mxu0 %v4702_v16  ;;  %1177 = vmatpush1.msra.mxu1 %v4703_v19 }
 0x465   :  { %1107 = vmatprep.subr.mxu0 %v4704_v20  ;;  %1178 = vmatprep.subr.mxu1 %v4705_v58  ;;  %v4716_v58 = vld [vmem:[#allocation39_spill] sm:$0xff] }
 0x466   :  { %1108 = vmatpush1.msra.mxu0 %v4706_v11  ;;  %1179 = vmatpush1.msra.mxu1 %v4707_v37  ;;  %v4717_v11 = vld [vmem:[#allocation50_spill] sm:$0xff]  ;;  %v4718_v37 = vld [vmem:[#allocation41_spill] sm:$0xff] }
 0x467   :  { %1109 = vmatprep.subr.mxu0 %v4708_v35  ;;  %1180 = vmatprep.subr.mxu1 %v4709_v46  ;;  %v4719_v35 = vld [vmem:[#allocation52_spill] sm:$0xff]  ;;  %v4720_v46 = vld [vmem:[#allocation43_spill] sm:$0xff] }
 0x468   :  { %1110 = vmatpush1.msra.mxu0 %v4710_v32  ;;  %1181 = vmatpush1.msra.mxu1 %v4711_v33  ;;  %v4721_v32 = vld [vmem:[#allocation54_spill] sm:$0xff]  ;;  %v4722_v33 = vld [vmem:[#allocation45_spill] sm:$0xff] }
 0x469   :  { %1111 = vmatprep.subr.mxu0 %v4712_v56  ;;  %1182 = vmatprep.subr.mxu1 %v4713_v28  ;;  %v4723_v56 = vld [vmem:[#allocation56_spill] sm:$0xff]  ;;  %v4724_v28 = vld [vmem:[#allocation47_spill] sm:$0xff] }
 0x46a   :  { %1112 = vmatpush1.msra.mxu0 %v4714_v27  ;;  %1183 = vmatpush1.msra.mxu1 %v4715_v29  ;;  %v4725_v29 = vld [vmem:[#allocation49_spill] sm:$0xff] }
 0x46b   :  { %1113 = vmatprep.subr.mxu0 %v4716_v58  ;;  %1184 = vmatprep.subr.mxu1 %v4717_v11  ;;  %v4726_v58 = vld [vmem:[#allocation60_spill] sm:$0xff] }
 0x46c   :  { %1114 = vmatpush1.msra.mxu0 %v4718_v37  ;;  %1185 = vmatpush1.msra.mxu1 %v4719_v35  ;;  %v4727_v37 = vld [vmem:[#allocation62_spill] sm:$0xff]  ;;  %v4728_v35 = vld [vmem:[#allocation53_spill] sm:$0xff] }
 0x46d   :  { %1115 = vmatprep.subr.mxu0 %v4720_v46  ;;  %1186 = vmatprep.subr.mxu1 %v4721_v32 }
 0x46e   :  { %1116 = vmatpush1.msra.mxu0 %v4722_v33  ;;  %1187 = vmatpush1.msra.mxu1 %v4723_v56  ;;  %v4729_v33 = vld [vmem:[#allocation67_spill] sm:$0xff] }
 0x46f   :  { %1117 = vmatprep.subr.mxu0 %v4724_v28  ;;  %1188 = vmatprep.subr.mxu1 %v4647_v14  ;;  %v4730_v14 = vld [vmem:[#allocation61_spill] sm:$0xff] }
 0x470   :  { %1118 = vmatpush2.msra.mxu0 %v4725_v29  ;;  %1189 = vmatpush2.msra.mxu1 %v4726_v58 }
 0x471   :  { %1119 = vmatprep.subr.mxu0 %v4650_v18  ;;  %1190 = vmatprep.subr.mxu1 %v4727_v37  ;;  %v4731_v18 = vld [vmem:[#allocation65_spill] sm:$0xff]  ;;  %v4732_v37 = vld [vmem:[#allocation66_spill] sm:$0xff] }
 0x472   :  { %1120 = vmatpush2.msra.mxu0 %v4728_v35  ;;  %1191 = vmatpush2.msra.mxu1 %v4653_v21  ;;  %v4733_v35 = vld [vmem:[#allocation79_spill] sm:$0xff]  ;;  %v4734_v21 = vld [vmem:[#allocation68_spill] sm:$0xff] }
 0x473   :  { %1121 = vmatprep.subr.mxu0 %v4654_v10  ;;  %1192 = vmatprep.subr.mxu1 %v4729_v33  ;;  %v4735_v10 = vld [vmem:[#allocation87_spill] sm:$0xff]  ;;  %v4736_v33 = vld [vmem:[#allocation70_spill] sm:$0xff] }
 0x474   :  { %1122 = vmatpush2.msra.mxu0 %v4656_v12  ;;  %1193 = vmatpush2.msra.mxu1 %v4657_v13  ;;  %v4737_v12 = vld [vmem:[#allocation80_spill] sm:$0xff] }
 0x475   :  { %1123 = vmatprep.subr.mxu0 %v4730_v14  ;;  %1194 = vmatprep.subr.mxu1 %v4658_v15  ;;  %v4738_v13 = vld [vmem:[#allocation72_spill] sm:$0xff]  ;;  %v4740_v15 = vld [vmem:[#allocation74_spill] sm:$0xff] }
 0x476   :  { %1124 = vmatpush2.msra.mxu0 %v4659_v17  ;;  %1195 = vmatpush2.msra.mxu1 %v4731_v18  ;;  %v4739_v14 = vld [vmem:[#allocation88_spill] sm:$0xff]  ;;  %v4741_v17 = vld [vmem:[#allocation82_spill] sm:$0xff] }
 0x477   :  { %1125 = vmatprep.subr.mxu0 %v4732_v37  ;;  %1196 = vmatprep.subr.mxu1 %v4733_v35  ;;  %v4742_v18 = vld [vmem:[#allocation84_spill] sm:$0xff]  ;;  %v4743_v37 = vld [vmem:[#allocation89_spill] sm:$0xff] }
 0x478   :  { %1126 = vmatpush2.msra.mxu0 %v4734_v21  ;;  %1197 = vmatpush2.msra.mxu1 %v4735_v10  ;;  %v4744_v35 = vld [vmem:[#allocation76_spill] sm:$0xff]  ;;  %v4745_v21 = vld [vmem:[#allocation83_spill] sm:$0xff]  ;;  %v4746_v10 = vld [vmem:[#allocation85_spill] sm:$0xff] }
 0x479   :  { %1127 = vmatprep.subr.mxu0 %v4736_v33  ;;  %1198 = vmatprep.subr.mxu1 %v4737_v12  ;;  %v4747_v33 = vld [vmem:[#allocation90_spill] sm:$0xff] }
 0x47a   :  { %1128 = vmatpush2.msra.mxu0 %v4738_v13  ;;  %1199 = vmatpush2.msra.mxu1 %v4739_v14  ;;  %v4748_v12 = vld [vmem:[#allocation78_spill] sm:$0xff]  ;;  %v4749_v13 = vld [vmem:[#allocation75_spill] sm:$0xff] }
 0x47b   :  { %1129 = vmatprep.subr.mxu0 %v4740_v15  ;;  %1200 = vmatprep.subr.mxu1 %v4741_v17  ;;  %v4750_v14 = vld [vmem:[#allocation86_spill] sm:$0xff]  ;;  %v4751_v15 = vld [vmem:[#allocation77_spill] sm:$0xff] }
 0x47c   :  { %1130 = vmatpush2.msra.mxu0 %v4742_v18  ;;  %1201 = vmatpush2.msra.mxu1 %v4743_v37  ;;  %v4752_v17 = vld [vmem:[#allocation81_spill] sm:$0xff]  ;;  %v4753_v18 = vld [vmem:[#allocation8_spill] sm:$0xff]  ;;  %v4754_v37 = vld [vmem:[#allocation14_spill] sm:$0xff] }
 0x47d   :  { %1131 = vmatprep.subr.mxu0 %v4744_v35  ;;  %1202 = vmatprep.subr.mxu1 %v4745_v21  ;;  %v4755_v35 = vld [vmem:[#allocation9_spill] sm:$0xff]  ;;  %v4756_v21 = vld [vmem:[#allocation16_spill] sm:$0xff] }
 0x47e   :  { %1132 = vmatpush2.msra.mxu0 %v4746_v10  ;;  %1203 = vmatpush2.msra.mxu1 %v4747_v33  ;;  %v4757_v10 = vld [vmem:[#allocation10_spill] sm:$0xff] }
 0x47f   :  { %1133 = vmatprep.subr.mxu0 %v4748_v12  ;;  %1204 = vmatprep.subr.mxu1 %v4749_v13  ;;  %v4758_v33 = vld [vmem:[#allocation18_spill] sm:$0xff]  ;;  %v4759_v12 = vld [vmem:[#allocation11_spill] sm:$0xff]  ;;  %v4760_v13 = vld [vmem:[#allocation20_spill] sm:$0xff] }
 0x480   :  { %1134 = vmatpush2.msra.mxu0 %v4750_v14  ;;  %1205 = vmatpush2.msra.mxu1 %v4751_v15  ;;  %v4761_v14 = vld [vmem:[#allocation12_spill] sm:$0xff]  ;;  %v4762_v15 = vld [vmem:[#allocation22_spill] sm:$0xff] }
 0x481   :  { %1135 = vmatprep.subr.mxu0 %v4752_v17  ;;  %1206 = vmatprep.subr.mxu1 %v4753_v18  ;;  %v4763_v17 = vld [vmem:[#allocation13_spill] sm:$0xff]  ;;  %v4764_v18 = vld [vmem:[#allocation24_spill] sm:$0xff] }
 0x482   :  { %1136 = vmatpush2.msra.mxu0 %v4754_v37  ;;  %1207 = vmatpush2.msra.mxu1 %v4755_v35  ;;  %v4765_v37 = vld [vmem:[#allocation15_spill] sm:$0xff]  ;;  %v4766_v35 = vld [vmem:[#allocation26_spill] sm:$0xff] }
 0x483   :  { %1137 = vmatprep.subr.mxu0 %v4756_v21  ;;  %1208 = vmatprep.subr.mxu1 %v4757_v10  ;;  %v4767_v21 = vld [vmem:[#allocation17_spill] sm:$0xff]  ;;  %v4768_v10 = vld [vmem:[#allocation28_spill] sm:$0xff] }
 0x484   :  { %1138 = vmatpush2.msra.mxu0 %v4758_v33  ;;  %1209 = vmatpush2.msra.mxu1 %v4759_v12  ;;  %v4769_v33 = vld [vmem:[#allocation19_spill] sm:$0xff]  ;;  %v4770_v12 = vld [vmem:[#allocation30_spill] sm:$0xff] }
 0x485   :  { %1139 = vmatprep.subr.mxu0 %v4760_v13  ;;  %1210 = vmatprep.subr.mxu1 %v4761_v14  ;;  %v4771_v13 = vld [vmem:[#allocation21_spill] sm:$0xff]  ;;  %v4772_v14 = vld [vmem:[#allocation91_spill] sm:$0xff] }
 0x486   :  { %1140 = vmatpush2.msra.mxu0 %v4762_v15  ;;  %1211 = vmatpush2.msra.mxu1 %v4763_v17  ;;  %v4773_v15 = vld [vmem:[#allocation92_spill] sm:$0xff]  ;;  %v4774_v17 = vld [vmem:[#allocation93_spill] sm:$0xff] }
 0x487   :  { %1141 = vmatprep.subr.mxu0 %v4764_v18  ;;  %1212 = vmatprep.subr.mxu1 %v4765_v37  ;;  %v4775_v18 = vld [vmem:[#allocation94_spill] sm:$0xff]  ;;  %v4776_v37 = vld [vmem:[#allocation95_spill] sm:$0xff] }
 0x488   :  { %1142 = vmatpush2.msra.mxu0 %v4766_v35  ;;  %1213 = vmatpush2.msra.mxu1 %v4767_v21  ;;  %v4777_v35 = vld [vmem:[#allocation96_spill] sm:$0xff]  ;;  %v4778_v21 = vld [vmem:[#allocation97_spill] sm:$0xff] }
 0x489   :  { %1143 = vmatprep.subr.mxu0 %v4768_v10  ;;  %1214 = vmatprep.subr.mxu1 %v4769_v33  ;;  %v4779_v10 = vld [vmem:[#allocation98_spill] sm:$0xff]  ;;  %v4780_v33 = vld [vmem:[#allocation69_spill] sm:$0xff] }
 0x48a   :  { %1144 = vmatpush2.msra.mxu0 %v4770_v12  ;;  %1215 = vmatpush2.msra.mxu1 %v4771_v13  ;;  %v4781_v12 = vld [vmem:[#allocation71_spill] sm:$0xff] }
 0x48b   :  { %1145 = vmatprep.subr.mxu0 %v4772_v14  ;;  %1216 = vmatprep.subr.mxu1 %v4773_v15  ;;  %v1770_v15 = vld [vmem:[%s3900_s0 + $0x40] sm:$0xff] }
 0x48c   :  { %1146 = vmatpush2.msra.mxu0 %v4774_v17  ;;  %1217 = vmatpush2.msra.mxu1 %v4775_v18 }
 0x48d   :  { %1147 = vmatprep.subr.mxu0 %v4776_v37  ;;  %1218 = vmatprep.subr.mxu1 %v4777_v35 }
 0x48e   :  { %1148 = vmatpush2.msra.mxu0 %v4778_v21  ;;  %1219 = vmatpush2.msra.mxu1 %v4779_v10  ;;  %v1771_v10 = vld [vmem:[%s3900_s0 + $0x48] sm:$0xff] }
 0x48f   :  { %1266 = vmatprep.subr.mxu0 %v4780_v33  ;;  %1337 = vmatprep.subr.mxu1 %v4781_v12 }
 0x50f   :  { %v970_v13 = vpop.f32.mrf.mxu0  ;;  %v1041_v18 = vpop.f32.mrf.mxu1 }
 0x511   :  { %v972_v17 = vpop.f32.mrf.mxu0  ;;  %v1043_v35 = vpop.f32.mrf.mxu1 }
 0x512   :  { %v1050_v14 = vcombine.low %v970_v13, %v972_v17  ;;  %v1051_v29 = vcombine.low %v1041_v18, %v1043_v35 }
 0x514   :  { %v1054_v58 = vadd.f32 %v1770_v15, %v1050_v14  ;;  %v1055_v33 = vadd.f32 %v1771_v10, %v1051_v29 }
 0x516   :  { %v1772_v37 = vmul.f32 -1.442695, %v1054_v58  ;;  %v1773_v21 = vmul.f32 -1.442695, %v1055_v33  ;;  %v1069_v56 = vrot.slane %v1055_v33, 4  ;;  %v4830_v33 = vld [vmem:[#allocation78_spill] sm:$0xff] }
 0x518   :  { %1876 = vpow2.f32 %v1772_v37 }
 0x519   :  { %1878 = vpow2.f32 %v1773_v21 }
 0x525   :  { %v1877_v12 = vpop.eup %1876 }
 0x526   :  { %v1062_v28 = vadd.f32 1.0, %v1877_v12  ;;  %v1879_v32 = vpop.eup %1878  ;;  %v4831_v12 = vld [vmem:[#allocation75_spill] sm:$0xff] }
 0x527   :  { %v1063_v15 = vadd.f32 1.0, %v1879_v32 }
 0x528   :  { %1880 = vrcp.f32 %v1062_v28  ;;  %v4828_v28 = vld [vmem:[#allocation85_spill] sm:$0xff] }
 0x529   :  { %1882 = vtanh.f32 %v1069_v56  ;;  %v3598_v56 = vld [vmem:[%s3904_s4] sm:$0xff] }
 0x52a   :  { %1884 = vrcp.f32 %v1063_v15  ;;  %v4835_v15 = vld [vmem:[#allocation8_spill] sm:$0xff] }
 0x535   :  { %v1881_v13 = vpop.eup %1880 }
 0x536   :  { %v1073_v17 = vrot.slane %v1881_v13, 4  ;;  %v1883_v14 = vpop.eup %1882 }
 0x537   :  { %v1076_v18 = vmul.f32 %v1883_v14, %v1881_v13  ;;  %v1885_v10 = vpop.eup %1884  ;;  %v4832_v13 = vld [vmem:[#allocation86_spill] sm:$0xff]  ;;  %v4834_v14 = vld [vmem:[#allocation81_spill] sm:$0xff] }
 0x538   :  { %v1075_v58 = vmul.f32 %v1073_v17, %v3451_v54  ;;  %v4819_v54 = vld [vmem:[#allocation80_spill] sm:$0xff]  ;;  %v4833_v17 = vld [vmem:[#allocation77_spill] sm:$0xff] }
 0x53a   :  { %v3591_v37 = vadd.f32 %v1076_v18, %v1075_v58  ;;  %v4836_v58 = vld [vmem:[#allocation14_spill] sm:$0xff]  ;;  %v4837_v18 = vld [vmem:[#allocation9_spill] sm:$0xff] }
 0x53c   :  { %1886 = vtanh.f32 %v3591_v37 }
 0x549   :  { %v1887_v35 = vpop.eup %1886 }
 0x54a   :  { %v1079_v29 = vmul.f32 %v1887_v35, %v1885_v10  ;;  %v4838_v10 = vld [vmem:[#allocation16_spill] sm:$0xff]  ;;  %v4839_v35 = vld [vmem:[#allocation10_spill] sm:$0xff] }
 0x54c   :  { %v1081_v21 = vmul.f32 %v1079_v29, %v2776_v53  ;;  %v1080_v32 = vmul.f32 %v3598_v56, %v1079_v29  ;;  %v4840_v29 = vld [vmem:[#allocation18_spill] sm:$0xff] }
 0x54e   :  { %1149 = vmatprep.mubr.f32.mxu0 %v1081_v21  ;;  %1220 = vmatprep.mubr.f32.mxu1 %v1081_v21  ;;  %v4841_v21 = vld [vmem:[#allocation11_spill] sm:$0xff] }
 0x54f   :  { %1150 = vmatmul.mubr.f32.vlgmr.msra.gmra.mxu0 %v1080_v32  ;;  %1221 = vmatmul.mubr.f32.vlgmr.msra.gmra.mxu1 %v1080_v32  ;;  %v4842_v32 = vld [vmem:[#allocation20_spill] sm:$0xff] }
 0x550   :  { %1267 = vmatpush1.msra.mxu0 %v2924_v36  ;;  %1338 = vmatpush1.msra.mxu1 %v2927_v55  ;;  %v4782_v36 = vld [vmem:[#allocation38_spill] sm:$0xff]  ;;  %v4783_v55 = vld [vmem:[#allocation29_spill] sm:$0xff] }
 0x551   :  { %1268 = vmatprep.subr.mxu0 %v2930_v38  ;;  %1339 = vmatprep.subr.mxu1 %v2933_v40  ;;  %v4784_v38 = vld [vmem:[#allocation40_spill] sm:$0xff]  ;;  %v4785_v40 = vld [vmem:[#allocation31_spill] sm:$0xff] }
 0x552   :  { %1269 = vmatpush1.msra.mxu0 %v2936_v42  ;;  %1340 = vmatpush1.msra.mxu1 %v2939_v44  ;;  %v4786_v42 = vld [vmem:[#allocation42_spill] sm:$0xff]  ;;  %v4787_v44 = vld [vmem:[#allocation33_spill] sm:$0xff] }
 0x553   :  { %1270 = vmatprep.subr.mxu0 %v2942_v8  ;;  %1341 = vmatprep.subr.mxu1 %v2945_v39  ;;  %v4788_v8 = vld [vmem:[#allocation44_spill] sm:$0xff]  ;;  %v4789_v39 = vld [vmem:[#allocation35_spill] sm:$0xff] }
 0x554   :  { %1271 = vmatpush1.msra.mxu0 %v2948_v52  ;;  %1342 = vmatpush1.msra.mxu1 %v2951_v57  ;;  %v4790_v52 = vld [vmem:[#allocation46_spill] sm:$0xff]  ;;  %v4791_v57 = vld [vmem:[#allocation48_spill] sm:$0xff] }
 0x555   :  { %1272 = vmatprep.subr.mxu0 %v2954_v49  ;;  %1343 = vmatprep.subr.mxu1 %v2957_v63  ;;  %v4792_v49 = vld [vmem:[#allocation39_spill] sm:$0xff]  ;;  %v4793_v63 = vld [vmem:[#allocation41_spill] sm:$0xff] }
 0x556   :  { %1273 = vmatpush1.msra.mxu0 %v2960_v0  ;;  %1344 = vmatpush1.msra.mxu1 %v2963_v2  ;;  %v4794_v0 = vld [vmem:[#allocation52_spill] sm:$0xff]  ;;  %v4795_v2 = vld [vmem:[#allocation54_spill] sm:$0xff] }
 0x557   :  { %1274 = vmatprep.subr.mxu0 %v2966_v3  ;;  %1345 = vmatprep.subr.mxu1 %v4599_v22  ;;  %v4796_v3 = vld [vmem:[#allocation45_spill] sm:$0xff]  ;;  %v4797_v22 = vld [vmem:[#allocation56_spill] sm:$0xff] }
 0x558   :  { %1275 = vmatpush1.msra.mxu0 %v4600_v23  ;;  %1346 = vmatpush1.msra.mxu1 %v4601_v24  ;;  %v4798_v23 = vld [vmem:[#allocation47_spill] sm:$0xff]  ;;  %v4799_v24 = vld [vmem:[#allocation58_spill] sm:$0xff] }
 0x559   :  { %1276 = vmatprep.subr.mxu0 %v4602_v25  ;;  %1347 = vmatprep.subr.mxu1 %v4603_v26  ;;  %v4800_v25 = vld [vmem:[#allocation49_spill] sm:$0xff]  ;;  %v4801_v26 = vld [vmem:[#allocation60_spill] sm:$0xff] }
 0x55a   :  { %1277 = vmatpush1.msra.mxu0 %v4604_v30  ;;  %1348 = vmatpush1.msra.mxu1 %v4605_v41  ;;  %v4802_v30 = vld [vmem:[#allocation51_spill] sm:$0xff]  ;;  %v4803_v41 = vld [vmem:[#allocation62_spill] sm:$0xff] }
 0x55b   :  { %1278 = vmatprep.subr.mxu0 %v4606_v43  ;;  %1349 = vmatprep.subr.mxu1 %v4607_v47  ;;  %v4804_v43 = vld [vmem:[#allocation53_spill] sm:$0xff]  ;;  %v4805_v47 = vld [vmem:[#allocation64_spill] sm:$0xff] }
 0x55c   :  { %1279 = vmatpush1.msra.mxu0 %v4608_v50  ;;  %1350 = vmatpush1.msra.mxu1 %v4609_v51  ;;  %v4806_v50 = vld [vmem:[#allocation55_spill] sm:$0xff] }
 0x55d   :  { %1280 = vmatprep.subr.mxu0 %v4610_v59  ;;  %1351 = vmatprep.subr.mxu1 %v4611_v61  ;;  %v4807_v51 = vld [vmem:[#allocation67_spill] sm:$0xff]  ;;  %v4808_v59 = vld [vmem:[#allocation57_spill] sm:$0xff] }
 0x55e   :  { %1281 = vmatpush1.msra.mxu0 %v4612_v60  ;;  %1352 = vmatpush1.msra.mxu1 %v4613_v62  ;;  %v4809_v61 = vld [vmem:[#allocation59_spill] sm:$0xff]  ;;  %v4810_v60 = vld [vmem:[#allocation61_spill] sm:$0xff] }
 0x55f   :  { %1282 = vmatprep.subr.mxu0 %v4614_v48  ;;  %1353 = vmatprep.subr.mxu1 %v4615_v1  ;;  %v4811_v62 = vld [vmem:[#allocation73_spill] sm:$0xff]  ;;  %v4812_v48 = vld [vmem:[#allocation63_spill] sm:$0xff] }
 0x560   :  { %1283 = vmatpush1.msra.mxu0 %v4616_v4  ;;  %1354 = vmatpush1.msra.mxu1 %v4617_v5  ;;  %v4813_v1 = vld [vmem:[#allocation65_spill] sm:$0xff]  ;;  %v4814_v4 = vld [vmem:[#allocation66_spill] sm:$0xff]  ;;  %v4815_v5 = vld [vmem:[#allocation79_spill] sm:$0xff] }
 0x561   :  { %1284 = vmatprep.subr.mxu0 %v4618_v6  ;;  %1355 = vmatprep.subr.mxu1 %v4619_v7  ;;  %v4816_v6 = vld [vmem:[#allocation68_spill] sm:$0xff]  ;;  %v4817_v7 = vld [vmem:[#allocation87_spill] sm:$0xff] }
 0x562   :  { %1285 = vmatpush1.msra.mxu0 %v4620_v9  ;;  %1356 = vmatpush1.msra.mxu1 %v4699_v45  ;;  %v4818_v9 = vld [vmem:[#allocation70_spill] sm:$0xff]  ;;  %v4820_v45 = vld [vmem:[#allocation72_spill] sm:$0xff] }
 0x563   :  { %1286 = vmatprep.subr.mxu0 %v4700_v31  ;;  %1357 = vmatprep.subr.mxu1 %v4701_v34  ;;  %v4821_v31 = vld [vmem:[#allocation88_spill] sm:$0xff]  ;;  %v4822_v34 = vld [vmem:[#allocation74_spill] sm:$0xff] }
 0x564   :  { %1287 = vmatpush1.msra.mxu0 %v4702_v16  ;;  %1358 = vmatpush1.msra.mxu1 %v4703_v19  ;;  %v4823_v16 = vld [vmem:[#allocation82_spill] sm:$0xff]  ;;  %v4824_v19 = vld [vmem:[#allocation84_spill] sm:$0xff] }
 0x565   :  { %1288 = vmatprep.subr.mxu0 %v4704_v20  ;;  %1359 = vmatprep.subr.mxu1 %v4782_v36  ;;  %v4825_v20 = vld [vmem:[#allocation89_spill] sm:$0xff]  ;;  %v4843_v36 = vld [vmem:[#allocation12_spill] sm:$0xff] }
 0x566   :  { %1289 = vmatpush1.msra.mxu0 %v4783_v55  ;;  %1360 = vmatpush1.msra.mxu1 %v4784_v38  ;;  %v4844_v55 = vld [vmem:[#allocation22_spill] sm:$0xff]  ;;  %v4845_v38 = vld [vmem:[#allocation13_spill] sm:$0xff] }
 0x567   :  { %1290 = vmatprep.subr.mxu0 %v4785_v40  ;;  %1361 = vmatprep.subr.mxu1 %v4786_v42  ;;  %v4846_v40 = vld [vmem:[#allocation24_spill] sm:$0xff]  ;;  %v4847_v42 = vld [vmem:[#allocation15_spill] sm:$0xff] }
 0x568   :  { %1291 = vmatpush1.msra.mxu0 %v4787_v44  ;;  %1362 = vmatpush1.msra.mxu1 %v4788_v8  ;;  %v4848_v44 = vld [vmem:[#allocation26_spill] sm:$0xff]  ;;  %v4849_v8 = vld [vmem:[#allocation17_spill] sm:$0xff] }
 0x569   :  { %1292 = vmatprep.subr.mxu0 %v4789_v39  ;;  %1363 = vmatprep.subr.mxu1 %v4790_v52  ;;  %v4850_v39 = vld [vmem:[#allocation28_spill] sm:$0xff]  ;;  %v4851_v52 = vld [vmem:[#allocation19_spill] sm:$0xff] }
 0x56a   :  { %1293 = vmatpush1.msra.mxu0 %v4714_v27  ;;  %1364 = vmatpush1.msra.mxu1 %v4791_v57  ;;  %v4829_v27 = vld [vmem:[#allocation90_spill] sm:$0xff] }
 0x56b   :  { %1294 = vmatprep.subr.mxu0 %v4792_v49  ;;  %1365 = vmatprep.subr.mxu1 %v4717_v11  ;;  %v4826_v11 = vld [vmem:[#allocation76_spill] sm:$0xff]  ;;  %v4852_v57 = vld [vmem:[#allocation30_spill] sm:$0xff]  ;;  %v4853_v49 = vld [vmem:[#allocation21_spill] sm:$0xff] }
 0x56c   :  { %1295 = vmatpush1.msra.mxu0 %v4793_v63  ;;  %1366 = vmatpush1.msra.mxu1 %v4794_v0  ;;  %v4854_v63 = vld [vmem:[#allocation91_spill] sm:$0xff]  ;;  %v4855_v0 = vld [vmem:[#allocation92_spill] sm:$0xff] }
 0x56d   :  { %1296 = vmatprep.subr.mxu0 %v4720_v46  ;;  %1367 = vmatprep.subr.mxu1 %v4795_v2  ;;  %v4827_v46 = vld [vmem:[#allocation83_spill] sm:$0xff]  ;;  %v4856_v2 = vld [vmem:[#allocation93_spill] sm:$0xff] }
 0x56e   :  { %1297 = vmatpush1.msra.mxu0 %v4796_v3  ;;  %1368 = vmatpush1.msra.mxu1 %v4797_v22  ;;  %v4857_v3 = vld [vmem:[#allocation94_spill] sm:$0xff]  ;;  %v4858_v22 = vld [vmem:[#allocation95_spill] sm:$0xff] }
 0x56f   :  { %1298 = vmatprep.subr.mxu0 %v4798_v23  ;;  %1369 = vmatprep.subr.mxu1 %v4799_v24  ;;  %v4859_v23 = vld [vmem:[#allocation96_spill] sm:$0xff]  ;;  %v4860_v24 = vld [vmem:[#allocation97_spill] sm:$0xff] }
 0x570   :  { %1299 = vmatpush2.msra.mxu0 %v4800_v25  ;;  %1370 = vmatpush2.msra.mxu1 %v4801_v26  ;;  %v4861_v25 = vld [vmem:[#allocation98_spill] sm:$0xff]  ;;  %v2053_v26 = vld [vmem:[#allocation2 + $0x1e8] sm:$0xff] }
 0x571   :  { %1300 = vmatprep.subr.mxu0 %v4802_v30  ;;  %1371 = vmatprep.subr.mxu1 %v4803_v41  ;;  %v2054_v30 = vld [vmem:[#allocation2 + $0x1f8] sm:$0xff] }
 0x572   :  { %1301 = vmatpush2.msra.mxu0 %v4804_v43  ;;  %1372 = vmatpush2.msra.mxu1 %v4805_v47  ;;  %v1774_v43 = vld [vmem:[%s3900_s0 + $0x50] sm:$0xff] }
 0x573   :  { %1302 = vmatprep.subr.mxu0 %v4806_v50  ;;  %1373 = vmatprep.subr.mxu1 %v4807_v51 }
 0x574   :  { %1303 = vmatpush2.msra.mxu0 %v4808_v59  ;;  %1374 = vmatpush2.msra.mxu1 %v4809_v61 }
 0x575   :  { %1304 = vmatprep.subr.mxu0 %v4810_v60  ;;  %1375 = vmatprep.subr.mxu1 %v4811_v62 }
 0x576   :  { %1305 = vmatpush2.msra.mxu0 %v4812_v48  ;;  %1376 = vmatpush2.msra.mxu1 %v4813_v1  ;;  %v1775_v48 = vld [vmem:[%s3900_s0 + $0x58] sm:$0xff] }
 0x577   :  { %1306 = vmatprep.subr.mxu0 %v4814_v4  ;;  %1377 = vmatprep.subr.mxu1 %v4815_v5 }
 0x578   :  { %1307 = vmatpush2.msra.mxu0 %v4816_v6  ;;  %1378 = vmatpush2.msra.mxu1 %v4817_v7 }
 0x579   :  { %1308 = vmatprep.subr.mxu0 %v4818_v9  ;;  %1379 = vmatprep.subr.mxu1 %v4819_v54 }
 0x57a   :  { %1309 = vmatpush2.msra.mxu0 %v4820_v45  ;;  %1380 = vmatpush2.msra.mxu1 %v4821_v31 }
 0x57b   :  { %1310 = vmatprep.subr.mxu0 %v4822_v34  ;;  %1381 = vmatprep.subr.mxu1 %v4823_v16 }
 0x57c   :  { %1311 = vmatpush2.msra.mxu0 %v4824_v19  ;;  %1382 = vmatpush2.msra.mxu1 %v4825_v20 }
 0x57d   :  { %1312 = vmatprep.subr.mxu0 %v4826_v11  ;;  %1383 = vmatprep.subr.mxu1 %v4827_v46 }
 0x57e   :  { %1313 = vmatpush2.msra.mxu0 %v4828_v28  ;;  %1384 = vmatpush2.msra.mxu1 %v4829_v27 }
 0x57f   :  { %1314 = vmatprep.subr.mxu0 %v4830_v33  ;;  %1385 = vmatprep.subr.mxu1 %v4831_v12 }
 0x580   :  { %1315 = vmatpush2.msra.mxu0 %v4832_v13  ;;  %1386 = vmatpush2.msra.mxu1 %v4833_v17 }
 0x581   :  { %1316 = vmatprep.subr.mxu0 %v4834_v14  ;;  %1387 = vmatprep.subr.mxu1 %v4835_v15 }
 0x582   :  { %1317 = vmatpush2.msra.mxu0 %v4836_v58  ;;  %1388 = vmatpush2.msra.mxu1 %v4837_v18 }
 0x583   :  { %1318 = vmatprep.subr.mxu0 %v4838_v10  ;;  %1389 = vmatprep.subr.mxu1 %v4839_v35 }
 0x584   :  { %1319 = vmatpush2.msra.mxu0 %v4840_v29  ;;  %1390 = vmatpush2.msra.mxu1 %v4841_v21 }
 0x585   :  { %1320 = vmatprep.subr.mxu0 %v4842_v32  ;;  %1391 = vmatprep.subr.mxu1 %v4843_v36 }
 0x586   :  { %1321 = vmatpush2.msra.mxu0 %v4844_v55  ;;  %1392 = vmatpush2.msra.mxu1 %v4845_v38 }
 0x587   :  { %1322 = vmatprep.subr.mxu0 %v4846_v40  ;;  %1393 = vmatprep.subr.mxu1 %v4847_v42 }
 0x588   :  { %1323 = vmatpush2.msra.mxu0 %v4848_v44  ;;  %1394 = vmatpush2.msra.mxu1 %v4849_v8 }
 0x589   :  { %1324 = vmatprep.subr.mxu0 %v4850_v39  ;;  %1395 = vmatprep.subr.mxu1 %v4851_v52 }
 0x58a   :  { %1325 = vmatpush2.msra.mxu0 %v4852_v57  ;;  %1396 = vmatpush2.msra.mxu1 %v4853_v49 }
 0x58b   :  { %1326 = vmatprep.subr.mxu0 %v4854_v63  ;;  %1397 = vmatprep.subr.mxu1 %v4855_v0 }
 0x58c   :  { %1327 = vmatpush2.msra.mxu0 %v4856_v2  ;;  %1398 = vmatpush2.msra.mxu1 %v4857_v3 }
 0x58d   :  { %1328 = vmatprep.subr.mxu0 %v4858_v22  ;;  %1399 = vmatprep.subr.mxu1 %v4859_v23 }
 0x58e   :  { %1329 = vmatpush2.msra.mxu0 %v4860_v24  ;;  %1400 = vmatpush2.msra.mxu1 %v4861_v25 }
 0x58f   :  { %1447 = vmatprep.subr.mxu0 %v2053_v26  ;;  %1518 = vmatprep.subr.mxu1 %v2054_v30 }
 0x60f   :  { %v1151_v41 = vpop.f32.mrf.mxu0  ;;  %v1222_v51 = vpop.f32.mrf.mxu1 }
 0x611   :  { %v1153_v47 = vpop.f32.mrf.mxu0  ;;  %v1224_v60 = vpop.f32.mrf.mxu1 }
 0x612   :  { %v1231_v50 = vcombine.low %v1151_v41, %v1153_v47  ;;  %v1232_v62 = vcombine.low %v1222_v51, %v1224_v60  ;;  %v2058_v60 = vld [vmem:[#allocation2 + $0x1d8] sm:$0xff] }
 0x614   :  { %v1235_v59 = vadd.f32 %v1774_v43, %v1231_v50  ;;  %v1236_v1 = vadd.f32 %v1775_v48, %v1232_v62  ;;  %v2059_v62 = vld [vmem:[#allocation2 + $0x1c0] sm:$0xff]  ;;  %v2060_v48 = vld [vmem:[#allocation2 + $0x1d0] sm:$0xff] }
 0x616   :  { %v1776_v61 = vmul.f32 -1.442695, %v1235_v59  ;;  %v1777_v4 = vmul.f32 -1.442695, %v1236_v1  ;;  %v1250_v45 = vrot.slane %v1236_v1, 4  ;;  %v2055_v59 = vld [vmem:[#allocation2 + $0x1e0] sm:$0xff] }
 0x617   :  { %v2061_v1 = vld [vmem:[#allocation2 + $0x1a8] sm:$0xff] }
 0x618   :  { %1888 = vpow2.f32 %v1776_v61  ;;  %v2057_v61 = vld [vmem:[#allocation2 + $0x1c8] sm:$0xff] }
 0x619   :  { %1890 = vpow2.f32 %v1777_v4  ;;  %v2062_v4 = vld [vmem:[#allocation2 + $0x1b8] sm:$0xff] }
 0x625   :  { %v1889_v6 = vpop.eup %1888 }
 0x626   :  { %v1243_v9 = vadd.f32 1.0, %v1889_v6  ;;  %v1891_v34 = vpop.eup %1890  ;;  %v2063_v6 = vld [vmem:[#allocation2 + $0x1a0] sm:$0xff] }
 0x627   :  { %v1244_v33 = vadd.f32 1.0, %v1891_v34  ;;  %v2066_v34 = vld [vmem:[#allocation2 + $0x198] sm:$0xff] }
 0x628   :  { %1892 = vrcp.f32 %v1243_v9  ;;  %v2064_v9 = vld [vmem:[#allocation2 + $0x1b0] sm:$0xff] }
 0x629   :  { %1894 = vtanh.f32 %v1250_v45  ;;  %v2065_v45 = vld [vmem:[#allocation2 + $0x188] sm:$0xff] }
 0x62a   :  { %1896 = vrcp.f32 %v1244_v33  ;;  %v2070_v33 = vld [vmem:[#allocation2 + $0x178] sm:$0xff] }
 0x635   :  { %v1893_v19 = vpop.eup %1892 }
 0x636   :  { %v1254_v11 = vrot.slane %v1893_v19, 4  ;;  %v1895_v28 = vpop.eup %1894 }
 0x637   :  { %v1257_v26 = vmul.f32 %v1895_v28, %v1893_v19  ;;  %v1897_v41 = vpop.eup %1896  ;;  %v2067_v19 = vld [vmem:[#allocation2 + $0x180] sm:$0xff]  ;;  %v2069_v28 = vld [vmem:[#allocation2 + $0x168] sm:$0xff] }
 0x638   :  { %v1256_v13 = vmul.f32 %v1254_v11, %v3591_v37  ;;  %v2056_v37 = vld [vmem:[#allocation2 + $0x1f0] sm:$0xff] }
 0x639   :  { %v2068_v11 = vld [vmem:[#allocation2 + $0x190] sm:$0xff] }
 0x63a   :  { %v3734_v30 = vadd.f32 %v1257_v26, %v1256_v13  ;;  %v2071_v13 = vld [vmem:[#allocation2 + $0x160] sm:$0xff]  ;;  %v2072_v26 = vld [vmem:[#allocation2 + $0x170] sm:$0xff] }
 0x63c   :  { %1898 = vtanh.f32 %v3734_v30 }
 0x649   :  { %v1899_v43 = vpop.eup %1898 }
 0x64a   :  { %v1260_v47 = vmul.f32 %v1899_v43, %v1897_v41  ;;  %v2073_v41 = vld [vmem:[#allocation2 + $0x148] sm:$0xff]  ;;  %v2074_v43 = vld [vmem:[#allocation2 + $0x158] sm:$0xff] }
 0x64c   :  { %v1262_v50 = vmul.f32 %v1260_v47, %v2776_v53  ;;  %v1261_v51 = vmul.f32 %v3598_v56, %v1260_v47  ;;  %v2075_v47 = vld [vmem:[#allocation2 + $0x140] sm:$0xff] }
 0x64e   :  { %1330 = vmatprep.mubr.f32.mxu0 %v1262_v50  ;;  %1401 = vmatprep.mubr.f32.mxu1 %v1262_v50  ;;  %v2076_v50 = vld [vmem:[#allocation2 + $0x150] sm:$0xff] }
 0x64f   :  { %1331 = vmatmul.mubr.f32.vlgmr.msra.gmra.mxu0 %v1261_v51  ;;  %1402 = vmatmul.mubr.f32.vlgmr.msra.gmra.mxu1 %v1261_v51  ;;  %v2077_v51 = vld [vmem:[#allocation2 + $0x128] sm:$0xff] }
 0x650   :  { %1448 = vmatpush1.msra.mxu0 %v2055_v59  ;;  %1519 = vmatpush1.msra.mxu1 %v2056_v37  ;;  %v2078_v59 = vld [vmem:[#allocation2 + $0x138] sm:$0xff]  ;;  %v2079_v37 = vld [vmem:[#allocation2 + $0x120] sm:$0xff] }
 0x651   :  { %1449 = vmatprep.subr.mxu0 %v2057_v61  ;;  %1520 = vmatprep.subr.mxu1 %v2058_v60  ;;  %v2080_v61 = vld [vmem:[#allocation2 + $0x130] sm:$0xff]  ;;  %v2081_v60 = vld [vmem:[#allocation2 + $0x108] sm:$0xff] }
 0x652   :  { %1450 = vmatpush1.msra.mxu0 %v2059_v62  ;;  %1521 = vmatpush1.msra.mxu1 %v2060_v48  ;;  %v2082_v62 = vld [vmem:[#allocation2 + $0x118] sm:$0xff]  ;;  %v2083_v48 = vld [vmem:[#allocation2 + $0x100] sm:$0xff] }
 0x653   :  { %1451 = vmatprep.subr.mxu0 %v2061_v1  ;;  %1522 = vmatprep.subr.mxu1 %v2062_v4  ;;  %v2084_v1 = vld [vmem:[#allocation2 + $0x110] sm:$0xff]  ;;  %v2085_v4 = vld [vmem:[#allocation2 + $0xe8] sm:$0xff] }
 0x654   :  { %1452 = vmatpush1.msra.mxu0 %v2063_v6  ;;  %1523 = vmatpush1.msra.mxu1 %v2064_v9  ;;  %v2086_v6 = vld [vmem:[#allocation2 + $0xf8] sm:$0xff]  ;;  %v2087_v9 = vld [vmem:[#allocation2 + $0xe0] sm:$0xff] }
 0x655   :  { %1453 = vmatprep.subr.mxu0 %v2065_v45  ;;  %1524 = vmatprep.subr.mxu1 %v2066_v34  ;;  %v2088_v45 = vld [vmem:[#allocation2 + $0xf0] sm:$0xff]  ;;  %v2089_v34 = vld [vmem:[#allocation2 + $0xc8] sm:$0xff] }
 0x656   :  { %1454 = vmatpush1.msra.mxu0 %v2067_v19  ;;  %1525 = vmatpush1.msra.mxu1 %v2068_v11  ;;  %v2090_v19 = vld [vmem:[#allocation2 + $0xd8] sm:$0xff]  ;;  %v2091_v11 = vld [vmem:[#allocation2 + $0xc0] sm:$0xff] }
 0x657   :  { %1455 = vmatprep.subr.mxu0 %v2069_v28  ;;  %1526 = vmatprep.subr.mxu1 %v2070_v33  ;;  %v2092_v28 = vld [vmem:[#allocation2 + $0xd0] sm:$0xff]  ;;  %v2093_v33 = vld [vmem:[#allocation2 + $0xa8] sm:$0xff] }
 0x658   :  { %1456 = vmatpush1.msra.mxu0 %v2071_v13  ;;  %1527 = vmatpush1.msra.mxu1 %v2072_v26  ;;  %v2094_v13 = vld [vmem:[#allocation2 + $0xb8] sm:$0xff]  ;;  %v2095_v26 = vld [vmem:[#allocation2 + $0xa0] sm:$0xff] }
 0x659   :  { %1457 = vmatprep.subr.mxu0 %v2073_v41  ;;  %1528 = vmatprep.subr.mxu1 %v2074_v43  ;;  %v2096_v41 = vld [vmem:[#allocation2 + $0xb0] sm:$0xff]  ;;  %v2097_v43 = vld [vmem:[#allocation2 + $0x88] sm:$0xff] }
 0x65a   :  { %1458 = vmatpush1.msra.mxu0 %v2075_v47  ;;  %1529 = vmatpush1.msra.mxu1 %v2076_v50  ;;  %v2098_v47 = vld [vmem:[#allocation2 + $0x98] sm:$0xff]  ;;  %v2099_v50 = vld [vmem:[#allocation2 + $0x80] sm:$0xff] }
 0x65b   :  { %1459 = vmatprep.subr.mxu0 %v2077_v51  ;;  %1530 = vmatprep.subr.mxu1 %v2078_v59  ;;  %v2100_v51 = vld [vmem:[#allocation2 + $0x90] sm:$0xff]  ;;  %v2101_v59 = vld [vmem:[#allocation2 + $0x68] sm:$0xff] }
 0x65c   :  { %1460 = vmatpush1.msra.mxu0 %v2079_v37  ;;  %1531 = vmatpush1.msra.mxu1 %v2080_v61  ;;  %v2102_v37 = vld [vmem:[#allocation2 + $0x78] sm:$0xff]  ;;  %v2103_v61 = vld [vmem:[#allocation2 + $0x60] sm:$0xff] }
 0x65d   :  { %1461 = vmatprep.subr.mxu0 %v2081_v60  ;;  %1532 = vmatprep.subr.mxu1 %v2082_v62  ;;  %v2104_v60 = vld [vmem:[#allocation2 + $0x70] sm:$0xff]  ;;  %v2105_v62 = vld [vmem:[#allocation2 + $0x48] sm:$0xff] }
 0x65e   :  { %1462 = vmatpush1.msra.mxu0 %v2083_v48  ;;  %1533 = vmatpush1.msra.mxu1 %v2084_v1  ;;  %v2106_v48 = vld [vmem:[#allocation2 + $0x58] sm:$0xff]  ;;  %v2107_v1 = vld [vmem:[#allocation2 + $0x40] sm:$0xff] }
 0x65f   :  { %1463 = vmatprep.subr.mxu0 %v2085_v4  ;;  %1534 = vmatprep.subr.mxu1 %v2086_v6  ;;  %v2108_v4 = vld [vmem:[#allocation2 + $0x50] sm:$0xff]  ;;  %v2109_v6 = vld [vmem:[#allocation2 + $0x28] sm:$0xff] }
 0x660   :  { %1464 = vmatpush1.msra.mxu0 %v2087_v9  ;;  %1535 = vmatpush1.msra.mxu1 %v2088_v45  ;;  %v2110_v9 = vld [vmem:[#allocation2 + $0x38] sm:$0xff]  ;;  %v2111_v45 = vld [vmem:[#allocation2 + $0x20] sm:$0xff] }
 0x661   :  { %1465 = vmatprep.subr.mxu0 %v2089_v34  ;;  %1536 = vmatprep.subr.mxu1 %v2090_v19  ;;  %v2112_v34 = vld [vmem:[#allocation2 + $0x30] sm:$0xff]  ;;  %v2113_v19 = vld [vmem:[#allocation2 + $0x8] sm:$0xff] }
 0x662   :  { %1466 = vmatpush1.msra.mxu0 %v2091_v11  ;;  %1537 = vmatpush1.msra.mxu1 %v2092_v28  ;;  %v2114_v11 = vld [vmem:[#allocation2 + $0x18] sm:$0xff]  ;;  %v2115_v28 = vld [vmem:[#allocation2] sm:$0xff] }
 0x663   :  { %1467 = vmatprep.subr.mxu0 %v2093_v33  ;;  %1538 = vmatprep.subr.mxu1 %v2094_v13  ;;  %v2116_v33 = vld [vmem:[#allocation2 + $0x10] sm:$0xff]  ;;  %v2117_v13 = vld [vmem:[#allocation2 + $0x3e8] sm:$0xff] }
 0x664   :  { %1468 = vmatpush1.msra.mxu0 %v2095_v26  ;;  %1539 = vmatpush1.msra.mxu1 %v2096_v41  ;;  %v2118_v26 = vld [vmem:[#allocation2 + $0x3f8] sm:$0xff]  ;;  %v2119_v41 = vld [vmem:[#allocation2 + $0x3e0] sm:$0xff] }
 0x665   :  { %1469 = vmatprep.subr.mxu0 %v2097_v43  ;;  %1540 = vmatprep.subr.mxu1 %v2098_v47  ;;  %v2120_v43 = vld [vmem:[#allocation2 + $0x3f0] sm:$0xff]  ;;  %v2121_v47 = vld [vmem:[#allocation2 + $0x3c8] sm:$0xff] }
 0x666   :  { %1470 = vmatpush1.msra.mxu0 %v2099_v50  ;;  %1541 = vmatpush1.msra.mxu1 %v2100_v51  ;;  %v2122_v50 = vld [vmem:[#allocation2 + $0x3d8] sm:$0xff]  ;;  %v2123_v51 = vld [vmem:[#allocation2 + $0x3c0] sm:$0xff] }
 0x667   :  { %1471 = vmatprep.subr.mxu0 %v2101_v59  ;;  %1542 = vmatprep.subr.mxu1 %v2102_v37  ;;  %v2124_v59 = vld [vmem:[#allocation2 + $0x3d0] sm:$0xff]  ;;  %v2125_v37 = vld [vmem:[#allocation2 + $0x3a8] sm:$0xff] }
 0x668   :  { %1472 = vmatpush1.msra.mxu0 %v2103_v61  ;;  %1543 = vmatpush1.msra.mxu1 %v2104_v60  ;;  %v2126_v61 = vld [vmem:[#allocation2 + $0x3b8] sm:$0xff]  ;;  %v2127_v60 = vld [vmem:[#allocation2 + $0x3a0] sm:$0xff] }
 0x669   :  { %1473 = vmatprep.subr.mxu0 %v2105_v62  ;;  %1544 = vmatprep.subr.mxu1 %v2106_v48  ;;  %v2128_v62 = vld [vmem:[#allocation2 + $0x3b0] sm:$0xff]  ;;  %v2129_v48 = vld [vmem:[#allocation2 + $0x388] sm:$0xff] }
 0x66a   :  { %1474 = vmatpush1.msra.mxu0 %v2107_v1  ;;  %1545 = vmatpush1.msra.mxu1 %v2108_v4  ;;  %v2130_v1 = vld [vmem:[#allocation2 + $0x398] sm:$0xff]  ;;  %v2131_v4 = vld [vmem:[#allocation2 + $0x380] sm:$0xff] }
 0x66b   :  { %1475 = vmatprep.subr.mxu0 %v2109_v6  ;;  %1546 = vmatprep.subr.mxu1 %v2110_v9  ;;  %v2132_v6 = vld [vmem:[#allocation2 + $0x390] sm:$0xff]  ;;  %v2133_v9 = vld [vmem:[#allocation2 + $0x368] sm:$0xff] }
 0x66c   :  { %1476 = vmatpush1.msra.mxu0 %v2111_v45  ;;  %1547 = vmatpush1.msra.mxu1 %v2112_v34  ;;  %v2134_v45 = vld [vmem:[#allocation2 + $0x360] sm:$0xff]  ;;  %v2135_v34 = vld [vmem:[#allocation2 + $0x348] sm:$0xff] }
 0x66d   :  { %1477 = vmatprep.subr.mxu0 %v2113_v19  ;;  %1548 = vmatprep.subr.mxu1 %v2114_v11  ;;  %v2136_v19 = vld [vmem:[#allocation2 + $0x340] sm:$0xff]  ;;  %v2137_v11 = vld [vmem:[#allocation2 + $0x328] sm:$0xff] }
 0x66e   :  { %1478 = vmatpush1.msra.mxu0 %v2115_v28  ;;  %1549 = vmatpush1.msra.mxu1 %v2116_v33  ;;  %v2138_v28 = vld [vmem:[#allocation2 + $0x320] sm:$0xff] }
 0x66f   :  { %1479 = vmatprep.subr.mxu0 %v2117_v13  ;;  %1550 = vmatprep.subr.mxu1 %v2118_v26  ;;  %v1637_v33 = vld [vmem:[%s3905_s5 + $0x60] sm:$0xff]  ;;  %v1652_v13 = vld [vmem:[%s3905_s5 + $0xd8] sm:$0xff] }
 0x670   :  { %1480 = vmatpush2.msra.mxu0 %v2119_v41  ;;  %1551 = vmatpush2.msra.mxu1 %v2120_v43  ;;  %v1636_v26 = vld [vmem:[%s3905_s5 + $0x58] sm:$0xff]  ;;  %v1651_v41 = vld [vmem:[%s3905_s5 + $0xd0] sm:$0xff] }
 0x671   :  { %1481 = vmatprep.subr.mxu0 %v2121_v47  ;;  %1552 = vmatprep.subr.mxu1 %v2122_v50  ;;  %v1635_v43 = vld [vmem:[%s3905_s5 + $0x50] sm:$0xff]  ;;  %v1650_v47 = vld [vmem:[%s3905_s5 + $0xc8] sm:$0xff] }
 0x672   :  { %1482 = vmatpush2.msra.mxu0 %v2123_v51  ;;  %1553 = vmatpush2.msra.mxu1 %v2124_v59  ;;  %v1634_v50 = vld [vmem:[%s3905_s5 + $0x48] sm:$0xff]  ;;  %v1649_v51 = vld [vmem:[%s3905_s5 + $0xc0] sm:$0xff] }
 0x673   :  { %1483 = vmatprep.subr.mxu0 %v2125_v37  ;;  %1554 = vmatprep.subr.mxu1 %v2126_v61  ;;  %v1633_v59 = vld [vmem:[%s3905_s5 + $0x40] sm:$0xff]  ;;  %v1648_v37 = vld [vmem:[%s3905_s5 + $0xb8] sm:$0xff] }
 0x674   :  { %1484 = vmatpush2.msra.mxu0 %v2127_v60  ;;  %1555 = vmatpush2.msra.mxu1 %v2128_v62  ;;  %v1632_v61 = vld [vmem:[%s3905_s5 + $0x38] sm:$0xff]  ;;  %v1647_v60 = vld [vmem:[%s3905_s5 + $0xb0] sm:$0xff] }
 0x675   :  { %1485 = vmatprep.subr.mxu0 %v2129_v48  ;;  %1556 = vmatprep.subr.mxu1 %v2130_v1  ;;  %v1631_v62 = vld [vmem:[%s3905_s5 + $0x30] sm:$0xff]  ;;  %v1646_v48 = vld [vmem:[%s3905_s5 + $0xa8] sm:$0xff] }
 0x676   :  { %1486 = vmatpush2.msra.mxu0 %v2131_v4  ;;  %1557 = vmatpush2.msra.mxu1 %v2132_v6  ;;  %v1630_v1 = vld [vmem:[%s3905_s5 + $0x28] sm:$0xff]  ;;  %v1645_v4 = vld [vmem:[%s3905_s5 + $0xa0] sm:$0xff] }
 0x677   :  { %1487 = vmatprep.subr.mxu0 %v2133_v9  ;;  %1558 = vmatprep.subr.mxu1 %v4815_v5  ;;  %v2139_v5 = vld [vmem:[#allocation2 + $0x308] sm:$0xff]  ;;  %v1629_v6 = vld [vmem:[%s3905_s5 + $0x20] sm:$0xff]  ;;  %v1644_v9 = vld [vmem:[%s3905_s5 + $0x98] sm:$0xff] }
 0x678   :  { %1488 = vmatpush2.msra.mxu0 %v2134_v45  ;;  %1559 = vmatpush2.msra.mxu1 %v4817_v7  ;;  %v2140_v7 = vld [vmem:[#allocation2 + $0x300] sm:$0xff]  ;;  %v1628_v45 = vld [vmem:[%s3905_s5 + $0x18] sm:$0xff] }
 0x679   :  { %1489 = vmatprep.subr.mxu0 %v2135_v34  ;;  %1560 = vmatprep.subr.mxu1 %v4819_v54  ;;  %v2141_v54 = vld [vmem:[#allocation2 + $0x2e8] sm:$0xff]  ;;  %v1643_v34 = vld [vmem:[%s3905_s5 + $0x90] sm:$0xff] }
 0x67a   :  { %1490 = vmatpush2.msra.mxu0 %v2136_v19  ;;  %1561 = vmatpush2.msra.mxu1 %v4821_v31  ;;  %v2142_v31 = vld [vmem:[#allocation2 + $0x2e0] sm:$0xff]  ;;  %v1627_v19 = vld [vmem:[%s3905_s5 + $0x10] sm:$0xff] }
 0x67b   :  { %1491 = vmatprep.subr.mxu0 %v2137_v11  ;;  %1562 = vmatprep.subr.mxu1 %v4823_v16  ;;  %v1642_v11 = vld [vmem:[%s3905_s5 + $0x88] sm:$0xff] }
 0x67c   :  { %1492 = vmatpush2.msra.mxu0 %v2138_v28  ;;  %1563 = vmatpush2.msra.mxu1 %v4825_v20  ;;  %v1778_v20 = vld [vmem:[%s3900_s0 + $0x60] sm:$0xff]  ;;  %v1626_v28 = vld [vmem:[%s3905_s5 + $0x8] sm:$0xff] }
 0x67d   :  { %1493 = vmatprep.subr.mxu0 %v2139_v5  ;;  %1564 = vmatprep.subr.mxu1 %v4827_v46  ;;  %v1641_v5 = vld [vmem:[%s3905_s5 + $0x80] sm:$0xff] }
 0x67e   :  { %1494 = vmatpush2.msra.mxu0 %v2140_v7  ;;  %1565 = vmatpush2.msra.mxu1 %v4829_v27  ;;  %v1625_v7 = vld [vmem:[%s3905_s5] sm:$0xff] }
 0x67f   :  { %1495 = vmatprep.subr.mxu0 %v2141_v54  ;;  %1566 = vmatprep.subr.mxu1 %v4831_v12 }
 0x680   :  { %1496 = vmatpush2.msra.mxu0 %v2142_v31  ;;  %1567 = vmatpush2.msra.mxu1 %v4833_v17  ;;  %v1782_v31 = vld [vmem:[%s3900_s0 + $0x70] sm:$0xff] }
 0x681   :  { %1497 = vmatprep.subr.mxu0 %v4834_v14  ;;  %1568 = vmatprep.subr.mxu1 %v4835_v15 }
 0x682   :  { %1498 = vmatpush2.msra.mxu0 %v4836_v58  ;;  %1569 = vmatpush2.msra.mxu1 %v4837_v18  ;;  %v1779_v18 = vld [vmem:[%s3900_s0 + $0x68] sm:$0xff] }
 0x683   :  { %1499 = vmatprep.subr.mxu0 %v4838_v10  ;;  %1570 = vmatprep.subr.mxu1 %v4839_v35 }
 0x684   :  { %1500 = vmatpush2.msra.mxu0 %v4840_v29  ;;  %1571 = vmatpush2.msra.mxu1 %v4841_v21 }
 0x685   :  { %1501 = vmatprep.subr.mxu0 %v4842_v32  ;;  %1572 = vmatprep.subr.mxu1 %v4843_v36 }
 0x686   :  { %1502 = vmatpush2.msra.mxu0 %v4844_v55  ;;  %1573 = vmatpush2.msra.mxu1 %v4845_v38 }
 0x687   :  { %1503 = vmatprep.subr.mxu0 %v4846_v40  ;;  %1574 = vmatprep.subr.mxu1 %v4847_v42 }
 0x688   :  { %1504 = vmatpush2.msra.mxu0 %v4848_v44  ;;  %1575 = vmatpush2.msra.mxu1 %v4849_v8 }
 0x689   :  { %1505 = vmatprep.subr.mxu0 %v4850_v39  ;;  %1576 = vmatprep.subr.mxu1 %v4851_v52 }
 0x68a   :  { %1506 = vmatpush2.msra.mxu0 %v4852_v57  ;;  %1577 = vmatpush2.msra.mxu1 %v4853_v49 }
 0x68b   :  { %1507 = vmatprep.subr.mxu0 %v4854_v63  ;;  %1578 = vmatprep.subr.mxu1 %v4855_v0 }
 0x68c   :  { %1508 = vmatpush2.msra.mxu0 %v4856_v2  ;;  %1579 = vmatpush2.msra.mxu1 %v4857_v3  ;;  %v1656_v2 = vld [vmem:[%s3905_s5 + $0xf8] sm:$0xff] }
 0x68d   :  { %1509 = vmatprep.subr.mxu0 %v4858_v22  ;;  %1580 = vmatprep.subr.mxu1 %v4859_v23  ;;  %v1640_v3 = vld [vmem:[%s3905_s5 + $0x78] sm:$0xff]  ;;  %v1655_v22 = vld [vmem:[%s3905_s5 + $0xf0] sm:$0xff] }
 0x68e   :  { %1510 = vmatpush2.msra.mxu0 %v4860_v24  ;;  %1581 = vmatpush2.msra.mxu1 %v4861_v25  ;;  %v1639_v23 = vld [vmem:[%s3905_s5 + $0x70] sm:$0xff]  ;;  %v1654_v24 = vld [vmem:[%s3905_s5 + $0xe8] sm:$0xff] }
 0x68f   :  { %1787 = vmatprep.subr.mxu0 %v1656_v2  ;;  %v1638_v25 = vld [vmem:[%s3905_s5 + $0x68] sm:$0xff] }
 0x70f   :  { %v1332_v16 = vpop.f32.mrf.mxu0  ;;  %v1403_v12 = vpop.f32.mrf.mxu1 }
 0x711   :  { %v1334_v46 = vpop.f32.mrf.mxu0  ;;  %v1405_v15 = vpop.f32.mrf.mxu1 }
 0x712   :  { %v1412_v27 = vcombine.low %v1332_v16, %v1334_v46  ;;  %v1413_v58 = vcombine.low %v1403_v12, %v1405_v15  ;;  %v1783_v15 = vld [vmem:[%s3900_s0 + $0x78] sm:$0xff] }
 0x714   :  { %v1416_v17 = vadd.f32 %v1778_v20, %v1412_v27  ;;  %v1417_v10 = vadd.f32 %v1779_v18, %v1413_v58 }
 0x716   :  { %v1780_v14 = vmul.f32 -1.442695, %v1416_v17  ;;  %v1781_v35 = vmul.f32 -1.442695, %v1417_v10  ;;  %v1431_v32 = vrot.slane %v1417_v10, 4 }
 0x718   :  { %1900 = vpow2.f32 %v1780_v14 }
 0x719   :  { %1902 = vpow2.f32 %v1781_v35 }
 0x725   :  { %v1901_v29 = vpop.eup %1900 }
 0x726   :  { %v1424_v21 = vadd.f32 1.0, %v1901_v29  ;;  %v1903_v36 = vpop.eup %1902 }
 0x727   :  { %v1425_v42 = vadd.f32 1.0, %v1903_v36 }
 0x728   :  { %1904 = vrcp.f32 %v1424_v21 }
 0x729   :  { %1906 = vtanh.f32 %v1431_v32 }
 0x72a   :  { %1908 = vrcp.f32 %v1425_v42 }
 0x735   :  { %v1905_v55 = vpop.eup %1904 }
 0x736   :  { %v1435_v38 = vrot.slane %v1905_v55, 4  ;;  %v1907_v40 = vpop.eup %1906 }
 0x737   :  { %v1438_v8 = vmul.f32 %v1907_v40, %v1905_v55  ;;  %v1909_v52 = vpop.eup %1908 }
 0x738   :  { %v1437_v44 = vmul.f32 %v1435_v38, %v3734_v30  ;;  %v1653_v30 = vld [vmem:[%s3905_s5 + $0xe0] sm:$0xff] }
 0x73a   :  { %v3784_v39 = vadd.f32 %v1438_v8, %v1437_v44 }
 0x73c   :  { %1910 = vtanh.f32 %v3784_v39 }
 0x749   :  { %v1911_v57 = vpop.eup %1910 }
 0x74a   :  { %v1441_v49 = vmul.f32 %v1911_v57, %v1909_v52 }
 0x74c   :  { %v1443_v63 = vmul.f32 %v1441_v49, %v2776_v53  ;;  %v1442_v0 = vmul.f32 %v3598_v56, %v1441_v49 }
 0x74e   :  { %1511 = vmatprep.mubr.f32.mxu0 %v1443_v63  ;;  %1582 = vmatprep.mubr.f32.mxu1 %v1443_v63 }
 0x74f   :  { %1512 = vmatmul.mubr.f32.vlgmr.msra.gmra.mxu0 %v1442_v0  ;;  %1583 = vmatmul.mubr.f32.vlgmr.msra.gmra.mxu1 %v1442_v0 }
 0x750   :  { %1788 = vmatpush3.msra.mxu0 %v1640_v3 }
 0x751   :  { %1789 = vmatprep.subr.mxu0 %v1655_v22 }
 0x752   :  { %1790 = vmatpush3.msra.mxu0 %v1639_v23 }
 0x753   :  { %1791 = vmatprep.subr.mxu0 %v1654_v24 }
 0x754   :  { %1792 = vmatpush3.msra.mxu0 %v1638_v25 }
 0x755   :  { %1793 = vmatprep.subr.mxu0 %v1653_v30 }
 0x756   :  { %1794 = vmatpush3.msra.mxu0 %v1637_v33 }
 0x757   :  { %1795 = vmatprep.subr.mxu0 %v1652_v13 }
 0x758   :  { %1796 = vmatpush3.msra.mxu0 %v1636_v26 }
 0x759   :  { %1797 = vmatprep.subr.mxu0 %v1651_v41 }
 0x75a   :  { %1798 = vmatpush3.msra.mxu0 %v1635_v43 }
 0x75b   :  { %1799 = vmatprep.subr.mxu0 %v1650_v47 }
 0x75c   :  { %1800 = vmatpush3.msra.mxu0 %v1634_v50 }
 0x75d   :  { %1801 = vmatprep.subr.mxu0 %v1649_v51 }
 0x75e   :  { %1802 = vmatpush3.msra.mxu0 %v1633_v59 }
 0x75f   :  { %1803 = vmatprep.subr.mxu0 %v1648_v37 }
 0x760   :  { %1804 = vmatpush3.msra.mxu0 %v1632_v61 }
 0x761   :  { %1805 = vmatprep.subr.mxu0 %v1647_v60 }
 0x762   :  { %1806 = vmatpush3.msra.mxu0 %v1631_v62 }
 0x763   :  { %1807 = vmatprep.subr.mxu0 %v1646_v48 }
 0x764   :  { %1808 = vmatpush3.msra.mxu0 %v1630_v1 }
 0x765   :  { %1809 = vmatprep.subr.mxu0 %v1645_v4 }
 0x766   :  { %1810 = vmatpush3.msra.mxu0 %v1629_v6 }
 0x767   :  { %1811 = vmatprep.subr.mxu0 %v1644_v9 }
 0x768   :  { %1812 = vmatpush3.msra.mxu0 %v1628_v45 }
 0x769   :  { %1813 = vmatprep.subr.mxu0 %v1643_v34 }
 0x76a   :  { %1814 = vmatpush3.msra.mxu0 %v1627_v19 }
 0x76b   :  { %1815 = vmatprep.subr.mxu0 %v1642_v11 }
 0x76c   :  { %1816 = vmatpush3.msra.mxu0 %v1626_v28 }
 0x76d   :  { %1817 = vmatprep.subr.mxu0 %v1641_v5 }
 0x76e   :  { %1818 = vmatpush3.msra.mxu0 %v1625_v7 }
 0x80f   :  { %v1513_v54 = vpop.f32.mrf.mxu0  ;;  %v1584_v46 = vpop.f32.mrf.mxu1 }
 0x811   :  { %v1515_v16 = vpop.f32.mrf.mxu0  ;;  %v1586_v17 = vpop.f32.mrf.mxu1 }
 0x812   :  { %v1593_v20 = vcombine.low %v1513_v54, %v1515_v16  ;;  %v1594_v14 = vcombine.low %v1584_v46, %v1586_v17 }
 0x814   :  { %v1597_v27 = vadd.f32 %v1782_v31, %v1593_v20  ;;  %v1598_v58 = vadd.f32 %v1783_v15, %v1594_v14 }
 0x816   :  { %v1784_v12 = vmul.f32 -1.442695, %v1597_v27  ;;  %v1785_v18 = vmul.f32 -1.442695, %v1598_v58  ;;  %v1612_v29 = vrot.slane %v1598_v58, 4 }
 0x818   :  { %1912 = vpow2.f32 %v1784_v12 }
 0x819   :  { %1914 = vpow2.f32 %v1785_v18 }
 0x825   :  { %v1913_v10 = vpop.eup %1912 }
 0x826   :  { %v1605_v35 = vadd.f32 1.0, %v1913_v10  ;;  %v1915_v21 = vpop.eup %1914 }
 0x827   :  { %v1606_v38 = vadd.f32 1.0, %v1915_v21 }
 0x828   :  { %1916 = vrcp.f32 %v1605_v35 }
 0x829   :  { %1918 = vtanh.f32 %v1612_v29 }
 0x82a   :  { %1920 = vrcp.f32 %v1606_v38 }
 0x835   :  { %v1917_v32 = vpop.eup %1916 }
 0x836   :  { %v1616_v36 = vrot.slane %v1917_v32, 4  ;;  %v1919_v55 = vpop.eup %1918 }
 0x837   :  { %v1619_v40 = vmul.f32 %v1919_v55, %v1917_v32  ;;  %v1921_v8 = vpop.eup %1920 }
 0x838   :  { %v1618_v42 = vmul.f32 %v1616_v36, %v3784_v39  ;;  %v1786_v39 = vld [vmem:[%s3906_s6] ss:$0 sm:$0xff] }
 0x83a   :  { %v1620_v44 = vadd.f32 %v1619_v40, %v1618_v42 }
 0x83c   :  { %1922 = vtanh.f32 %v1620_v44 }
 0x849   :  { %v1923_v52 = vpop.eup %1922 }
 0x84a   :  { %v1622_v57 = vmul.f32 %v1923_v52, %v1921_v8 }
 0x84c   :  { %v1624_v49 = vmul.f32 %v1622_v57, %v2776_v53  ;;  %v1623_v63 = vmul.f32 %v3598_v56, %v1622_v57 }
 0x84e   :  { %1721 = vmatprep.mubr.f32.mxu0 %v1624_v49 }
 0x84f   :  { %1722 = vmatmul.mubr.f32.vlgmr.msra.gmra.mxu0 %v1623_v63 }
 0x90f   :  { %v1819_v0 = vpop.f32.mrf.mxu0 }
 0x911   :  { %v1820_v2 = vpop.f32.mrf.mxu0 }
 0x912   :  { %v1821_v3 = vadd.f32 %v1820_v2, %v1819_v0 }
 0x914   :  { %v1728_v22 = vrot.slane %v1821_v3, 2 }
 0x916   :  { %v1730_v23 = vadd.f32 %v1821_v3, %v1728_v22 }
 0x918   :  { %v1738_v24 = vadd.f32 %v1786_v39, %v1730_v23 }
 0x91a   :  { %1740 = vst.msk [vmem:[#allocation5] sm:$0x3] %vm1739_vm0, %v1738_v24 }
 0x91b   :  { %2174 = shalt.err (!%p2171_p9)
}
 0x91c   :  { %1750 = dma.vmem_to_hbm [thread:$0]  %s1748_s29, 32, %s3907_s7, [#allocation4]  }
 0x91d   :  { %2185 = dma.done.wait [#allocation4], 32  }
 0x91e   :  { %2186 = vsyncadd [#allocation4], 4294967264 }
 0x91f   :  { %1754 = vsyncpa [#allocation3], 1 }
 0x920   :  { %1755 = vsyncpa [#allocation4], 1 }

</bundles_post_ra>
